<compile_context>
chip_gen: v5e
topology: v5e:2x2
jax: 0.10.0
libtpu: 0.0.40
codegen_flags: <defaults>
</compile_context>

<pallas_src>
import functools

import jax
import jax.numpy as jnp
from jax.experimental import pallas as pl
from jax.experimental.pallas import tpu as pltpu

EXACT_RECIPROCAL = False   # set True for training-grade parity (no approx rcp)


# --------------------------------------------------------------------------
# Fused kernel: affinity head + token Linear + masked softmax + seg matmul
# --------------------------------------------------------------------------
def fused_proxy_kernel(xmid_ref, x_ref, mask_ref,
                       wdw_ref, s1_ref, b1_ref, wpw_ref, s2_ref, b2_ref,
                       wfin_ref, bfin_ref, wmlp_ref, bmlp_ref,
                       out_ref, *, TH, W, K, C):
    Cin = xmid_ref.shape[-1]
    Wp = xmid_ref.shape[1]              # padded band width (>= W + 2, % 8 == 0)
    nine_k = 9 * K

    # ---------------- affinity branch: depthwise 3x3 + BN + ReLU -----------
    xm = xmid_ref[...]                                   # (TH+2, Wp, Cin) f32
    wdw = wdw_ref[...]                                   # (9, Cin)
    acc = jnp.zeros((TH, W, Cin), jnp.float32)
    for dy in range(3):
        for dx in range(3):
            acc = acc + xm[dy:dy + TH, dx:dx + W, :] * wdw[dy * 3 + dx][None, None, :]
    y1 = jnp.maximum(acc * s1_ref[...].reshape(1, 1, Cin)
                     + b1_ref[...].reshape(1, 1, Cin), 0.0)
    # TODO(synk): this merge is only a free relayout when W % 8 == 0; for odd
    # production widths it still lowers but materializes a copy.
    y1 = y1.reshape(TH * W, Cin)

    # pointwise 1x1 + BN + ReLU   (bf16 MXU inputs, f32 accumulate, f32 VPU)
    y2 = jnp.dot(y1.astype(jnp.bfloat16), wpw_ref[...],
                 preferred_element_type=jnp.float32)
    y2 = jnp.maximum(y2 * s2_ref[...] + b2_ref[...], 0.0)

    # final 1x1 conv -> 9*K affinity logits (+ bias), channel layout n*K + k
    aff = jnp.dot(y2.astype(jnp.bfloat16), wfin_ref[...],
                  preferred_element_type=jnp.float32) + bfin_ref[...]
    aff = aff.reshape(TH, W, nine_k)

    # ---------------- token logits: fused 1x1 Linear on the halo band ------
    # Wp % 8 == 0 -> this flatten is a free relayout.
    xb = x_ref[...].reshape((TH + 2) * Wp, Cin)
    tok = (jnp.dot(xb.astype(jnp.bfloat16), wmlp_ref[...],
                   preferred_element_type=jnp.float32) + bmlp_ref[...])
    tok = tok.reshape(TH + 2, Wp, C)
    # Out-of-image halo/pad positions hold `bias`, not 0, but they are only
    # ever multiplied by exactly-zero softmax weights (boundary mask), so they
    # never leak into the output.

    # ---------------- boundary-masked softmax over the 9 neighbours --------
    lg = aff + mask_ref[...]                             # ONE full-width add
    # Centre tap (n == 4) is never masked -> max stays finite (guards against
    # exp(-inf - (-inf)) = NaN if the mask construction ever changes).
    m = lg[:, :, 4 * K:5 * K]
    for n in range(9):
        if n != 4:
            m = jnp.maximum(m, lg[:, :, n * K:(n + 1) * K])
    m_rep = jnp.concatenate([m] * 9, axis=-1)            # (TH, W, 9K)
    e = jnp.exp(lg - m_rep)                              # single full-width EUP call
    denom = e[:, :, 0:K]
    for n in range(1, 9):
        denom = denom + e[:, :, n * K:(n + 1) * K]
    if EXACT_RECIPROCAL:
        inv = 1.0 / denom
    else:
        inv = pl.reciprocal(denom, approx=True)          # EUP slot, off VPU

    # ---------------- affinity x unfolded token logits (lane-dense) --------
    # Output lane layout: c*K + k  with k = h_idx*rw + w_idx  (128 lanes at
    # the test config -> unmasked full-width stores).
    trep = jnp.concatenate(
        [jnp.broadcast_to(tok[:, :, c:c + 1], (TH + 2, Wp, K)) for c in range(C)],
        axis=-1)                                         # (TH+2, Wp, C*K), built once
    acc2 = jnp.zeros((TH, W, C * K), jnp.float32)
    for n in range(9):
        dy, dx = n // 3, n % 3
        # TODO(synk): if bundle dumps show XLU binding, hoist/merge these
        # C-fold lane replications (2 XLU units on v6e/v7x).
        w_rep = jnp.concatenate([e[:, :, n * K:(n + 1) * K]] * C, axis=-1)
        acc2 = acc2 + w_rep * trep[dy:dy + TH, dx:dx + W, :]
    inv_rep = jnp.concatenate([inv] * C, axis=-1)
    out_ref[...] = acc2 * inv_rep                        # normalize once, full width


# --------------------------------------------------------------------------
# VMEM budgeting / tiling helpers
# --------------------------------------------------------------------------
def _vmem_budget_bytes():
    try:
        return int(pltpu.get_tpu_info().vmem_capacity_bytes)
    except Exception:
        return 64 * 1024 * 1024          # conservative (v7x per-core VMEM)


def _step_vmem_bytes(TH, W, Wp, Cin, Cmid, C, K):
    f32 = 4
    band = (TH + 2) * Wp * Cin * f32                 # one input band
    mask = TH * W * 9 * K * f32
    outb = TH * W * C * K * f32
    streamed = 2 * (2 * band + mask + outb)          # double-buffered blocks
    weights = 2 * f32 * (9 * Cin + 2 * Cin + Cin * Cmid + 2 * Cmid
                         + Cmid * 9 * K + 9 * K + Cin * C + C)
    temps = f32 * (TH * W * (Cin + Cmid + 2 * 9 * K + 2 * C * K)
                   + (TH + 2) * Wp * (C + C * K))    # in-kernel live values
    return streamed + weights + temps


def _pick_row_tile(H, W, Wp, Cin, Cmid, C, K, budget):
    # Largest divisor of H whose per-step footprint fits comfortably in the
    # scoped-VMEM budget (bigger tiles amortize the ~0.35us/step overhead;
    # smaller tiles are forced automatically on v7x's 64 MiB).
    cands = [d for d in range(min(H, 256), 0, -1) if H % d == 0]
    for th in cands:
        if _step_vmem_bytes(th, W, Wp, Cin, Cmid, C, K) <= 0.4 * budget:
            return th
    return cands[-1]


def _make_bands(xpad, TH):
    # (B, H+2, Wp, C) -> (B, nT, TH+2, Wp, C): overlapping row bands with a
    # 1-row halo each side (duplicates only 2 rows per tile in HBM).
    B, Hp, Wp, C = xpad.shape
    H = Hp - 2
    nT = H // TH
    rows = jnp.arange(nT)[:, None] * TH + jnp.arange(TH + 2)[None, :]
    return jnp.take(xpad, rows, axis=1)


# --------------------------------------------------------------------------
# pallas_call wrapper
# --------------------------------------------------------------------------
def fused_proxy_call(xmid_bands, x_bands, mask, params, TH, W, K, C, vmem_limit):
    B, nT, THp2, Wp, Cin = xmid_bands.shape
    Cmid = params["w_pw"].shape[-1]
    H = nT * TH
    kern = functools.partial(fused_proxy_kernel, TH=TH, W=W, K=K, C=C)

    def wspec(shape):
        return pl.BlockSpec(shape, lambda b, i: (0, 0))

    return pl.pallas_call(
        kern,
        out_shape=jax.ShapeDtypeStruct((B, H, W, C * K), jnp.float32),
        grid=(B, nT),
        in_specs=[
            pl.BlockSpec((None, None, THp2, Wp, Cin), lambda b, i: (b, i, 0, 0, 0)),
            pl.BlockSpec((None, None, THp2, Wp, Cin), lambda b, i: (b, i, 0, 0, 0)),
            pl.BlockSpec((TH, W, 9 * K), lambda b, i: (i, 0, 0)),
            wspec((9, Cin)),
            wspec((1, Cin)),
            wspec((1, Cin)),
            wspec((Cin, Cmid)),
            wspec((1, Cmid)),
            wspec((1, Cmid)),
            wspec((Cmid, 9 * K)),
            wspec((1, 9 * K)),
            wspec((Cin, C)),
            wspec((1, C)),
        ],
        out_specs=pl.BlockSpec((None, TH, W, C * K), lambda b, i: (b, i, 0, 0)),
        compiler_params=pltpu.CompilerParams(
            dimension_semantics=("parallel", "parallel"),
            vmem_limit_bytes=int(vmem_limit)),
    )(xmid_bands, x_bands, mask,
      params["w_dw9"], params["s1"], params["b1"],
      params["w_pw"].astype(jnp.bfloat16), params["s2"], params["b2"],
      params["w_fin"].astype(jnp.bfloat16), params["b_fin"],
      params["w_mlp"].astype(jnp.bfloat16), params["b_mlp"])


# --------------------------------------------------------------------------
# Full ProxyHead forward (glue in plain JAX, hot path in one Pallas kernel)
# --------------------------------------------------------------------------
def proxy_head_forward(x_mid_nchw, x_nchw, params, region_res=(4, 4)):
    rh, rw = region_res
    K = rh * rw
    x_mid = jnp.transpose(x_mid_nchw, (0, 2, 3, 1)).astype(jnp.float32)  # NHWC
    x = jnp.transpose(x_nchw, (0, 2, 3, 1)).astype(jnp.float32)
    B, H, W, Cin = x_mid.shape
    C = params["w_mlp"].shape[-1]          # num classes
    Cmid = params["w_pw"].shape[-1]
    # TODO(synk): for production class counts where C*K is not a multiple of
    # 128 the last output vreg per row is a masked store; pad C*K at the store
    # if that path ever dominates.

    # Sublane-friendly padded width: >= W+2 and a multiple of 8 so in-kernel
    # flattening of the halo band is a free relayout.  Extra right-pad columns
    # are never read by the shifted slices.
    Wp = -(-(W + 2) // 8) * 8
    pad_r = Wp - (W + 1)
    x_mid_p = jnp.pad(x_mid, ((0, 0), (1, 1), (1, pad_r), (0, 0)))
    x_p = jnp.pad(x, ((0, 0), (1, 1), (1, pad_r), (0, 0)))

    # Batch-invariant additive boundary mask, pre-expanded to 9*K lanes
    # (lane index n*K + k, matching the affinity channel layout).
    row = jnp.arange(H)[:, None, None]
    col = jnp.arange(W)[None, :, None]
    n = jnp.arange(9)[None, None, :]
    bad = (((n < 3) & (row == 0)) | ((n >= 6) & (row == H - 1))
           | ((n % 3 == 0) & (col == 0)) | ((n % 3 == 2) & (col == W - 1)))
    mask9 = jnp.where(bad, -jnp.inf, 0.0).astype(jnp.float32)   # (H, W, 9)
    mask = jnp.repeat(mask9, K, axis=-1)                        # (H, W, 9K)

    # Row-tile size from the per-generation VMEM budget; explicit vmem limit.
    budget = _vmem_budget_bytes()
    TH = _pick_row_tile(H, W, Wp, Cin, Cmid, C, K, budget)
    est = _step_vmem_bytes(TH, W, Wp, Cin, Cmid, C, K)
    vmem_limit = min(int(0.9 * budget), max(32 << 20, 2 * est))

    xmid_bands = _make_bands(x_mid_p, TH)    # (B, nT, TH+2, Wp, Cin)
    x_bands = _make_bands(x_p, TH)

    seg = fused_proxy_call(xmid_bands, x_bands, mask, params,
                           TH, W, K, C, vmem_limit)             # (B,H,W,C*K)

    # flat lane index = c*K + (h*rw + w)  ->  'B H W C h w -> B C (H h) (W w)'
    seg = seg.reshape(B, H, W, C, rh, rw)
    seg = seg.transpose(0, 3, 1, 4, 2, 5).reshape(B, C, H * rh, W * rw)
    return seg


# --------------------------------------------------------------------------
# Pure-JAX reference (same math, f32, no Pallas) for a correctness check
# --------------------------------------------------------------------------
def reference_forward(x_mid_nchw, x_nchw, params, region_res=(4, 4)):
    rh, rw = region_res
    x_mid = jnp.transpose(x_mid_nchw, (0, 2, 3, 1)).astype(jnp.float32)
    x = jnp.transpose(x_nchw, (0, 2, 3, 1)).astype(jnp.float32)
    B, H, W, Cin = x_mid.shape
    Ncls = params["w_mlp"].shape[-1]
    K = rh * rw

    xp = jnp.pad(x_mid, ((0, 0), (1, 1), (1, 1), (0, 0)))
    acc = jnp.zeros((B, H, W, Cin), jnp.float32)
    for dy in range(3):
        for dx in range(3):
            acc = acc + xp[:, dy:dy + H, dx:dx + W, :] * params["w_dw9"][dy * 3 + dx]
    y1 = jax.nn.relu(acc * params["s1"] + params["b1"])
    y2 = jax.nn.relu(jnp.einsum("bhwc,cd->bhwd", y1, params["w_pw"])
                     * params["s2"] + params["b2"])
    aff = jnp.einsum("bhwc,cd->bhwd", y2, params["w_fin"]) + params["b_fin"]
    aff = aff.reshape(B, H, W, 9, K)

    row = jnp.arange(H)[None, :, None, None, None]
    col = jnp.arange(W)[None, None, :, None, None]
    n_idx = jnp.arange(9)[None, None, None, :, None]
    mask = (((n_idx < 3) & (row == 0)) | ((n_idx >= 6) & (row == H - 1))
            | ((n_idx % 3 == 0) & (col == 0)) | ((n_idx % 3 == 2) & (col == W - 1)))
    aff = jnp.where(mask, -jnp.inf, aff)
    affw = jax.nn.softmax(aff, axis=3)                               # (B,H,W,9,K)

    tok = jnp.einsum("bhwc,cd->bhwd", x, params["w_mlp"]) + params["b_mlp"]
    tokp = jnp.pad(tok, ((0, 0), (1, 1), (1, 1), (0, 0)))
    seg = jnp.zeros((B, H, W, K, Ncls), jnp.float32)
    for n in range(9):
        dy, dx = n // 3, n % 3
        t = tokp[:, dy:dy + H, dx:dx + W, :]
        seg = seg + affw[:, :, :, n, :][..., None] * t[:, :, :, None, :]
    seg = seg.reshape(B, H, W, rh, rw, Ncls)
    return seg.transpose(0, 5, 1, 3, 2, 4).reshape(B, Ncls, H * rh, W * rw)


# --------------------------------------------------------------------------
# Deterministic parameter init (shapes follow the PyTorch __init__),
# eval-mode BatchNorm folded into per-channel scale / bias.
# --------------------------------------------------------------------------
def init_params(key, Cin, Cmid, num_classes, rh, rw):
    n_aff = 9 * rh * rw
    ks = jax.random.split(key, 14)
    eps = 1e-5
    w_dw = 0.2 * jax.random.normal(ks[0], (3, 3, Cin), jnp.float32)
    g1 = 1.0 + 0.1 * jax.random.normal(ks[1], (1, Cin), jnp.float32)
    be1 = 0.1 * jax.random.normal(ks[2], (1, Cin), jnp.float32)
    mu1 = 0.05 * jax.random.normal(ks[3], (1, Cin), jnp.float32)
    var1 = 1.0 + 0.1 * jnp.abs(jax.random.normal(ks[4], (1, Cin), jnp.float32))
    w_pw = 0.2 * jax.random.normal(ks[5], (Cin, Cmid), jnp.float32)
    g2 = 1.0 + 0.1 * jax.random.normal(ks[6], (1, Cmid), jnp.float32)
    be2 = 0.1 * jax.random.normal(ks[7], (1, Cmid), jnp.float32)
    mu2 = 0.05 * jax.random.normal(ks[8], (1, Cmid), jnp.float32)
    var2 = 1.0 + 0.1 * jnp.abs(jax.random.normal(ks[9], (1, Cmid), jnp.float32))
    w_fin = 0.2 * jax.random.normal(ks[10], (Cmid, n_aff), jnp.float32)
    b_fin = 0.05 * jax.random.normal(ks[11], (1, n_aff), jnp.float32)
    w_mlp = 0.02 * jax.random.normal(ks[12], (Cin, num_classes), jnp.float32)
    b_mlp = 0.02 * jax.random.normal(ks[13], (1, num_classes), jnp.float32)
    s1 = g1 / jnp.sqrt(var1 + eps)
    b1 = be1 - mu1 * s1
    s2 = g2 / jnp.sqrt(var2 + eps)
    b2 = be2 - mu2 * s2
    return {"w_dw9": w_dw.reshape(9, Cin), "s1": s1, "b1": b1,
            "w_pw": w_pw, "s2": s2, "b2": b2,
            "w_fin": w_fin, "b_fin": b_fin,
            "w_mlp": w_mlp, "b_mlp": b_mlp}


if __name__ == "__main__":
    key = jax.random.PRNGKey(0)
    B, Cin, Cmid, Ncls, H, W = 2, 8, 16, 8, 8, 8
    rh, rw = 4, 4

    k_in, k_par = jax.random.split(key)
    k1, k2 = jax.random.split(k_in)
    x_mid = jax.random.normal(k1, (B, Cin, H, W), jnp.float32)   # NCHW (PyTorch)
    x = jax.random.normal(k2, (B, Cin, H, W), jnp.float32)       # NCHW (PyTorch)
    params = init_params(k_par, Cin, Cmid, Ncls, rh, rw)

    out = proxy_head_forward(x_mid, x, params, (rh, rw))
    out = jax.block_until_ready(out)

    ref = reference_forward(x_mid, x, params, (rh, rw))
    assert out.shape == (B, Ncls, H * rh, W * rw), out.shape
    # bf16 MXU inputs + approx reciprocal -> slightly looser tolerance vs f32 ref
    assert bool(jnp.allclose(out, ref, rtol=1e-2, atol=1e-2)), \
        float(jnp.max(jnp.abs(out - ref)))
    print("KERNEL_OK")
</pallas_src>

<mosaic_0001>
module attributes {stable_mosaic.version = 11 : i64} {
  func.func @fused_proxy_kernel(%arg0: i32, %arg1: i32, %arg2: memref<1x1x10x16x8xf32, #tpu.memory_space<vmem>>, %arg3: memref<1x1x10x16x8xf32, #tpu.memory_space<vmem>>, %arg4: memref<8x8x144xf32, #tpu.memory_space<vmem>>, %arg5: memref<9x8xf32, #tpu.memory_space<vmem>>, %arg6: memref<1x8xf32, #tpu.memory_space<vmem>>, %arg7: memref<1x8xf32, #tpu.memory_space<vmem>>, %arg8: memref<8x16xbf16, #tpu.memory_space<vmem>>, %arg9: memref<1x16xf32, #tpu.memory_space<vmem>>, %arg10: memref<1x16xf32, #tpu.memory_space<vmem>>, %arg11: memref<16x144xbf16, #tpu.memory_space<vmem>>, %arg12: memref<1x144xf32, #tpu.memory_space<vmem>>, %arg13: memref<8x8xbf16, #tpu.memory_space<vmem>>, %arg14: memref<1x8xf32, #tpu.memory_space<vmem>>, %arg15: memref<1x8x8x128xf32, #tpu.memory_space<vmem>>) attributes {dimension_semantics = [#tpu.dimension_semantics<parallel>, #tpu.dimension_semantics<parallel>], iteration_bounds = array<i64: 2, 1>, scalar_prefetch = 0 : i64, scratch_operands = 0 : i64, tpu.core_type = #tpu.core_type<tc>, window_params = [{transform_indices = @transform_0, window_bounds = array<i64: 1, 1, 10, 16, 8>}, {transform_indices = @transform_1, window_bounds = array<i64: 1, 1, 10, 16, 8>}, {transform_indices = @transform_2, window_bounds = array<i64: 8, 8, 144>}, {pipeline_mode = #tpu.pipeline_mode<synchronous>, transform_indices = @transform_3, window_bounds = array<i64: 9, 8>}, {pipeline_mode = #tpu.pipeline_mode<synchronous>, transform_indices = @transform_4, window_bounds = array<i64: 1, 8>}, {pipeline_mode = #tpu.pipeline_mode<synchronous>, transform_indices = @transform_5, window_bounds = array<i64: 1, 8>}, {pipeline_mode = #tpu.pipeline_mode<synchronous>, transform_indices = @transform_6, window_bounds = array<i64: 8, 16>}, {pipeline_mode = #tpu.pipeline_mode<synchronous>, transform_indices = @transform_7, window_bounds = array<i64: 1, 16>}, {pipeline_mode = #tpu.pipeline_mode<synchronous>, transform_indices = @transform_8, window_bounds = array<i64: 1, 16>}, {pipeline_mode = #tpu.pipeline_mode<synchronous>, transform_indices = @transform_9, window_bounds = array<i64: 16, 144>}, {pipeline_mode = #tpu.pipeline_mode<synchronous>, transform_indices = @transform_10, window_bounds = array<i64: 1, 144>}, {pipeline_mode = #tpu.pipeline_mode<synchronous>, transform_indices = @transform_11, window_bounds = array<i64: 8, 8>}, {pipeline_mode = #tpu.pipeline_mode<synchronous>, transform_indices = @transform_12, window_bounds = array<i64: 1, 8>}, {transform_indices = @transform_13, window_bounds = array<i64: 1, 8, 8, 128>}]} {
    %c0 = arith.constant 0 : index
    %c0_0 = arith.constant 0 : index
    %c0_1 = arith.constant 0 : index
    %c0_2 = arith.constant 0 : index
    %c0_3 = arith.constant 0 : index
    %0 = vector.load %arg2[%c0, %c0_0, %c0_1, %c0_2, %c0_3] : memref<1x1x10x16x8xf32, #tpu.memory_space<vmem>>, vector<1x1x10x16x8xf32>
    %1 = vector.shape_cast %0 : vector<1x1x10x16x8xf32> to vector<10x16x8xf32>
    %c0_4 = arith.constant 0 : index
    %c0_5 = arith.constant 0 : index
    %2 = vector.load %arg5[%c0_4, %c0_5] : memref<9x8xf32, #tpu.memory_space<vmem>>, vector<9x8xf32>
    %cst = arith.constant 0.000000e+00 : f32
    %3 = vector.broadcast %cst : f32 to vector<8x8x8xf32>
    %4 = vector.extract_strided_slice %1 {offsets = [0, 0, 0], sizes = [8, 8, 8], strides = [1, 1, 1]} : vector<10x16x8xf32> to vector<8x8x8xf32>
    %5 = vector.extract_strided_slice %2 {offsets = [0, 0], sizes = [1, 8], strides = [1, 1]} : vector<9x8xf32> to vector<1x8xf32>
    %6 = vector.shape_cast %5 : vector<1x8xf32> to vector<8xf32>
    %7 = vector.shape_cast %6 : vector<8xf32> to vector<1x1x8xf32>
    %8 = vector.broadcast %7 : vector<1x1x8xf32> to vector<8x8x8xf32>
    %9 = arith.mulf %4, %8 : vector<8x8x8xf32>
    %10 = arith.addf %3, %9 : vector<8x8x8xf32>
    %11 = vector.extract_strided_slice %1 {offsets = [0, 1, 0], sizes = [8, 8, 8], strides = [1, 1, 1]} : vector<10x16x8xf32> to vector<8x8x8xf32>
    %12 = vector.extract_strided_slice %2 {offsets = [1, 0], sizes = [1, 8], strides = [1, 1]} : vector<9x8xf32> to vector<1x8xf32>
    %13 = vector.shape_cast %12 : vector<1x8xf32> to vector<8xf32>
    %14 = vector.shape_cast %13 : vector<8xf32> to vector<1x1x8xf32>
    %15 = vector.broadcast %14 : vector<1x1x8xf32> to vector<8x8x8xf32>
    %16 = arith.mulf %11, %15 : vector<8x8x8xf32>
    %17 = arith.addf %10, %16 : vector<8x8x8xf32>
    %18 = vector.extract_strided_slice %1 {offsets = [0, 2, 0], sizes = [8, 8, 8], strides = [1, 1, 1]} : vector<10x16x8xf32> to vector<8x8x8xf32>
    %19 = vector.extract_strided_slice %2 {offsets = [2, 0], sizes = [1, 8], strides = [1, 1]} : vector<9x8xf32> to vector<1x8xf32>
    %20 = vector.shape_cast %19 : vector<1x8xf32> to vector<8xf32>
    %21 = vector.shape_cast %20 : vector<8xf32> to vector<1x1x8xf32>
    %22 = vector.broadcast %21 : vector<1x1x8xf32> to vector<8x8x8xf32>
    %23 = arith.mulf %18, %22 : vector<8x8x8xf32>
    %24 = arith.addf %17, %23 : vector<8x8x8xf32>
    %25 = vector.extract_strided_slice %1 {offsets = [1, 0, 0], sizes = [8, 8, 8], strides = [1, 1, 1]} : vector<10x16x8xf32> to vector<8x8x8xf32>
    %26 = vector.extract_strided_slice %2 {offsets = [3, 0], sizes = [1, 8], strides = [1, 1]} : vector<9x8xf32> to vector<1x8xf32>
    %27 = vector.shape_cast %26 : vector<1x8xf32> to vector<8xf32>
    %28 = vector.shape_cast %27 : vector<8xf32> to vector<1x1x8xf32>
    %29 = vector.broadcast %28 : vector<1x1x8xf32> to vector<8x8x8xf32>
    %30 = arith.mulf %25, %29 : vector<8x8x8xf32>
    %31 = arith.addf %24, %30 : vector<8x8x8xf32>
    %32 = vector.extract_strided_slice %1 {offsets = [1, 1, 0], sizes = [8, 8, 8], strides = [1, 1, 1]} : vector<10x16x8xf32> to vector<8x8x8xf32>
    %33 = vector.extract_strided_slice %2 {offsets = [4, 0], sizes = [1, 8], strides = [1, 1]} : vector<9x8xf32> to vector<1x8xf32>
    %34 = vector.shape_cast %33 : vector<1x8xf32> to vector<8xf32>
    %35 = vector.shape_cast %34 : vector<8xf32> to vector<1x1x8xf32>
    %36 = vector.broadcast %35 : vector<1x1x8xf32> to vector<8x8x8xf32>
    %37 = arith.mulf %32, %36 : vector<8x8x8xf32>
    %38 = arith.addf %31, %37 : vector<8x8x8xf32>
    %39 = vector.extract_strided_slice %1 {offsets = [1, 2, 0], sizes = [8, 8, 8], strides = [1, 1, 1]} : vector<10x16x8xf32> to vector<8x8x8xf32>
    %40 = vector.extract_strided_slice %2 {offsets = [5, 0], sizes = [1, 8], strides = [1, 1]} : vector<9x8xf32> to vector<1x8xf32>
    %41 = vector.shape_cast %40 : vector<1x8xf32> to vector<8xf32>
    %42 = vector.shape_cast %41 : vector<8xf32> to vector<1x1x8xf32>
    %43 = vector.broadcast %42 : vector<1x1x8xf32> to vector<8x8x8xf32>
    %44 = arith.mulf %39, %43 : vector<8x8x8xf32>
    %45 = arith.addf %38, %44 : vector<8x8x8xf32>
    %46 = vector.extract_strided_slice %1 {offsets = [2, 0, 0], sizes = [8, 8, 8], strides = [1, 1, 1]} : vector<10x16x8xf32> to vector<8x8x8xf32>
    %47 = vector.extract_strided_slice %2 {offsets = [6, 0], sizes = [1, 8], strides = [1, 1]} : vector<9x8xf32> to vector<1x8xf32>
    %48 = vector.shape_cast %47 : vector<1x8xf32> to vector<8xf32>
    %49 = vector.shape_cast %48 : vector<8xf32> to vector<1x1x8xf32>
    %50 = vector.broadcast %49 : vector<1x1x8xf32> to vector<8x8x8xf32>
    %51 = arith.mulf %46, %50 : vector<8x8x8xf32>
    %52 = arith.addf %45, %51 : vector<8x8x8xf32>
    %53 = vector.extract_strided_slice %1 {offsets = [2, 1, 0], sizes = [8, 8, 8], strides = [1, 1, 1]} : vector<10x16x8xf32> to vector<8x8x8xf32>
    %54 = vector.extract_strided_slice %2 {offsets = [7, 0], sizes = [1, 8], strides = [1, 1]} : vector<9x8xf32> to vector<1x8xf32>
    %55 = vector.shape_cast %54 : vector<1x8xf32> to vector<8xf32>
    %56 = vector.shape_cast %55 : vector<8xf32> to vector<1x1x8xf32>
    %57 = vector.broadcast %56 : vector<1x1x8xf32> to vector<8x8x8xf32>
    %58 = arith.mulf %53, %57 : vector<8x8x8xf32>
    %59 = arith.addf %52, %58 : vector<8x8x8xf32>
    %60 = vector.extract_strided_slice %1 {offsets = [2, 2, 0], sizes = [8, 8, 8], strides = [1, 1, 1]} : vector<10x16x8xf32> to vector<8x8x8xf32>
    %61 = vector.extract_strided_slice %2 {offsets = [8, 0], sizes = [1, 8], strides = [1, 1]} : vector<9x8xf32> to vector<1x8xf32>
    %62 = vector.shape_cast %61 : vector<1x8xf32> to vector<8xf32>
    %63 = vector.shape_cast %62 : vector<8xf32> to vector<1x1x8xf32>
    %64 = vector.broadcast %63 : vector<1x1x8xf32> to vector<8x8x8xf32>
    %65 = arith.mulf %60, %64 : vector<8x8x8xf32>
    %66 = arith.addf %59, %65 : vector<8x8x8xf32>
    %c0_6 = arith.constant 0 : index
    %c0_7 = arith.constant 0 : index
    %67 = vector.load %arg6[%c0_6, %c0_7] : memref<1x8xf32, #tpu.memory_space<vmem>>, vector<1x8xf32>
    %68 = vector.shape_cast %67 : vector<1x8xf32> to vector<1x1x8xf32>
    %69 = vector.broadcast %68 : vector<1x1x8xf32> to vector<8x8x8xf32>
    %70 = arith.mulf %66, %69 : vector<8x8x8xf32>
    %c0_8 = arith.constant 0 : index
    %c0_9 = arith.constant 0 : index
    %71 = vector.load %arg7[%c0_8, %c0_9] : memref<1x8xf32, #tpu.memory_space<vmem>>, vector<1x8xf32>
    %72 = vector.shape_cast %71 : vector<1x8xf32> to vector<1x1x8xf32>
    %73 = vector.broadcast %72 : vector<1x1x8xf32> to vector<8x8x8xf32>
    %74 = arith.addf %70, %73 : vector<8x8x8xf32>
    %cst_10 = arith.constant 0.000000e+00 : f32
    %75 = vector.broadcast %cst_10 : f32 to vector<8x8x8xf32>
    %76 = arith.maximumf %74, %75 : vector<8x8x8xf32>
    %77 = vector.shape_cast %76 : vector<8x8x8xf32> to vector<64x8xf32>
    %78 = arith.truncf %77 : vector<64x8xf32> to vector<64x8xbf16>
    %c0_11 = arith.constant 0 : index
    %c0_12 = arith.constant 0 : index
    %79 = vector.load %arg8[%c0_11, %c0_12] : memref<8x16xbf16, #tpu.memory_space<vmem>>, vector<8x16xbf16>
    %cst_13 = arith.constant dense<0.000000e+00> : vector<64x16xf32>
    %80 = tpu.matmul %78, %79, %cst_13 {dimension_numbers = #tpu.dot_dimension_numbers<[1], [0], [0], [1], [0, 0, 1, 1], [], []>} : vector<64x8xbf16>, vector<8x16xbf16>, vector<64x16xf32> -> vector<64x16xf32>
    %c0_14 = arith.constant 0 : index
    %c0_15 = arith.constant 0 : index
    %81 = vector.load %arg9[%c0_14, %c0_15] : memref<1x16xf32, #tpu.memory_space<vmem>>, vector<1x16xf32>
    %82 = vector.broadcast %81 : vector<1x16xf32> to vector<64x16xf32>
    %83 = arith.mulf %80, %82 : vector<64x16xf32>
    %c0_16 = arith.constant 0 : index
    %c0_17 = arith.constant 0 : index
    %84 = vector.load %arg10[%c0_16, %c0_17] : memref<1x16xf32, #tpu.memory_space<vmem>>, vector<1x16xf32>
    %85 = vector.broadcast %84 : vector<1x16xf32> to vector<64x16xf32>
    %86 = arith.addf %83, %85 : vector<64x16xf32>
    %cst_18 = arith.constant 0.000000e+00 : f32
    %87 = vector.broadcast %cst_18 : f32 to vector<64x16xf32>
    %88 = arith.maximumf %86, %87 : vector<64x16xf32>
    %89 = arith.truncf %88 : vector<64x16xf32> to vector<64x16xbf16>
    %c0_19 = arith.constant 0 : index
    %c0_20 = arith.constant 0 : index
    %90 = vector.load %arg11[%c0_19, %c0_20] : memref<16x144xbf16, #tpu.memory_space<vmem>>, vector<16x144xbf16>
    %cst_21 = arith.constant dense<0.000000e+00> : vector<64x144xf32>
    %91 = tpu.matmul %89, %90, %cst_21 {dimension_numbers = #tpu.dot_dimension_numbers<[1], [0], [0], [1], [0, 0, 1, 1], [], []>} : vector<64x16xbf16>, vector<16x144xbf16>, vector<64x144xf32> -> vector<64x144xf32>
    %c0_22 = arith.constant 0 : index
    %c0_23 = arith.constant 0 : index
    %92 = vector.load %arg12[%c0_22, %c0_23] : memref<1x144xf32, #tpu.memory_space<vmem>>, vector<1x144xf32>
    %93 = vector.broadcast %92 : vector<1x144xf32> to vector<64x144xf32>
    %94 = arith.addf %91, %93 : vector<64x144xf32>
    %95 = vector.shape_cast %94 : vector<64x144xf32> to vector<8x8x144xf32>
    %c0_24 = arith.constant 0 : index
    %c0_25 = arith.constant 0 : index
    %c0_26 = arith.constant 0 : index
    %c0_27 = arith.constant 0 : index
    %c0_28 = arith.constant 0 : index
    %96 = vector.load %arg3[%c0_24, %c0_25, %c0_26, %c0_27, %c0_28] : memref<1x1x10x16x8xf32, #tpu.memory_space<vmem>>, vector<1x1x10x16x8xf32>
    %97 = vector.shape_cast %96 : vector<1x1x10x16x8xf32> to vector<10x16x8xf32>
    %98 = vector.shape_cast %97 : vector<10x16x8xf32> to vector<160x8xf32>
    %99 = arith.truncf %98 : vector<160x8xf32> to vector<160x8xbf16>
    %c0_29 = arith.constant 0 : index
    %c0_30 = arith.constant 0 : index
    %100 = vector.load %arg13[%c0_29, %c0_30] : memref<8x8xbf16, #tpu.memory_space<vmem>>, vector<8x8xbf16>
    %cst_31 = arith.constant dense<0.000000e+00> : vector<160x8xf32>
    %101 = tpu.matmul %99, %100, %cst_31 {dimension_numbers = #tpu.dot_dimension_numbers<[1], [0], [0], [1], [0, 0, 1, 1], [], []>} : vector<160x8xbf16>, vector<8x8xbf16>, vector<160x8xf32> -> vector<160x8xf32>
    %c0_32 = arith.constant 0 : index
    %c0_33 = arith.constant 0 : index
    %102 = vector.load %arg14[%c0_32, %c0_33] : memref<1x8xf32, #tpu.memory_space<vmem>>, vector<1x8xf32>
    %103 = vector.broadcast %102 : vector<1x8xf32> to vector<160x8xf32>
    %104 = arith.addf %101, %103 : vector<160x8xf32>
    %105 = vector.shape_cast %104 : vector<160x8xf32> to vector<10x16x8xf32>
    %c0_34 = arith.constant 0 : index
    %c0_35 = arith.constant 0 : index
    %c0_36 = arith.constant 0 : index
    %106 = vector.load %arg4[%c0_34, %c0_35, %c0_36] : memref<8x8x144xf32, #tpu.memory_space<vmem>>, vector<8x8x144xf32>
    %107 = arith.addf %95, %106 : vector<8x8x144xf32>
    %108 = vector.extract_strided_slice %107 {offsets = [0, 0, 64], sizes = [8, 8, 16], strides = [1, 1, 1]} : vector<8x8x144xf32> to vector<8x8x16xf32>
    %109 = vector.extract_strided_slice %107 {offsets = [0, 0, 0], sizes = [8, 8, 16], strides = [1, 1, 1]} : vector<8x8x144xf32> to vector<8x8x16xf32>
    %110 = arith.maximumf %108, %109 : vector<8x8x16xf32>
    %111 = vector.extract_strided_slice %107 {offsets = [0, 0, 16], sizes = [8, 8, 16], strides = [1, 1, 1]} : vector<8x8x144xf32> to vector<8x8x16xf32>
    %112 = arith.maximumf %110, %111 : vector<8x8x16xf32>
    %113 = vector.extract_strided_slice %107 {offsets = [0, 0, 32], sizes = [8, 8, 16], strides = [1, 1, 1]} : vector<8x8x144xf32> to vector<8x8x16xf32>
    %114 = arith.maximumf %112, %113 : vector<8x8x16xf32>
    %115 = vector.extract_strided_slice %107 {offsets = [0, 0, 48], sizes = [8, 8, 16], strides = [1, 1, 1]} : vector<8x8x144xf32> to vector<8x8x16xf32>
    %116 = arith.maximumf %114, %115 : vector<8x8x16xf32>
    %117 = vector.extract_strided_slice %107 {offsets = [0, 0, 80], sizes = [8, 8, 16], strides = [1, 1, 1]} : vector<8x8x144xf32> to vector<8x8x16xf32>
    %118 = arith.maximumf %116, %117 : vector<8x8x16xf32>
    %119 = vector.extract_strided_slice %107 {offsets = [0, 0, 96], sizes = [8, 8, 16], strides = [1, 1, 1]} : vector<8x8x144xf32> to vector<8x8x16xf32>
    %120 = arith.maximumf %118, %119 : vector<8x8x16xf32>
    %121 = vector.extract_strided_slice %107 {offsets = [0, 0, 112], sizes = [8, 8, 16], strides = [1, 1, 1]} : vector<8x8x144xf32> to vector<8x8x16xf32>
    %122 = arith.maximumf %120, %121 : vector<8x8x16xf32>
    %123 = vector.extract_strided_slice %107 {offsets = [0, 0, 128], sizes = [8, 8, 16], strides = [1, 1, 1]} : vector<8x8x144xf32> to vector<8x8x16xf32>
    %124 = arith.maximumf %122, %123 : vector<8x8x16xf32>
    %125 = tpu.concatenate %124, %124, %124, %124, %124, %124, %124, %124, %124 in 2 : vector<8x8x16xf32>, vector<8x8x16xf32>, vector<8x8x16xf32>, vector<8x8x16xf32>, vector<8x8x16xf32>, vector<8x8x16xf32>, vector<8x8x16xf32>, vector<8x8x16xf32>, vector<8x8x16xf32> -> vector<8x8x144xf32>
    %126 = arith.subf %107, %125 : vector<8x8x144xf32>
    %127 = math.exp %126 : vector<8x8x144xf32>
    %128 = vector.extract_strided_slice %127 {offsets = [0, 0, 0], sizes = [8, 8, 16], strides = [1, 1, 1]} : vector<8x8x144xf32> to vector<8x8x16xf32>
    %129 = vector.extract_strided_slice %127 {offsets = [0, 0, 16], sizes = [8, 8, 16], strides = [1, 1, 1]} : vector<8x8x144xf32> to vector<8x8x16xf32>
    %130 = arith.addf %128, %129 : vector<8x8x16xf32>
    %131 = vector.extract_strided_slice %127 {offsets = [0, 0, 32], sizes = [8, 8, 16], strides = [1, 1, 1]} : vector<8x8x144xf32> to vector<8x8x16xf32>
    %132 = arith.addf %130, %131 : vector<8x8x16xf32>
    %133 = vector.extract_strided_slice %127 {offsets = [0, 0, 48], sizes = [8, 8, 16], strides = [1, 1, 1]} : vector<8x8x144xf32> to vector<8x8x16xf32>
    %134 = arith.addf %132, %133 : vector<8x8x16xf32>
    %135 = vector.extract_strided_slice %127 {offsets = [0, 0, 64], sizes = [8, 8, 16], strides = [1, 1, 1]} : vector<8x8x144xf32> to vector<8x8x16xf32>
    %136 = arith.addf %134, %135 : vector<8x8x16xf32>
    %137 = vector.extract_strided_slice %127 {offsets = [0, 0, 80], sizes = [8, 8, 16], strides = [1, 1, 1]} : vector<8x8x144xf32> to vector<8x8x16xf32>
    %138 = arith.addf %136, %137 : vector<8x8x16xf32>
    %139 = vector.extract_strided_slice %127 {offsets = [0, 0, 96], sizes = [8, 8, 16], strides = [1, 1, 1]} : vector<8x8x144xf32> to vector<8x8x16xf32>
    %140 = arith.addf %138, %139 : vector<8x8x16xf32>
    %141 = vector.extract_strided_slice %127 {offsets = [0, 0, 112], sizes = [8, 8, 16], strides = [1, 1, 1]} : vector<8x8x144xf32> to vector<8x8x16xf32>
    %142 = arith.addf %140, %141 : vector<8x8x16xf32>
    %143 = vector.extract_strided_slice %127 {offsets = [0, 0, 128], sizes = [8, 8, 16], strides = [1, 1, 1]} : vector<8x8x144xf32> to vector<8x8x16xf32>
    %144 = arith.addf %142, %143 : vector<8x8x16xf32>
    %145 = tpu.reciprocal %144 {approx = true} : vector<8x8x16xf32> -> vector<8x8x16xf32>
    %146 = vector.extract_strided_slice %105 {offsets = [0, 0, 0], sizes = [10, 16, 1], strides = [1, 1, 1]} : vector<10x16x8xf32> to vector<10x16x1xf32>
    %147 = vector.shape_cast %146 : vector<10x16x1xf32> to vector<10x16x1xf32>
    %148 = vector.broadcast %147 : vector<10x16x1xf32> to vector<10x16x16xf32>
    %149 = vector.extract_strided_slice %105 {offsets = [0, 0, 1], sizes = [10, 16, 1], strides = [1, 1, 1]} : vector<10x16x8xf32> to vector<10x16x1xf32>
    %150 = vector.shape_cast %149 : vector<10x16x1xf32> to vector<10x16x1xf32>
    %151 = vector.broadcast %150 : vector<10x16x1xf32> to vector<10x16x16xf32>
    %152 = vector.extract_strided_slice %105 {offsets = [0, 0, 2], sizes = [10, 16, 1], strides = [1, 1, 1]} : vector<10x16x8xf32> to vector<10x16x1xf32>
    %153 = vector.shape_cast %152 : vector<10x16x1xf32> to vector<10x16x1xf32>
    %154 = vector.broadcast %153 : vector<10x16x1xf32> to vector<10x16x16xf32>
    %155 = vector.extract_strided_slice %105 {offsets = [0, 0, 3], sizes = [10, 16, 1], strides = [1, 1, 1]} : vector<10x16x8xf32> to vector<10x16x1xf32>
    %156 = vector.shape_cast %155 : vector<10x16x1xf32> to vector<10x16x1xf32>
    %157 = vector.broadcast %156 : vector<10x16x1xf32> to vector<10x16x16xf32>
    %158 = vector.extract_strided_slice %105 {offsets = [0, 0, 4], sizes = [10, 16, 1], strides = [1, 1, 1]} : vector<10x16x8xf32> to vector<10x16x1xf32>
    %159 = vector.shape_cast %158 : vector<10x16x1xf32> to vector<10x16x1xf32>
    %160 = vector.broadcast %159 : vector<10x16x1xf32> to vector<10x16x16xf32>
    %161 = vector.extract_strided_slice %105 {offsets = [0, 0, 5], sizes = [10, 16, 1], strides = [1, 1, 1]} : vector<10x16x8xf32> to vector<10x16x1xf32>
    %162 = vector.shape_cast %161 : vector<10x16x1xf32> to vector<10x16x1xf32>
    %163 = vector.broadcast %162 : vector<10x16x1xf32> to vector<10x16x16xf32>
    %164 = vector.extract_strided_slice %105 {offsets = [0, 0, 6], sizes = [10, 16, 1], strides = [1, 1, 1]} : vector<10x16x8xf32> to vector<10x16x1xf32>
    %165 = vector.shape_cast %164 : vector<10x16x1xf32> to vector<10x16x1xf32>
    %166 = vector.broadcast %165 : vector<10x16x1xf32> to vector<10x16x16xf32>
    %167 = vector.extract_strided_slice %105 {offsets = [0, 0, 7], sizes = [10, 16, 1], strides = [1, 1, 1]} : vector<10x16x8xf32> to vector<10x16x1xf32>
    %168 = vector.shape_cast %167 : vector<10x16x1xf32> to vector<10x16x1xf32>
    %169 = vector.broadcast %168 : vector<10x16x1xf32> to vector<10x16x16xf32>
    %170 = tpu.concatenate %148, %151, %154, %157, %160, %163, %166, %169 in 2 : vector<10x16x16xf32>, vector<10x16x16xf32>, vector<10x16x16xf32>, vector<10x16x16xf32>, vector<10x16x16xf32>, vector<10x16x16xf32>, vector<10x16x16xf32>, vector<10x16x16xf32> -> vector<10x16x128xf32>
    %cst_37 = arith.constant 0.000000e+00 : f32
    %171 = vector.broadcast %cst_37 : f32 to vector<8x8x128xf32>
    %172 = vector.extract_strided_slice %127 {offsets = [0, 0, 0], sizes = [8, 8, 16], strides = [1, 1, 1]} : vector<8x8x144xf32> to vector<8x8x16xf32>
    %173 = tpu.concatenate %172, %172, %172, %172, %172, %172, %172, %172 in 2 : vector<8x8x16xf32>, vector<8x8x16xf32>, vector<8x8x16xf32>, vector<8x8x16xf32>, vector<8x8x16xf32>, vector<8x8x16xf32>, vector<8x8x16xf32>, vector<8x8x16xf32> -> vector<8x8x128xf32>
    %174 = vector.extract_strided_slice %170 {offsets = [0, 0, 0], sizes = [8, 8, 128], strides = [1, 1, 1]} : vector<10x16x128xf32> to vector<8x8x128xf32>
    %175 = arith.mulf %173, %174 : vector<8x8x128xf32>
    %176 = arith.addf %171, %175 : vector<8x8x128xf32>
    %177 = vector.extract_strided_slice %127 {offsets = [0, 0, 16], sizes = [8, 8, 16], strides = [1, 1, 1]} : vector<8x8x144xf32> to vector<8x8x16xf32>
    %178 = tpu.concatenate %177, %177, %177, %177, %177, %177, %177, %177 in 2 : vector<8x8x16xf32>, vector<8x8x16xf32>, vector<8x8x16xf32>, vector<8x8x16xf32>, vector<8x8x16xf32>, vector<8x8x16xf32>, vector<8x8x16xf32>, vector<8x8x16xf32> -> vector<8x8x128xf32>
    %179 = vector.extract_strided_slice %170 {offsets = [0, 1, 0], sizes = [8, 8, 128], strides = [1, 1, 1]} : vector<10x16x128xf32> to vector<8x8x128xf32>
    %180 = arith.mulf %178, %179 : vector<8x8x128xf32>
    %181 = arith.addf %176, %180 : vector<8x8x128xf32>
    %182 = vector.extract_strided_slice %127 {offsets = [0, 0, 32], sizes = [8, 8, 16], strides = [1, 1, 1]} : vector<8x8x144xf32> to vector<8x8x16xf32>
    %183 = tpu.concatenate %182, %182, %182, %182, %182, %182, %182, %182 in 2 : vector<8x8x16xf32>, vector<8x8x16xf32>, vector<8x8x16xf32>, vector<8x8x16xf32>, vector<8x8x16xf32>, vector<8x8x16xf32>, vector<8x8x16xf32>, vector<8x8x16xf32> -> vector<8x8x128xf32>
    %184 = vector.extract_strided_slice %170 {offsets = [0, 2, 0], sizes = [8, 8, 128], strides = [1, 1, 1]} : vector<10x16x128xf32> to vector<8x8x128xf32>
    %185 = arith.mulf %183, %184 : vector<8x8x128xf32>
    %186 = arith.addf %181, %185 : vector<8x8x128xf32>
    %187 = vector.extract_strided_slice %127 {offsets = [0, 0, 48], sizes = [8, 8, 16], strides = [1, 1, 1]} : vector<8x8x144xf32> to vector<8x8x16xf32>
    %188 = tpu.concatenate %187, %187, %187, %187, %187, %187, %187, %187 in 2 : vector<8x8x16xf32>, vector<8x8x16xf32>, vector<8x8x16xf32>, vector<8x8x16xf32>, vector<8x8x16xf32>, vector<8x8x16xf32>, vector<8x8x16xf32>, vector<8x8x16xf32> -> vector<8x8x128xf32>
    %189 = vector.extract_strided_slice %170 {offsets = [1, 0, 0], sizes = [8, 8, 128], strides = [1, 1, 1]} : vector<10x16x128xf32> to vector<8x8x128xf32>
    %190 = arith.mulf %188, %189 : vector<8x8x128xf32>
    %191 = arith.addf %186, %190 : vector<8x8x128xf32>
    %192 = vector.extract_strided_slice %127 {offsets = [0, 0, 64], sizes = [8, 8, 16], strides = [1, 1, 1]} : vector<8x8x144xf32> to vector<8x8x16xf32>
    %193 = tpu.concatenate %192, %192, %192, %192, %192, %192, %192, %192 in 2 : vector<8x8x16xf32>, vector<8x8x16xf32>, vector<8x8x16xf32>, vector<8x8x16xf32>, vector<8x8x16xf32>, vector<8x8x16xf32>, vector<8x8x16xf32>, vector<8x8x16xf32> -> vector<8x8x128xf32>
    %194 = vector.extract_strided_slice %170 {offsets = [1, 1, 0], sizes = [8, 8, 128], strides = [1, 1, 1]} : vector<10x16x128xf32> to vector<8x8x128xf32>
    %195 = arith.mulf %193, %194 : vector<8x8x128xf32>
    %196 = arith.addf %191, %195 : vector<8x8x128xf32>
    %197 = vector.extract_strided_slice %127 {offsets = [0, 0, 80], sizes = [8, 8, 16], strides = [1, 1, 1]} : vector<8x8x144xf32> to vector<8x8x16xf32>
    %198 = tpu.concatenate %197, %197, %197, %197, %197, %197, %197, %197 in 2 : vector<8x8x16xf32>, vector<8x8x16xf32>, vector<8x8x16xf32>, vector<8x8x16xf32>, vector<8x8x16xf32>, vector<8x8x16xf32>, vector<8x8x16xf32>, vector<8x8x16xf32> -> vector<8x8x128xf32>
    %199 = vector.extract_strided_slice %170 {offsets = [1, 2, 0], sizes = [8, 8, 128], strides = [1, 1, 1]} : vector<10x16x128xf32> to vector<8x8x128xf32>
    %200 = arith.mulf %198, %199 : vector<8x8x128xf32>
    %201 = arith.addf %196, %200 : vector<8x8x128xf32>
    %202 = vector.extract_strided_slice %127 {offsets = [0, 0, 96], sizes = [8, 8, 16], strides = [1, 1, 1]} : vector<8x8x144xf32> to vector<8x8x16xf32>
    %203 = tpu.concatenate %202, %202, %202, %202, %202, %202, %202, %202 in 2 : vector<8x8x16xf32>, vector<8x8x16xf32>, vector<8x8x16xf32>, vector<8x8x16xf32>, vector<8x8x16xf32>, vector<8x8x16xf32>, vector<8x8x16xf32>, vector<8x8x16xf32> -> vector<8x8x128xf32>
    %204 = vector.extract_strided_slice %170 {offsets = [2, 0, 0], sizes = [8, 8, 128], strides = [1, 1, 1]} : vector<10x16x128xf32> to vector<8x8x128xf32>
    %205 = arith.mulf %203, %204 : vector<8x8x128xf32>
    %206 = arith.addf %201, %205 : vector<8x8x128xf32>
    %207 = vector.extract_strided_slice %127 {offsets = [0, 0, 112], sizes = [8, 8, 16], strides = [1, 1, 1]} : vector<8x8x144xf32> to vector<8x8x16xf32>
    %208 = tpu.concatenate %207, %207, %207, %207, %207, %207, %207, %207 in 2 : vector<8x8x16xf32>, vector<8x8x16xf32>, vector<8x8x16xf32>, vector<8x8x16xf32>, vector<8x8x16xf32>, vector<8x8x16xf32>, vector<8x8x16xf32>, vector<8x8x16xf32> -> vector<8x8x128xf32>
    %209 = vector.extract_strided_slice %170 {offsets = [2, 1, 0], sizes = [8, 8, 128], strides = [1, 1, 1]} : vector<10x16x128xf32> to vector<8x8x128xf32>
    %210 = arith.mulf %208, %209 : vector<8x8x128xf32>
    %211 = arith.addf %206, %210 : vector<8x8x128xf32>
    %212 = vector.extract_strided_slice %127 {offsets = [0, 0, 128], sizes = [8, 8, 16], strides = [1, 1, 1]} : vector<8x8x144xf32> to vector<8x8x16xf32>
    %213 = tpu.concatenate %212, %212, %212, %212, %212, %212, %212, %212 in 2 : vector<8x8x16xf32>, vector<8x8x16xf32>, vector<8x8x16xf32>, vector<8x8x16xf32>, vector<8x8x16xf32>, vector<8x8x16xf32>, vector<8x8x16xf32>, vector<8x8x16xf32> -> vector<8x8x128xf32>
    %214 = vector.extract_strided_slice %170 {offsets = [2, 2, 0], sizes = [8, 8, 128], strides = [1, 1, 1]} : vector<10x16x128xf32> to vector<8x8x128xf32>
    %215 = arith.mulf %213, %214 : vector<8x8x128xf32>
    %216 = arith.addf %211, %215 : vector<8x8x128xf32>
    %217 = tpu.concatenate %145, %145, %145, %145, %145, %145, %145, %145 in 2 : vector<8x8x16xf32>, vector<8x8x16xf32>, vector<8x8x16xf32>, vector<8x8x16xf32>, vector<8x8x16xf32>, vector<8x8x16xf32>, vector<8x8x16xf32>, vector<8x8x16xf32> -> vector<8x8x128xf32>
    %218 = arith.mulf %216, %217 : vector<8x8x128xf32>
    %c0_38 = arith.constant 0 : index
    %c0_39 = arith.constant 0 : index
    %c0_40 = arith.constant 0 : index
    %c0_41 = arith.constant 0 : index
    %219 = vector.load %arg15[%c0_38, %c0_39, %c0_40, %c0_41] : memref<1x8x8x128xf32, #tpu.memory_space<vmem>>, vector<1x8x8x128xf32>
    %220 = vector.shape_cast %219 : vector<1x8x8x128xf32> to vector<8x8x128xf32>
    %221 = vector.shape_cast %218 : vector<8x8x128xf32> to vector<1x8x8x128xf32>
    tpu.vector_store %arg15[%c0_38, %c0_39, %c0_40, %c0_41], %221 {strides = array<i32>} : memref<1x8x8x128xf32, #tpu.memory_space<vmem>>, vector<1x8x8x128xf32>,
    return
  }
  func.func @transform_0(%arg0: i32, %arg1: i32) -> (i32, i32, i32, i32, i32) {
    %c0_i32 = arith.constant 0 : i32
    %c0_i32_0 = arith.constant 0 : i32
    %c0_i32_1 = arith.constant 0 : i32
    %c0_i32_2 = arith.constant 0 : i32
    return %arg0, %arg1, %c0_i32, %c0_i32_0, %c0_i32_1 : i32, i32, i32, i32, i32
  }
  func.func @transform_1(%arg0: i32, %arg1: i32) -> (i32, i32, i32, i32, i32) {
    %c0_i32 = arith.constant 0 : i32
    %c0_i32_0 = arith.constant 0 : i32
    %c0_i32_1 = arith.constant 0 : i32
    %c0_i32_2 = arith.constant 0 : i32
    return %arg0, %arg1, %c0_i32, %c0_i32_0, %c0_i32_1 : i32, i32, i32, i32, i32
  }
  func.func @transform_2(%arg0: i32, %arg1: i32) -> (i32, i32, i32) {
    %c0_i32 = arith.constant 0 : i32
    %c0_i32_0 = arith.constant 0 : i32
    %c0_i32_1 = arith.constant 0 : i32
    return %arg1, %c0_i32, %c0_i32_0 : i32, i32, i32
  }
  func.func @transform_3(%arg0: i32, %arg1: i32) -> (i32, i32) {
    %c0_i32 = arith.constant 0 : i32
    %c0_i32_0 = arith.constant 0 : i32
    %c0_i32_1 = arith.constant 0 : i32
    return %c0_i32, %c0_i32_0 : i32, i32
  }
  func.func @transform_4(%arg0: i32, %arg1: i32) -> (i32, i32) {
    %c0_i32 = arith.constant 0 : i32
    %c0_i32_0 = arith.constant 0 : i32
    %c0_i32_1 = arith.constant 0 : i32
    return %c0_i32, %c0_i32_0 : i32, i32
  }
  func.func @transform_5(%arg0: i32, %arg1: i32) -> (i32, i32) {
    %c0_i32 = arith.constant 0 : i32
    %c0_i32_0 = arith.constant 0 : i32
    %c0_i32_1 = arith.constant 0 : i32
    return %c0_i32, %c0_i32_0 : i32, i32
  }
  func.func @transform_6(%arg0: i32, %arg1: i32) -> (i32, i32) {
    %c0_i32 = arith.constant 0 : i32
    %c0_i32_0 = arith.constant 0 : i32
    %c0_i32_1 = arith.constant 0 : i32
    return %c0_i32, %c0_i32_0 : i32, i32
  }
  func.func @transform_7(%arg0: i32, %arg1: i32) -> (i32, i32) {
    %c0_i32 = arith.constant 0 : i32
    %c0_i32_0 = arith.constant 0 : i32
    %c0_i32_1 = arith.constant 0 : i32
    return %c0_i32, %c0_i32_0 : i32, i32
  }
  func.func @transform_8(%arg0: i32, %arg1: i32) -> (i32, i32) {
    %c0_i32 = arith.constant 0 : i32
    %c0_i32_0 = arith.constant 0 : i32
    %c0_i32_1 = arith.constant 0 : i32
    return %c0_i32, %c0_i32_0 : i32, i32
  }
  func.func @transform_9(%arg0: i32, %arg1: i32) -> (i32, i32) {
    %c0_i32 = arith.constant 0 : i32
    %c0_i32_0 = arith.constant 0 : i32
    %c0_i32_1 = arith.constant 0 : i32
    return %c0_i32, %c0_i32_0 : i32, i32
  }
  func.func @transform_10(%arg0: i32, %arg1: i32) -> (i32, i32) {
    %c0_i32 = arith.constant 0 : i32
    %c0_i32_0 = arith.constant 0 : i32
    %c0_i32_1 = arith.constant 0 : i32
    return %c0_i32, %c0_i32_0 : i32, i32
  }
  func.func @transform_11(%arg0: i32, %arg1: i32) -> (i32, i32) {
    %c0_i32 = arith.constant 0 : i32
    %c0_i32_0 = arith.constant 0 : i32
    %c0_i32_1 = arith.constant 0 : i32
    return %c0_i32, %c0_i32_0 : i32, i32
  }
  func.func @transform_12(%arg0: i32, %arg1: i32) -> (i32, i32) {
    %c0_i32 = arith.constant 0 : i32
    %c0_i32_0 = arith.constant 0 : i32
    %c0_i32_1 = arith.constant 0 : i32
    return %c0_i32, %c0_i32_0 : i32, i32
  }
  func.func @transform_13(%arg0: i32, %arg1: i32) -> (i32, i32, i32, i32) {
    %c0_i32 = arith.constant 0 : i32
    %c0_i32_0 = arith.constant 0 : i32
    %c0_i32_1 = arith.constant 0 : i32
    return %arg0, %arg1, %c0_i32, %c0_i32_0 : i32, i32, i32, i32
  }
}

</mosaic_0001>

<bundles_post_ra>
// kernel: tpu_custom_call.1
= control target key start
LH: loop header
LB: loop body
LE: loop exit
PB: predicated region body
PF: predicated region fallthrough
CT: control target
= control target key end

     0   :  { %s8944_s0 = inlined_call_operand.vmem [shape: f32[2,1,10,16,8], index: 0, kind: input, shape index: {}]   ;;  %s8945_s1 = inlined_call_operand.vmem [shape: f32[2,1,10,16,8], index: 1, kind: input, shape index: {}]   ;;  %s8946_s2 = inlined_call_operand.vmem [shape: f32[8,8,144], index: 2, kind: input, shape index: {}]   ;;  %s8947_s3 = inlined_call_operand.vmem [shape: f32[9,8], index: 3, kind: input, shape index: {}]   ;;  %s8948_s4 = inlined_call_operand.vmem [shape: f32[1,8], index: 4, kind: input, shape index: {}]   ;;  %s8949_s5 = inlined_call_operand.vmem [shape: f32[1,8], index: 5, kind: input, shape index: {}]   ;;  %s8950_s6 = inlined_call_operand.vmem [shape: bf16[8,16], index: 6, kind: input, shape index: {}]   ;;  %s8951_s7 = inlined_call_operand.vmem [shape: f32[1,16], index: 7, kind: input, shape index: {}]   ;;  %s8952_s8 = inlined_call_operand.vmem [shape: f32[1,16], index: 8, kind: input, shape index: {}]   ;;  %s8953_s9 = inlined_call_operand.vmem [shape: bf16[16,144], index: 9, kind: input, shape index: {}]   ;;  %s8954_s10 = inlined_call_operand.vmem [shape: f32[1,144], index: 10, kind: input, shape index: {}]   ;;  %s8955_s11 = inlined_call_operand.vmem [shape: bf16[8,8], index: 11, kind: input, shape index: {}]   ;;  %s8956_s12 = inlined_call_operand.vmem [shape: f32[1,8], index: 12, kind: input, shape index: {}]   ;;  %s8957_s13 = inlined_call_operand.hbm [shape: f32[2,8,8,128], index: 13, kind: output, shape index: {}]  }
   0x1   :  { %9053 = sst [smem:[#allocation156_spill]] %s8944_s0 }
   0x2   :  { %9054 = sst [smem:[#allocation157_spill]] %s8945_s1 }
   0x3   :  { %9055 = sst [smem:[#allocation158_spill]] %s8947_s3 }
   0x4   :  { %18 = vsyncpa [#allocation3], 0 }
   0x5   :  { %20 = vsyncpa [#allocation3 + $0x1], 0  ;;  %s4739_s25 = smov 0   ;;  %s4741_s26 = smov 0  }
   0x6   :  { %s4743_s27 = smov 0   ;;  %s4745_s28 = smov 0  }
   0x7   :  { %s4747_s29 = smov 0   ;;  %s4749_s30 = smov 0  }
   0x8 LB: > { %s4322_s14 = sadd.s32 4294967295, %s4650_s30   ;;  %s4323_s15 = sadd.s32 4294967294, %s4650_s30   ;;  %s4650_s30 = sphi %s4749_s30, %s26_s30   ;;  %s4646_s29 = sphi %s4747_s29, %s9597_s29   ;;  %s4642_s28 = sphi %s4745_s28, %s9596_s28   ;;  %s4638_s27 = sphi %s4743_s27, %s9595_s27   ;;  %s4634_s26 = sphi %s4741_s26, %s9594_s26   ;;  %s4630_s25 = sphi %s4739_s25, %s9593_s25  }
   0x9   : > { %s38_s16 = sadd.s32 1, %s4646_s29  ;;  %s339_s17 = sadd.s32 1, %s4638_s27 }
   0xa   : > { %p40_p0 = scmp.ge.s32.totalorder %s38_s16, 2  ;;  %p349_p1 = scmp.ne.s32.totalorder %s4638_s27, %s4634_s26 }
   0xb   : > { %p350_p2 = scmp.eq.s32.totalorder %s4322_s14, 1  ;;  %p355_p3 = scmp.ne.s32.totalorder %s4634_s26, %s4630_s25 }
   0xc   : > { %s9599_s16 = smov (%p40_p0, %s38_s16), 0  ;;  %p356_p5 = scmp.eq.s32.totalorder %s4323_s15, 1 }
   0xd   : > { %9056 = sst [smem:[#allocation5_spill]] %s9599_s16  ;;  %p4779_p4 = por %p350_p2, %p349_p1 }
   0xe   : > { %s334_s19 = ssub.s32 %s4646_s29, %s9599_s16  ;;  %p4327_p6 = scmp.ge.s32.totalorder %s4650_s30, 1 }
   0xf   : > { %p337_p7 = scmp.eq.s32.totalorder %s334_s19, 0  ;;  %p4786_p8 = por %p356_p5, %p355_p3 }
  0x10   : > { %p438_p9 = scmp.lt.s32.totalorder %s4650_s30, 3 }
  0x11   : > { %s4792_s21 = scalar_select %p337_p7, %s4638_s27, %s339_s17  }
  0x12   : > { %p439_p10 = pnand %p4327_p6, %p438_p9 }
  0x14   : > { %442 = sbr.rel (%p439_p10) target bundleno = 1555 (0x613), region = 72 }
  0x19   : > { %vm1091_vm0 = vcmask 1043456   ;;  %v1279_v0 = vld [vmem:[%s8955_s11] sm:$0xf]  ;;  %p501_p11 = scmp.lt.s32.totalorder %s4642_s28, 1  ;;  %s9059_s3 = sld [smem:[#allocation158_spill]]  ;;  %vm1078_vm1 = vcmask 64512  }
  0x1a   : > { %v1315_v1 = vsel %vm1091_vm0, %v1279_v0, 0  ;;  %v1077_v2 = vld [vmem:[%s8950_s6] sm:$0xf]  ;;  %vm600_vm2 = vcmask 1046528   ;;  %s9060_s0 = sld [smem:[#allocation156_spill]]  ;;  %vm674_vm3 = vcmask 1045504  }
  0x1b   : > { %4371 = vmatpush.bf16.msra.mxu3 %v1315_v1  ;;  %s502_s15 = scalar_select %p501_p11, %s4642_s28, 1  ;;  %v1093_v3 = vsel %vm1091_vm0, %v1077_v2, 0  ;;  %vm1178_vm4 = vcmask 130048   ;;  %vm1873_vm5 = vcmask 392192   ;;  %vm1864_vm6 = vcmask 261120  }
  0x1c   : > { %1102 = vmatpush.bf16.msra.mxu0 %v1093_v3  ;;  %4369 = vmatpush.bf16.msra.mxu1 %v1093_v3  ;;  %s9061_s1 = sld [smem:[#allocation157_spill]]  ;;  %s8967_s19 = smov 16   ;;  %vm1882_vm7 = vcmask 523264   ;;  %vm1891_vm8 = vcmask 654336   ;;  %vm1900_vm9 = vcmask 785408   ;;  %vm1909_vm10 = vcmask 916480  }
  0x1d   : > { %s4372_s16 = smul.u32 160, %s502_s15  ;;  %4370 = vmatpush.bf16.msra.mxu2 %v1093_v3  ;;  %s8959_s22 = smov 80  }
  0x1e   : > { %s8973_s17 = smov 48   ;;  %s9110_s23 = smov 32  }
  0x1f   : > { %v548_v4 = vld [vmem:[%s9059_s3] sm:$0xff]  ;;  %s9115_s14 = smov 96  }
  0x20   : > { %1324 = vmatpush.bf16.msrb.mxu0 %v1315_v1  ;;  %v4805_v5 = vperm.slane %v548_v4, 0  ;;  %v4807_v6 = vperm.slane %v548_v4, 1  ;;  %v4809_v7 = vperm.slane %v548_v4, 2  ;;  %s4814_s24 = scalar_lea.vmem %s9060_s0, %s4372_s16  ;;  %v4826_v11 = vperm.slane %v548_v4, 3  ;;  %s9119_s0 = smov 48  }
  0x21   : > { %v4828_v12 = vperm.slane %v548_v4, 4  ;;  %v528_v15 = vld [vmem:[%s4814_s24] sm:$0xff]  ;;  %v529_v16 = vld [vmem:[%s4814_s24 + $0x8] sm:$0xff]  ;;  %v4835_v17 = vperm.slane %v548_v4, 5  ;;  %v4837_v18 = vperm.slane %v548_v4, 6  ;;  %v4839_v19 = vperm.slane %v548_v4, 7 }
  0x22   : > { %s4819_s15 = scalar_lea.vmem %s9061_s1, %s4372_s16  ;;  %v530_v21 = vld [vmem:[%s4814_s24 + $0x10] sm:$0xff]  ;;  %v531_v22 = vld [vmem:[%s4814_s24 + $0x18] sm:$0xff]  ;;  %v551_v23 = vmul.f32 %v4805_v5, %v528_v15  ;;  %v568_v24 = vmul.f32 %v4807_v6, %v528_v15  ;;  %v569_v25 = vmul.f32 %v4807_v6, %v529_v16  ;;  %v642_v29 = vmul.f32 %v4809_v7, %v528_v15  ;;  %v4854_v30 = vld [vmem:[%s4814_s24 + $0x20] sm:$0xff]  ;;  %s4655_s16 = smov 64  }
  0x23   : > { %v1257_v8 = vld [vmem:[%s4819_s15 + $0x40] sm:$0xff]  ;;  %v1258_v9 = vld [vmem:[%s4819_s15 + $0x48] sm:$0xff]  ;;  %v4824_v10 = vld [vmem:[%s4819_s15 + $0x50] sm:$0xff]  ;;  %v552_v26 = vmul.f32 %v4805_v5, %v530_v21  ;;  %v570_v27 = vmul.f32 %v4807_v6, %v530_v21  ;;  %v571_v28 = vmul.f32 %v4807_v6, %v531_v22  ;;  %v643_v33 = vmul.f32 %v4809_v7, %v529_v16 }
  0x24   : > { %v1273_v13 = vpack.c.bf16 %v1258_v9, %v1257_v8  ;;  %v4831_v14 = vld [vmem:[%s4819_s15 + $0x58] sm:$0xff]  ;;  %v601_v31 = vrot.slane %v568_v24, 1  ;;  %v602_v32 = vrot.slane %v569_v25, 1  ;;  %v644_v34 = vmul.f32 %v4809_v7, %v530_v21  ;;  %v4860_v39 = vld [vmem:[%s4814_s24 + $0x28] sm:$0xff]  ;;  %v4878_v0 = vld [vmem:[%s4814_s24 + $0x30] sm:$0xff] }
  0x25   : > { %v1274_v20 = vpack.c.bf16 %v4831_v14, %v4824_v10  ;;  %v604_v35 = vrot.slane %v570_v27, 1  ;;  %v605_v36 = vrot.slane %v571_v28, 1  ;;  %v645_v37 = vmul.f32 %v4809_v7, %v531_v22  ;;  %v4886_v8 = vld [vmem:[%s4814_s24 + $0x38] sm:$0xff] }
  0x26   : > { %4355 = vmatmul.msk.bf16.vlgmr.msra.gmra.mxu3 %vm1078_vm1, %v1273_v13  ;;  %v675_v38 = vrot.slane %v642_v29, 2  ;;  %v603_v40 = vsel %vm600_vm2, %v601_v31, %v602_v32  ;;  %v676_v41 = vrot.slane %v643_v33, 2  ;;  %v678_v42 = vrot.slane %v644_v34, 2 }
  0x27   : > { %v716_v43 = vmul.f32 %v4826_v11, %v530_v21  ;;  %v606_v44 = vsel %vm600_vm2, %v604_v35, %v605_v36  ;;  %v633_v45 = vadd.f32 %v603_v40, %v551_v23  ;;  %v679_v46 = vrot.slane %v645_v37, 2 }
  0x28   : > { %v717_v47 = vmul.f32 %v4826_v11, %v4854_v30  ;;  %v634_v48 = vadd.f32 %v606_v44, %v552_v26  ;;  %v677_v49 = vsel %vm674_vm3, %v675_v38, %v676_v41  ;;  %v733_v50 = vmul.f32 %v4828_v12, %v530_v21  ;;  %v4913_v44 = vld [vmem:[%s4819_s15 + $0x60] sm:$0xff] }
  0x29   : > { %v734_v51 = vmul.f32 %v4828_v12, %v531_v22  ;;  %v680_v52 = vsel %vm674_vm3, %v678_v42, %v679_v46  ;;  %v707_v53 = vadd.f32 %v677_v49, %v633_v45  ;;  %v735_v54 = vmul.f32 %v4828_v12, %v4854_v30  ;;  %v4916_v45 = vld [vmem:[%s4819_s15 + $0x68] sm:$0xff]  ;;  %v4919_v46 = vld [vmem:[%s4819_s15] sm:$0xff] }
  0x2a   : > { %v736_v55 = vmul.f32 %v4828_v12, %v4860_v39  ;;  %v708_v56 = vadd.f32 %v680_v52, %v634_v48  ;;  %v765_v57 = vrot.slane %v733_v50, 1  ;;  %v806_v59 = vmul.f32 %v4835_v17, %v530_v21  ;;  %v4892_v21 = vld [vmem:[%s9059_s3 + $0x8] ss:$0 sm:$0xff]  ;;  %v4934_v52 = vld [vmem:[%s4819_s15 + $0x10] sm:$0xff] }
  0x2b   : > { %v766_v58 = vrot.slane %v734_v51, 1  ;;  %v724_v60 = vadd.f32 %v716_v43, %v707_v53  ;;  %v768_v61 = vrot.slane %v735_v54, 1  ;;  %v807_v63 = vmul.f32 %v4835_v17, %v531_v22  ;;  %v4931_v51 = vld [vmem:[%s4819_s15 + $0x8] sm:$0xff]  ;;  %v4937_v53 = vld [vmem:[%s4819_s15 + $0x18] sm:$0xff] }
  0x2c   : > { %v769_v62 = vrot.slane %v736_v55, 1  ;;  %v725_v1 = vadd.f32 %v717_v47, %v708_v56  ;;  %v808_v3 = vmul.f32 %v4835_v17, %v4854_v30  ;;  %v809_v4 = vmul.f32 %v4835_v17, %v4860_v39 }
  0x2d   : > { %v767_v2 = vsel %vm600_vm2, %v765_v57, %v766_v58  ;;  %v838_v15 = vrot.slane %v806_v59, 2  ;;  %v839_v16 = vrot.slane %v807_v63, 2  ;;  %v879_v25 = vmul.f32 %v4837_v18, %v4854_v30  ;;  %v4943_v58 = vld [vmem:[%s8948_s4] ss:$0 sm:$0xff] }
  0x2e   : > { %v770_v9 = vsel %vm600_vm2, %v768_v61, %v769_v62  ;;  %v797_v13 = vadd.f32 %v767_v2, %v724_v60  ;;  %v841_v23 = vrot.slane %v808_v3, 2  ;;  %v842_v24 = vrot.slane %v809_v4, 2  ;;  %v4958_v3 = vld [vmem:[%s8949_s5] ss:$0 sm:$0xff] }
  0x2f   : > { %v798_v22 = vadd.f32 %v770_v9, %v725_v1  ;;  %v840_v26 = vsel %vm674_vm3, %v838_v15, %v839_v16  ;;  %v880_v27 = vmul.f32 %v4837_v18, %v4878_v0  ;;  %v896_v28 = vmul.f32 %v4839_v19, %v4854_v30 }
  0x30   : > { %v897_v29 = vmul.f32 %v4839_v19, %v4860_v39  ;;  %v843_v31 = vsel %vm674_vm3, %v841_v23, %v842_v24  ;;  %v870_v32 = vadd.f32 %v840_v26, %v797_v13  ;;  %v898_v33 = vmul.f32 %v4839_v19, %v4878_v0 }
  0x31   : > { %v899_v34 = vmul.f32 %v4839_v19, %v4886_v8  ;;  %v871_v35 = vadd.f32 %v843_v31, %v798_v22  ;;  %v928_v36 = vrot.slane %v896_v28, 1  ;;  %v969_v38 = vmul.f32 %v4892_v21, %v4854_v30 }
  0x32   : > { %v929_v37 = vrot.slane %v897_v29, 1  ;;  %v887_v40 = vadd.f32 %v879_v25, %v870_v32  ;;  %v931_v41 = vrot.slane %v898_v33, 1  ;;  %v970_v43 = vmul.f32 %v4892_v21, %v4860_v39 }
  0x33   : > { %v932_v42 = vrot.slane %v899_v34, 1  ;;  %v888_v47 = vadd.f32 %v880_v27, %v871_v35  ;;  %v971_v49 = vmul.f32 %v4892_v21, %v4878_v0  ;;  %v972_v50 = vmul.f32 %v4892_v21, %v4886_v8 }
  0x34   : > { %v930_v48 = vsel %vm600_vm2, %v928_v36, %v929_v37  ;;  %v1001_v14 = vrot.slane %v969_v38, 2  ;;  %v1275_v59 = vpack.c.bf16 %v4916_v45, %v4913_v44  ;;  %v1269_v61 = vpack.c.bf16 %v4931_v51, %v4919_v46  ;;  %v4983_v36 = vld [vmem:[%s4814_s24 + $0x40] sm:$0xff] }
  0x35   : > { %v933_v54 = vsel %vm600_vm2, %v931_v41, %v932_v42  ;;  %v960_v10 = vadd.f32 %v930_v48, %v887_v40  ;;  %v1004_v56 = vrot.slane %v971_v49, 2  ;;  %v1005_v57 = vrot.slane %v972_v50, 2  ;;  %v4988_v41 = vld [vmem:[%s4814_s24 + $0x48] sm:$0xff] }
  0x36   : > { %4356 = vmatmul.msk.bf16.gmra.mxu3 %vm1078_vm1, %v1274_v20  ;;  %v1002_v20 = vrot.slane %v970_v43, 2  ;;  %v961_v55 = vadd.f32 %v933_v54, %v888_v47  ;;  %v1270_v62 = vpack.c.bf16 %v4937_v53, %v4934_v52  ;;  %v553_v63 = vmul.f32 %v4805_v5, %v4854_v30 }
  0x37   : > { %v1006_v1 = vsel %vm674_vm3, %v1004_v56, %v1005_v57  ;;  %v554_v4 = vmul.f32 %v4805_v5, %v4878_v0  ;;  %v572_v9 = vmul.f32 %v4807_v6, %v4854_v30  ;;  %v573_v15 = vmul.f32 %v4807_v6, %v4860_v39 }
  0x38   : > { %v1003_v60 = vsel %vm674_vm3, %v1001_v14, %v1002_v20  ;;  %v1034_v13 = vadd.f32 %v1006_v1, %v961_v55  ;;  %v574_v16 = vmul.f32 %v4807_v6, %v4878_v0  ;;  %v575_v22 = vmul.f32 %v4807_v6, %v4886_v8 }
  0x39   : > { %v1033_v2 = vadd.f32 %v1003_v60, %v960_v10  ;;  %v607_v24 = vrot.slane %v572_v9, 1  ;;  %v646_v25 = vmul.f32 %v4809_v7, %v4854_v30  ;;  %v647_v26 = vmul.f32 %v4809_v7, %v4860_v39 }
  0x3a   : > { %v1046_v27 = vmul.f32 %v4943_v58, %v1034_v13  ;;  %v608_v28 = vrot.slane %v573_v15, 1  ;;  %v610_v29 = vrot.slane %v574_v16, 1  ;;  %v611_v31 = vrot.slane %v575_v22, 1  ;;  %v5011_v16 = vld [vmem:[%s4814_s24 + $0x50] sm:$0xff] }
  0x3b   : > { %v1045_v23 = vmul.f32 %v4943_v58, %v1033_v2  ;;  %v648_v33 = vmul.f32 %v4809_v7, %v4878_v0  ;;  %v649_v34 = vmul.f32 %v4809_v7, %v4886_v8  ;;  %v681_v35 = vrot.slane %v646_v25, 2 }
  0x3c   : > { %v1058_v30 = vadd.f32 %v4958_v3, %v1046_v27  ;;  %v609_v39 = vsel %vm600_vm2, %v607_v24, %v608_v28  ;;  %v612_v37 = vsel %vm600_vm2, %v610_v29, %v611_v31  ;;  %v682_v38 = vrot.slane %v647_v26, 2  ;;  %v5019_v26 = vld [vmem:[%s4814_s24 + $0x58] sm:$0xff] }
  0x3d   : > { %v1057_v32 = vadd.f32 %v4958_v3, %v1045_v23  ;;  %v635_v42 = vadd.f32 %v609_v39, %v553_v63  ;;  %v636_v43 = vadd.f32 %v612_v37, %v554_v4  ;;  %v684_v44 = vrot.slane %v648_v33, 2 }
  0x3e   : > { %v1066_v45 = vmax.f32 %v1058_v30, 0.0  ;;  %v683_v47 = vsel %vm674_vm3, %v681_v35, %v682_v38  ;;  %v685_v48 = vrot.slane %v649_v34, 2  ;;  %v718_v49 = vmul.f32 %v4826_v11, %v4878_v0 }
  0x3f   : > { %v1065_v40 = vmax.f32 %v1057_v32, 0.0  ;;  %v709_v50 = vadd.f32 %v683_v47, %v635_v42  ;;  %v719_v54 = vmul.f32 %v4826_v11, %v4983_v36  ;;  %v737_v10 = vmul.f32 %v4828_v12, %v4878_v0 }
  0x40   : > { %v738_v14 = vmul.f32 %v4828_v12, %v4886_v8  ;;  %v686_v55 = vsel %vm674_vm3, %v684_v44, %v685_v48  ;;  %v739_v56 = vmul.f32 %v4828_v12, %v4983_v36  ;;  %v740_v57 = vmul.f32 %v4828_v12, %v4988_v41 }
  0x41   : > { %v1073_v20 = vpack.c.bf16 %v1066_v45, %v1065_v40  ;;  %v710_v60 = vadd.f32 %v686_v55, %v636_v43  ;;  %v726_v63 = vadd.f32 %v718_v49, %v709_v50  ;;  %v771_v1 = vrot.slane %v737_v10, 1  ;;  %v1264_v10 = vld [vmem:[%s4819_s15 + $0x78] sm:$0xff] }
  0x42   : > { %v772_v2 = vrot.slane %v738_v14, 1  ;;  %v774_v4 = vrot.slane %v739_v56, 1  ;;  %v775_v9 = vrot.slane %v740_v57, 1  ;;  %v810_v13 = vmul.f32 %v4835_v17, %v4878_v0  ;;  %v5048_v57 = vld [vmem:[%s4819_s15 + $0x80] sm:$0xff] }
  0x43   : > { %4331 = vmatmul.msk.bf16.vlgmr.msra.gmra.mxu0 %vm1078_vm1, %v1073_v20  ;;  %v811_v15 = vmul.f32 %v4835_v17, %v4886_v8  ;;  %v727_v22 = vadd.f32 %v719_v54, %v710_v60  ;;  %v812_v24 = vmul.f32 %v4835_v17, %v4983_v36  ;;  %v813_v25 = vmul.f32 %v4835_v17, %v4988_v41  ;;  %v1263_v54 = vld [vmem:[%s4819_s15 + $0x70] sm:$0xff]  ;;  %v5051_v60 = vld [vmem:[%s4819_s15 + $0x88] sm:$0xff] }
  0x44   : > { %v773_v23 = vsel %vm600_vm2, %v771_v1, %v772_v2  ;;  %v776_v0 = vsel %vm600_vm2, %v774_v4, %v775_v9  ;;  %v844_v28 = vrot.slane %v810_v13, 2  ;;  %v881_v32 = vmul.f32 %v4837_v18, %v4983_v36 }
  0x45   : > { %v799_v27 = vadd.f32 %v773_v23, %v726_v63  ;;  %v845_v8 = vrot.slane %v811_v15, 2  ;;  %v800_v29 = vadd.f32 %v776_v0, %v727_v22  ;;  %v848_v31 = vrot.slane %v813_v25, 2 }
  0x46   : > { %4357 = vmatmul.msk.bf16.gmra.mxu3 %vm1078_vm1, %v1275_v59  ;;  %v847_v59 = vrot.slane %v812_v24, 2  ;;  %v882_v34 = vmul.f32 %v4837_v18, %v5011_v16  ;;  %v900_v35 = vmul.f32 %v4839_v19, %v4983_v36  ;;  %v901_v30 = vmul.f32 %v4839_v19, %v4988_v41 }
  0x47   : > { %v846_v33 = vsel %vm674_vm3, %v844_v28, %v845_v8  ;;  %v902_v38 = vmul.f32 %v4839_v19, %v5011_v16  ;;  %v903_v40 = vmul.f32 %v4839_v19, %v5019_v26  ;;  %v973_v45 = vmul.f32 %v4892_v21, %v4983_v36 }
  0x48   : > { %v849_v39 = vsel %vm674_vm3, %v847_v59, %v848_v31  ;;  %v872_v37 = vadd.f32 %v846_v33, %v799_v27  ;;  %v934_v43 = vrot.slane %v900_v35, 1  ;;  %v935_v44 = vrot.slane %v901_v30, 1 }
  0x49   : > { %v873_v42 = vadd.f32 %v849_v39, %v800_v29  ;;  %v937_v48 = vrot.slane %v902_v38, 1  ;;  %v938_v49 = vrot.slane %v903_v40, 1  ;;  %v974_v50 = vmul.f32 %v4892_v21, %v4988_v41 }
  0x4a   : > { %v889_v47 = vadd.f32 %v881_v32, %v872_v37  ;;  %v936_v20 = vsel %vm600_vm2, %v934_v43, %v935_v44  ;;  %v975_v55 = vmul.f32 %v4892_v21, %v5011_v16  ;;  %v976_v56 = vmul.f32 %v4892_v21, %v5019_v26  ;;  %v5084_v43 = vld [vmem:[%s4814_s24 + $0x60] sm:$0xff] }
  0x4b   : > { %v890_v14 = vadd.f32 %v882_v34, %v873_v42  ;;  %v939_v63 = vsel %vm600_vm2, %v937_v48, %v938_v49  ;;  %v1007_v2 = vrot.slane %v973_v45, 2  ;;  %v1008_v4 = vrot.slane %v974_v50, 2 }
  0x4c   : > { %v962_v1 = vadd.f32 %v936_v20, %v889_v47  ;;  %v1010_v13 = vrot.slane %v975_v55, 2  ;;  %v1011_v15 = vrot.slane %v976_v56, 2  ;;  %v1276_v22 = vpack.c.bf16 %v1264_v10, %v1263_v54 }
  0x4d   : > { %v963_v9 = vadd.f32 %v939_v63, %v890_v14  ;;  %v1009_v23 = vsel %vm674_vm3, %v1007_v2, %v1008_v4  ;;  %v1277_v24 = vpack.c.bf16 %v5051_v60, %v5048_v57  ;;  %v555_v25 = vmul.f32 %v4805_v5, %v4983_v36 }
  0x4e   : > { %v556_v0 = vmul.f32 %v4805_v5, %v5011_v16  ;;  %v1012_v27 = vsel %vm674_vm3, %v1010_v13, %v1011_v15  ;;  %v1035_v28 = vadd.f32 %v1009_v23, %v962_v1  ;;  %v576_v8 = vmul.f32 %v4807_v6, %v4983_v36 }
  0x4f   : > { %v577_v29 = vmul.f32 %v4807_v6, %v4988_v41  ;;  %v1036_v59 = vadd.f32 %v1012_v27, %v963_v9  ;;  %v578_v31 = vmul.f32 %v4807_v6, %v5011_v16  ;;  %v579_v32 = vmul.f32 %v4807_v6, %v5019_v26 }
  0x50   : > { %v650_v33 = vmul.f32 %v4809_v7, %v4983_v36  ;;  %v1047_v34 = vmul.f32 %v4943_v58, %v1035_v28  ;;  %v613_v35 = vrot.slane %v576_v8, 1  ;;  %v651_v39 = vmul.f32 %v4809_v7, %v4988_v41  ;;  %v5113_v28 = vld [vmem:[%s4814_s24 + $0x70] sm:$0xff] }
  0x51   : > { %v614_v30 = vrot.slane %v577_v29, 1  ;;  %v1048_v37 = vmul.f32 %v4943_v58, %v1036_v59  ;;  %v616_v38 = vrot.slane %v578_v31, 1  ;;  %v617_v40 = vrot.slane %v579_v32, 1 }
  0x52   : > { %v652_v42 = vmul.f32 %v4809_v7, %v5011_v16  ;;  %v1059_v36 = vadd.f32 %v4958_v3, %v1047_v34  ;;  %v653_v41 = vmul.f32 %v4809_v7, %v5019_v26  ;;  %v687_v45 = vrot.slane %v650_v33, 2 }
  0x53   : > { %4351 = vmatmul.msk.bf16.vlgmr.msrb.gmra.mxu0 %vm1078_vm1, %v1269_v61  ;;  %v615_v44 = vsel %vm600_vm2, %v613_v35, %v614_v30  ;;  %v1060_v47 = vadd.f32 %v4958_v3, %v1048_v37  ;;  %v618_v48 = vsel %vm600_vm2, %v616_v38, %v617_v40  ;;  %v688_v46 = vrot.slane %v651_v39, 2  ;;  %v5093_v61 = vld [vmem:[%s4814_s24 + $0x68] sm:$0xff] }
  0x54   : > { %v637_v49 = vadd.f32 %v615_v44, %v555_v25  ;;  %v1067_v51 = vmax.f32 %v1059_v36, 0.0  ;;  %v638_v50 = vadd.f32 %v618_v48, %v556_v0  ;;  %v690_v54 = vrot.slane %v652_v42, 2 }
  0x55   : > { %v691_v10 = vrot.slane %v653_v41, 2  ;;  %v1068_v14 = vmax.f32 %v1060_v47, 0.0  ;;  %v689_v20 = vsel %vm674_vm3, %v687_v45, %v688_v46  ;;  %v720_v55 = vmul.f32 %v4826_v11, %v5011_v16 }
  0x56   : > { %4358 = vmatmul.msk.bf16.gmra.mxu3 %vm1078_vm1, %v1276_v22  ;;  %v721_v56 = vmul.f32 %v4826_v11, %v5084_v43  ;;  %v711_v1 = vadd.f32 %v689_v20, %v637_v49  ;;  %v741_v2 = vmul.f32 %v4828_v12, %v5011_v16  ;;  %v742_v4 = vmul.f32 %v4828_v12, %v5019_v26 }
  0x57   : > { %v692_v63 = vsel %vm674_vm3, %v690_v54, %v691_v10  ;;  %v1074_v9 = vpack.c.bf16 %v1068_v14, %v1067_v51  ;;  %v743_v15 = vmul.f32 %v4828_v12, %v5084_v43  ;;  %v744_v22 = vmul.f32 %v4828_v12, %v5093_v61 }
  0x58   : > { %v712_v13 = vadd.f32 %v692_v63, %v638_v50  ;;  %v728_v23 = vadd.f32 %v720_v55, %v711_v1  ;;  %v777_v25 = vrot.slane %v741_v2, 1  ;;  %v778_v0 = vrot.slane %v742_v4, 1 }
  0x59   : > { %v814_v27 = vmul.f32 %v4835_v17, %v5011_v16  ;;  %4332 = vmatmul.msk.bf16.vlgmr.msra.gmra.mxu1 %vm1078_vm1, %v1074_v9  ;;  %v780_v29 = vrot.slane %v743_v15, 1  ;;  %v781_v59 = vrot.slane %v744_v22, 1  ;;  %v815_v31 = vmul.f32 %v4835_v17, %v5019_v26  ;;  %v5123_v16 = vld [vmem:[%s4814_s24 + $0x78] sm:$0xff] }
  0x5a   : > { %v729_v8 = vadd.f32 %v721_v56, %v712_v13  ;;  %v779_v32 = vsel %vm600_vm2, %v777_v25, %v778_v0  ;;  %v816_v33 = vmul.f32 %v4835_v17, %v5084_v43  ;;  %v817_v34 = vmul.f32 %v4835_v17, %v5093_v61 }
  0x5b   : > { %v850_v35 = vrot.slane %v814_v27, 2  ;;  %v782_v30 = vsel %vm600_vm2, %v780_v29, %v781_v59  ;;  %v801_v39 = vadd.f32 %v779_v32, %v728_v23  ;;  %v851_v37 = vrot.slane %v815_v31, 2  ;;  %v1253_v31 = vld [vmem:[%s4819_s15 + $0x20] sm:$0xff] }
  0x5c   : > { %v883_v38 = vmul.f32 %v4837_v18, %v5084_v43  ;;  %v802_v40 = vadd.f32 %v782_v30, %v729_v8  ;;  %v853_v26 = vrot.slane %v816_v33, 2  ;;  %v854_v42 = vrot.slane %v817_v34, 2  ;;  %v1267_v33 = vld [vmem:[%s4819_s15 + $0x90] sm:$0xff]  ;;  %v1268_v34 = vld [vmem:[%s4819_s15 + $0x98] sm:$0xff] }
  0x5d   : > { %v884_v36 = vmul.f32 %v4837_v18, %v5113_v28  ;;  %v852_v44 = vsel %vm674_vm3, %v850_v35, %v851_v37  ;;  %v904_v41 = vmul.f32 %v4839_v19, %v5084_v43  ;;  %v905_v45 = vmul.f32 %v4839_v19, %v5093_v61 }
  0x5e   : > { %v906_v47 = vmul.f32 %v4839_v19, %v5113_v28  ;;  %v855_v48 = vsel %vm674_vm3, %v853_v26, %v854_v42  ;;  %v874_v49 = vadd.f32 %v852_v44, %v801_v39  ;;  %v907_v46 = vmul.f32 %v4839_v19, %v5123_v16 }
  0x5f   : > { %v977_v51 = vmul.f32 %v4892_v21, %v5084_v43  ;;  %v875_v50 = vadd.f32 %v855_v48, %v802_v40  ;;  %v940_v54 = vrot.slane %v904_v41, 1  ;;  %v941_v10 = vrot.slane %v905_v45, 1 }
  0x60   : > { %v943_v14 = vrot.slane %v906_v47, 1  ;;  %v891_v20 = vadd.f32 %v883_v38, %v874_v49  ;;  %v944_v55 = vrot.slane %v907_v46, 1  ;;  %v978_v56 = vmul.f32 %v4892_v21, %v5093_v61 }
  0x61   : > { %v979_v63 = vmul.f32 %v4892_v21, %v5113_v28  ;;  %v892_v1 = vadd.f32 %v884_v36, %v875_v50  ;;  %v942_v2 = vsel %vm600_vm2, %v940_v54, %v941_v10  ;;  %v980_v4 = vmul.f32 %v4892_v21, %v5123_v16  ;;  %v544_v54 = vld [vmem:[%s4814_s24 + $0x80] sm:$0xff]  ;;  %v545_v10 = vld [vmem:[%s4814_s24 + $0x88] sm:$0xff] }
  0x62   : > { %v1013_v9 = vrot.slane %v977_v51, 2  ;;  %v945_v13 = vsel %vm600_vm2, %v943_v14, %v944_v55  ;;  %v964_v15 = vadd.f32 %v942_v2, %v891_v20  ;;  %v1014_v22 = vrot.slane %v978_v56, 2 }
  0x63   : > { %4352 = vmatmul.msk.bf16.gmra.mxu0 %vm1078_vm1, %v1270_v62  ;;  %v1016_v23 = vrot.slane %v979_v63, 2  ;;  %v965_v25 = vadd.f32 %v945_v13, %v892_v1  ;;  %v1017_v0 = vrot.slane %v980_v4, 2  ;;  %v1278_v39 = vpack.c.bf16 %v1268_v34, %v1267_v33 }
  0x64   : > { %v1015_v52 = vsel %vm674_vm3, %v1013_v9, %v1014_v22  ;;  %v580_v37 = vmul.f32 %v4807_v6, %v5084_v43  ;;  %v581_v38 = vmul.f32 %v4807_v6, %v5093_v61  ;;  %v582_v40 = vmul.f32 %v4807_v6, %v5113_v28 }
  0x65   : > { %v1018_v53 = vsel %vm674_vm3, %v1016_v23, %v1017_v0  ;;  %v1037_v62 = vadd.f32 %v1015_v52, %v964_v15  ;;  %v583_v26 = vmul.f32 %v4807_v6, %v5123_v16  ;;  %v557_v45 = vmul.f32 %v4805_v5, %v5084_v43 }
  0x66   : > { %4359 = vmatmul.msk.bf16.gmra.mxu3 %vm1078_vm1, %v1277_v24  ;;  %v1038_v27 = vadd.f32 %v1018_v53, %v965_v25  ;;  %v1254_v24 = vld [vmem:[%s4819_s15 + $0x28] sm:$0xff]  ;;  %v619_v42 = vrot.slane %v580_v37, 1  ;;  %v620_v36 = vrot.slane %v581_v38, 1  ;;  %v622_v44 = vrot.slane %v582_v40, 1 }
  0x67   : > { %v1049_v8 = vmul.f32 %v4943_v58, %v1037_v62  ;;  %v1271_v30 = vpack.c.bf16 %v1254_v24, %v1253_v31  ;;  %v623_v41 = vrot.slane %v583_v26, 1  ;;  %v558_v47 = vmul.f32 %v4805_v5, %v5113_v28 }
  0x68   : > { %v1050_v29 = vmul.f32 %v4943_v58, %v1038_v27  ;;  %v654_v48 = vmul.f32 %v4809_v7, %v5084_v43  ;;  %v655_v49 = vmul.f32 %v4809_v7, %v5093_v61  ;;  %v621_v46 = vsel %vm600_vm2, %v619_v42, %v620_v36  ;;  %v546_v27 = vld [vmem:[%s4814_s24 + $0x90] sm:$0xff] }
  0x69   : > { %v1061_v59 = vadd.f32 %v4958_v3, %v1049_v8  ;;  %v624_v6 = vsel %vm600_vm2, %v622_v44, %v623_v41  ;;  %v656_v51 = vmul.f32 %v4809_v7, %v5113_v28  ;;  %v657_v50 = vmul.f32 %v4809_v7, %v5123_v16 }
  0x6a   : > { %v1062_v57 = vadd.f32 %v4958_v3, %v1050_v29  ;;  %v639_v14 = vadd.f32 %v621_v46, %v557_v45  ;;  %v640_v5 = vadd.f32 %v624_v6, %v558_v47  ;;  %v693_v20 = vrot.slane %v654_v48, 2 }
  0x6b   : > { %v1069_v60 = vmax.f32 %v1061_v59, 0.0  ;;  %v694_v55 = vrot.slane %v655_v49, 2  ;;  %v696_v43 = vrot.slane %v656_v51, 2  ;;  %v697_v56 = vrot.slane %v657_v50, 2  ;;  %v1255_v50 = vld [vmem:[%s4819_s15 + $0x30] sm:$0xff] }
  0x6c   : > { %v1070_v32 = vmax.f32 %v1062_v57, 0.0  ;;  %v745_v61 = vmul.f32 %v4828_v12, %v5113_v28  ;;  %v746_v63 = vmul.f32 %v4828_v12, %v5123_v16  ;;  %v722_v2 = vmul.f32 %v4826_v11, %v5113_v28 }
  0x6d   : > { %v695_v1 = vsel %vm674_vm3, %v693_v20, %v694_v55  ;;  %v723_v7 = vmul.f32 %v4826_v11, %v544_v54  ;;  %v747_v4 = vmul.f32 %v4828_v12, %v544_v54  ;;  %v698_v9 = vsel %vm674_vm3, %v696_v43, %v697_v56 }
  0x6e   : > { %v1075_v35 = vpack.c.bf16 %v1070_v32, %v1069_v60  ;;  %v713_v13 = vadd.f32 %v695_v1, %v639_v14  ;;  %v748_v15 = vmul.f32 %v4828_v12, %v545_v10  ;;  %v4652_v22 = vmov 0   ;;  %v547_v60 = vld [vmem:[%s4814_s24 + $0x98] sm:$0xff]  ;;  %s8969_s24 = smov 32  }
  0x6f   : > { %4445 = vset.pattern.permute.xlu2 %v4652_v22  ;;  %4448 = vset.pattern.permute.xlu0 %v4652_v22  ;;  %v714_v23 = vadd.f32 %v698_v9, %v640_v5  ;;  %v783_v25 = vrot.slane %v745_v61, 1  ;;  %v784_v0 = vrot.slane %v746_v63, 1  ;;  %v786_v52 = vrot.slane %v747_v4, 1  ;;  %v1256_v14 = vld [vmem:[%s4819_s15 + $0x38] sm:$0xff]  ;;  %s8962_s15 = smov 112  }
  0x70   : > { %4333 = vmatmul.msk.bf16.gmra.mxu1 %vm1078_vm1, %v1075_v35  ;;  %4451 = vset.pattern.permute.xlu1 %v4652_v22  ;;  %v730_v11 = vadd.f32 %v722_v2, %v713_v13  ;;  %v787_v53 = vrot.slane %v748_v15, 1  ;;  %v818_v62 = vmul.f32 %v4835_v17, %v5113_v28  ;;  %v819_v12 = vmul.f32 %v4835_v17, %v5123_v16 }
  0x71   : > { %v731_v8 = vadd.f32 %v723_v7, %v714_v23  ;;  %v785_v29 = vsel %vm600_vm2, %v783_v25, %v784_v0  ;;  %v820_v59 = vmul.f32 %v4835_v17, %v544_v54  ;;  %v821_v57 = vmul.f32 %v4835_v17, %v545_v10  ;;  %v5246_v0 = vld [vmem:[%s8956_s12] ss:$0 sm:$0xff] }
  0x72   : > { %v788_v31 = vsel %vm600_vm2, %v786_v52, %v787_v53  ;;  %v803_v24 = vadd.f32 %v785_v29, %v730_v11  ;;  %v856_v32 = vrot.slane %v818_v62, 2  ;;  %v857_v33 = vrot.slane %v819_v12, 2  ;;  %v4366_v62 = vld [vmem:[%s8953_s9 + $0x4] sm:$0xf]  ;;  %v4339_v12 = vld [vmem:[%s8953_s9 + $0x8] sm:$0xf0] }
  0x73   : > { %4353 = vmatmul.msk.bf16.gmra.mxu0 %vm1078_vm1, %v1271_v30  ;;  %v804_v34 = vadd.f32 %v788_v31, %v731_v8  ;;  %v859_v35 = vrot.slane %v820_v59, 2  ;;  %v860_v28 = vrot.slane %v821_v57, 2  ;;  %v885_v30 = vmul.f32 %v4837_v18, %v544_v54 }
  0x74   : > { %v858_v16 = vsel %vm674_vm3, %v856_v32, %v857_v33  ;;  %v908_v37 = vmul.f32 %v4839_v19, %v544_v54  ;;  %v909_v38 = vmul.f32 %v4839_v19, %v545_v10  ;;  %v910_v26 = vmul.f32 %v4839_v19, %v546_v27 }
  0x75   : > { %v861_v17 = vsel %vm674_vm3, %v859_v35, %v860_v28  ;;  %v876_v40 = vadd.f32 %v858_v16, %v803_v24  ;;  %v911_v42 = vmul.f32 %v4839_v19, %v547_v60  ;;  %v981_v45 = vmul.f32 %v4892_v21, %v544_v54  ;;  %v5281_v24 = vld [vmem:[%s8951_s7] ss:$0 sm:$0xff] }
  0x76   : > { %4360 = vmatmul.msk.bf16.gmra.mxu3 %vm1078_vm1, %v1278_v39  ;;  %v886_v39 = vmul.f32 %v4837_v18, %v546_v27  ;;  %v877_v36 = vadd.f32 %v861_v17, %v804_v34  ;;  %v946_v44 = vrot.slane %v908_v37, 1  ;;  %v947_v41 = vrot.slane %v909_v38, 1  ;;  %v5288_v35 = vld [vmem:[%s8952_s8] ss:$0 sm:$0xff] }
  0x77   : > { %v893_v47 = vadd.f32 %v885_v30, %v876_v40  ;;  %v949_v18 = vrot.slane %v910_v26, 1  ;;  %v950_v48 = vrot.slane %v911_v42, 1  ;;  %v982_v49 = vmul.f32 %v4892_v21, %v545_v10 }
  0x78   : > { %v894_v46 = vadd.f32 %v886_v39, %v877_v36  ;;  %v948_v6 = vsel %vm600_vm2, %v946_v44, %v947_v41  ;;  %v983_v51 = vmul.f32 %v4892_v21, %v546_v27  ;;  %v984_v20 = vmul.f32 %v4892_v21, %v547_v60 }
  0x79   : > { %v951_v5 = vsel %vm600_vm2, %v949_v18, %v950_v48  ;;  %v966_v19 = vadd.f32 %v948_v6, %v893_v47  ;;  %v1019_v55 = vrot.slane %v981_v45, 2  ;;  %v1272_v43 = vpack.c.bf16 %v1256_v14, %v1255_v50 }
  0x7a   : > { %v967_v54 = vadd.f32 %v951_v5, %v894_v46  ;;  %v1020_v56 = vrot.slane %v982_v49, 2  ;;  %v1022_v61 = vrot.slane %v983_v51, 2  ;;  %v1023_v63 = vrot.slane %v984_v20, 2 }
  0x7b   : > { %v4342_v27 = vor.u32 %v4366_v62, %v4339_v12  ;;  %v4653_v59 = vmov 1   ;;  %v4654_v31 = vmov 2  }
  0x7c   : > { %v1021_v10 = vsel %vm674_vm3, %v1019_v55, %v1020_v56  ;;  %v1024_v1 = vsel %vm674_vm3, %v1022_v61, %v1023_v63 }
  0x7d   : > { %v1039_v2 = vadd.f32 %v1021_v10, %v966_v19  ;;  %v1040_v7 = vadd.f32 %v1024_v1, %v967_v54  ;;  %1227 = vmatpush.bf16.msrb.mxu2 %v4342_v27 }
  0x7f   : > { %v1051_v4 = vmul.f32 %v4943_v58, %v1039_v2  ;;  %v1052_v9 = vmul.f32 %v4943_v58, %v1040_v7  ;;  %v4337_v58 = vld [vmem:[%s8953_s9] sm:$0xf] }
  0x81   : > { %v1063_v21 = vadd.f32 %v4958_v3, %v1051_v4  ;;  %v1064_v13 = vadd.f32 %v4958_v3, %v1052_v9  ;;  %v4367_v3 = vld [vmem:[%s8953_s9 + $0x4] sm:$0xf0] }
  0x82   : > { %v4338_v53 = vor.u32 %v4367_v3, %v4337_v58 }
  0x83   : > { %4354 = vmatmul.msk.bf16.gmra.mxu0 %vm1078_vm1, %v1272_v43  ;;  %v1071_v15 = vmax.f32 %v1063_v21, 0.0  ;;  %v1072_v23 = vmax.f32 %v1064_v13, 0.0 }
  0x84   : > { %1198 = vmatpush.bf16.msrb.mxu1 %v4338_v53 }
  0x85   : > { %v1076_v25 = vpack.c.bf16 %v1072_v23, %v1071_v15 }
  0x87   : > { %4334 = vmatmul.msk.bf16.vlgmr.msra.gmra.mxu2 %vm1078_vm1, %v1076_v25 }
  0xa9   : > { %v1346_v52 = vpop.f32.mrf.mxu3 }
  0xaa   : > { %v5249_v11 = vadd.f32 %v5246_v0, %v1346_v52 }
  0xac   : > { %2256 = vperm.xlu2 %4445, %v5249_v11  }
  0xb1   : > { %v1348_v8 = vpop.f32.mrf.mxu3 }
  0xb2   : > { %v5265_v29 = vadd.f32 %v5246_v0, %v1348_v8 }
  0xb4   : > { %2261 = vperm.xlu0 %4448, %v5265_v29   ;;  %4446 = vset.pattern.permute.xlu2 %v4653_v59 }
  0xb5   : > { %2347 = vperm.xlu2 %4446, %v5249_v11  }
  0xb9   : > { %v1351_v57 = vpop.f32.mrf.mxu3 }
  0xba   : > { %v5271_v60 = vadd.f32 %v5246_v0, %v1351_v57 }
  0xbc   : > { %2266 = vperm.xlu1 %4451, %v5271_v60   ;;  %4449 = vset.pattern.permute.xlu0 %v4653_v59 }
  0xbd   : > { %2351 = vperm.xlu0 %4449, %v5265_v29   ;;  %4447 = vset.pattern.permute.xlu2 %v4654_v31 }
  0xbe   : > { %2427 = vperm.xlu2 %4447, %v5249_v11  }
  0xc0   : > { %v1104_v33 = vpop.f32.mrf.mxu0 }
  0xc1   : > { %v1353_v32 = vpop.f32.mrf.mxu3  ;;  %v1128_v34 = vmul.f32 %v5281_v24, %v1104_v33 }
  0xc2   : > { %v5291_v28 = vadd.f32 %v5246_v0, %v1353_v32 }
  0xc3   : > { %v1140_v30 = vadd.f32 %v5288_v35, %v1128_v34 }
  0xc4   : > { %4452 = vset.pattern.permute.xlu1 %v4653_v59 }
  0xc5   : > { %2355 = vperm.xlu1 %4452, %v5271_v60   ;;  %4450 = vset.pattern.permute.xlu0 %v4654_v31  ;;  %v1148_v17 = vmax.f32 %v1140_v30, 0.0 }
  0xc6   : > { %2431 = vperm.xlu0 %4450, %v5265_v29   ;;  %4454 = vset.pattern.permute.xlu2 %v4652_v22 }
  0xc7   : > { %2271 = vperm.xlu2 %4454, %v5291_v28  }
  0xc8   : > { %v1106_v39 = vpop.f32.mrf.mxu0 }
  0xc9   : > { %v1356_v16 = vpop.f32.mrf.mxu3  ;;  %v1129_v37 = vmul.f32 %v5281_v24, %v1106_v39 }
  0xca   : > { %v5301_v38 = vadd.f32 %v5246_v0, %v1356_v16 }
  0xcb   : > { %v1141_v40 = vadd.f32 %v5288_v35, %v1129_v37 }
  0xcd   : > { %4453 = vset.pattern.permute.xlu1 %v4654_v31  ;;  %v1149_v26 = vmax.f32 %v1141_v40, 0.0 }
  0xce   : > { %2435 = vperm.xlu1 %4453, %v5271_v60   ;;  %4457 = vset.pattern.permute.xlu0 %v4652_v22 }
  0xcf   : > { %2276 = vperm.xlu0 %4457, %v5301_v38   ;;  %4455 = vset.pattern.permute.xlu2 %v4653_v59  ;;  %v1156_v42 = vpack.c.bf16 %v1149_v26, %v1148_v17 }
  0xd0   : > { %2359 = vperm.xlu2 %4455, %v5291_v28   ;;  %v1326_v41 = vpop.f32.mrf.mxu0 }
  0xd1   : > { %v1358_v36 = vpop.f32.mrf.mxu3  ;;  %4343 = vmatmul.msk.bf16.vlgmr.msrb.gmra.mxu1 %vm1178_vm4, %v1156_v42  ;;  %4347 = vmatmul.msk.bf16.vlgmr.msrb.gmra.mxu2 %vm1178_vm4, %v1156_v42  ;;  %v5323_v18 = vadd.f32 %v5246_v0, %v1326_v41 }
  0xd2   : > { %v5313_v44 = vadd.f32 %v5246_v0, %v1358_v36 }
  0xd6   : > { %4463 = vset.pattern.permute.xlu1 %v4652_v22  ;;  %v1109_v45 = vpop.f32.mrf.mxu1 }
  0xd7   : > { %2281 = vperm.xlu1 %4463, %v5313_v44   ;;  %4458 = vset.pattern.permute.xlu0 %v4653_v59  ;;  %v1130_v47 = vmul.f32 %v5281_v24, %v1109_v45 }
  0xd8   : > { %2363 = vperm.xlu0 %4458, %v5301_v38   ;;  %4456 = vset.pattern.permute.xlu2 %v4654_v31  ;;  %v1328_v6 = vpop.f32.mrf.mxu0 }
  0xd9   : > { %2439 = vperm.xlu2 %4456, %v5291_v28   ;;  %v1142_v48 = vadd.f32 %v5288_v35, %v1130_v47  ;;  %v5335_v5 = vadd.f32 %v5246_v0, %v1328_v6  ;;  %v1361_v43 = vpop.f32.mrf.mxu3 }
  0xda   : > { %v5355_v56 = vadd.f32 %v5246_v0, %v1361_v43 }
  0xdb   : > { %v1150_v51 = vmax.f32 %v1142_v48, 0.0 }
  0xde   : > { %v1111_v49 = vpop.f32.mrf.mxu1 }
  0xdf   : > { %4464 = vset.pattern.permute.xlu1 %v4653_v59  ;;  %v1131_v46 = vmul.f32 %v5281_v24, %v1111_v49 }
  0xe0   : > { %2367 = vperm.xlu1 %4464, %v5313_v44   ;;  %4459 = vset.pattern.permute.xlu0 %v4654_v31  ;;  %v1331_v20 = vpop.f32.mrf.mxu0 }
  0xe1   : > { %2443 = vperm.xlu0 %4459, %v5301_v38   ;;  %4460 = vset.pattern.permute.xlu2 %v4652_v22  ;;  %v1143_v50 = vadd.f32 %v5288_v35, %v1131_v46  ;;  %v5346_v55 = vadd.f32 %v5246_v0, %v1331_v20  ;;  %v1363_v63 = vpop.f32.mrf.mxu3 }
  0xe2   : > { %2216 = vperm.xlu2 %4460, %v5323_v18   ;;  %v5368_v4 = vadd.f32 %v5246_v0, %v1363_v63  ;;  %v1162_v63 = vld [vmem:[%s8954_s10] sm:$0x3] }
  0xe3   : > { %v1151_v14 = vmax.f32 %v1143_v50, 0.0 }
  0xe5   : > { %v1157_v19 = vpack.c.bf16 %v1151_v14, %v1150_v51 }
  0xe7   : > { %4344 = vmatmul.msk.bf16.gmra.mxu1 %vm1178_vm4, %v1157_v19  ;;  %4348 = vmatmul.msk.bf16.gmra.mxu2 %vm1178_vm4, %v1157_v19 }
  0xe8   : > { %4465 = vset.pattern.permute.xlu1 %v4654_v31  ;;  %v1333_v58 = vpop.f32.mrf.mxu0 }
  0xe9   : > { %2447 = vperm.xlu1 %4465, %v5313_v44   ;;  %4466 = vset.pattern.permute.xlu0 %v4652_v22  ;;  %v1366_v15 = vpop.f32.mrf.mxu3  ;;  %v5393_v53 = vadd.f32 %v5246_v0, %v1333_v58 }
  0xea   : > { %2221 = vperm.xlu0 %4466, %v5335_v5   ;;  %4461 = vset.pattern.permute.xlu2 %v4653_v59  ;;  %v5379_v25 = vadd.f32 %v5246_v0, %v1366_v15 }
  0xeb   : > { %2315 = vperm.xlu2 %4461, %v5323_v18  }
  0xed   : > { %v1114_v54 = vpop.f32.mrf.mxu1 }
  0xee   : > { %v1132_v61 = vmul.f32 %v5281_v24, %v1114_v54 }
  0xf0   : > { %v1144_v2 = vadd.f32 %v5288_v35, %v1132_v61  ;;  %v1336_v12 = vpop.f32.mrf.mxu0 }
  0xf1   : > { %4472 = vset.pattern.permute.xlu1 %v4652_v22  ;;  %v1368_v3 = vpop.f32.mrf.mxu3  ;;  %v5414_v33 = vadd.f32 %v5246_v0, %v1336_v12 }
  0xf2   : > { %2226 = vperm.xlu1 %4472, %v5346_v55   ;;  %4467 = vset.pattern.permute.xlu0 %v4653_v59  ;;  %v1152_v9 = vmax.f32 %v1144_v2, 0.0  ;;  %v5438_v45 = vadd.f32 %v5246_v0, %v1368_v3 }
  0xf3   : > { %2319 = vperm.xlu0 %4467, %v5335_v5   ;;  %4462 = vset.pattern.permute.xlu2 %v4654_v31 }
  0xf4   : > { %2395 = vperm.xlu2 %4462, %v5323_v18  }
  0xf5   : > { %v1116_v10 = vpop.f32.mrf.mxu1 }
  0xf6   : > { %v1133_v1 = vmul.f32 %v5281_v24, %v1116_v10 }
  0xf8   : > { %v1145_v7 = vadd.f32 %v5288_v35, %v1133_v1  ;;  %v1338_v32 = vpop.f32.mrf.mxu0  ;;  %v5489_v1 = vperm.slane %v1162_v63, 0 }
  0xf9   : > { %v1371_v27 = vpop.f32.mrf.mxu3  ;;  %v5486_v10 = vadd.f32 %v5246_v0, %v1338_v32 }
  0xfa   : > { %4473 = vset.pattern.permute.xlu1 %v4653_v59  ;;  %v1153_v21 = vmax.f32 %v1145_v7, 0.0  ;;  %v5403_v8 = vadd.f32 %v5246_v0, %v1371_v27 }
  0xfb   : > { %2323 = vperm.xlu1 %4473, %v5346_v55   ;;  %4468 = vset.pattern.permute.xlu0 %v4654_v31 }
  0xfc   : > { %2399 = vperm.xlu0 %4468, %v5335_v5   ;;  %4469 = vset.pattern.permute.xlu2 %v4652_v22  ;;  %v1158_v23 = vpack.c.bf16 %v1153_v21, %v1152_v9  ;;  %v1376_v21 = vld [vmem:[%s8946_s2] sm:$0xff] }
  0xfd   : > { %2286 = vperm.xlu2 %4469, %v5355_v56  }
  0xfe   : > { %4345 = vmatmul.msk.bf16.gmra.mxu1 %vm1178_vm4, %v1158_v23  ;;  %4349 = vmatmul.msk.bf16.gmra.mxu2 %vm1178_vm4, %v1158_v23 }
 0x100   : > { %v1341_v37 = vpop.f32.mrf.mxu0 }
 0x101   : > { %v5430_v40 = vadd.f32 %v5246_v0, %v1341_v37  ;;  %v1373_v50 = vpop.f32.mrf.mxu3 }
 0x102   : > { %v5465_v19 = vadd.f32 %v5246_v0, %v1373_v50 }
 0x103   : > { %4474 = vset.pattern.permute.xlu1 %v4654_v31 }
 0x104   : > { %2403 = vperm.xlu1 %4474, %v5346_v55   ;;  %4475 = vset.pattern.permute.xlu0 %v4652_v22 }
 0x105   : > { %2291 = vperm.xlu0 %4475, %v5368_v4   ;;  %4470 = vset.pattern.permute.xlu2 %v4653_v59 }
 0x106   : > { %v5375_v13 = vpop.permute.xlu2 %2256  ;;  %2371 = vperm.xlu2 %4470, %v5355_v56  }
 0x108   : > { %v1343_v7 = vpop.f32.mrf.mxu0 }
 0x109   : > { %v5502_v58 = vadd.f32 %v5246_v0, %v1343_v7 }
 0x10a   : > { %v1119_v30 = vpop.f32.mrf.mxu2 }
 0x10b   : > { %v1134_v39 = vmul.f32 %v5281_v24, %v1119_v30 }
 0x10c   : > { %4481 = vset.pattern.permute.xlu1 %v4652_v22 }
 0x10d   : > { %2296 = vperm.xlu1 %4481, %v5379_v25   ;;  %4476 = vset.pattern.permute.xlu0 %v4653_v59  ;;  %v1146_v26 = vadd.f32 %v5288_v35, %v1134_v39 }
 0x10e   : > { %2375 = vperm.xlu0 %4476, %v5368_v4   ;;  %4471 = vset.pattern.permute.xlu2 %v4654_v31 }
 0x10f   : > { %v5388_v52 = vpop.permute.xlu2 %2347  ;;  %2451 = vperm.xlu2 %4471, %v5355_v56   ;;  %v1154_v47 = vmax.f32 %v1146_v26, 0.0  ;;  %v1378_v26 = vld [vmem:[%s8946_s2 + $0x10] sm:$0xff] }
 0x112   : > { %v1121_v36 = vpop.f32.mrf.mxu2 }
 0x113   : > { %v1135_v41 = vmul.f32 %v5281_v24, %v1121_v36 }
 0x115   : > { %4482 = vset.pattern.permute.xlu1 %v4653_v59  ;;  %v1147_v48 = vadd.f32 %v5288_v35, %v1135_v41 }
 0x116   : > { %2379 = vperm.xlu1 %4482, %v5379_v25   ;;  %4477 = vset.pattern.permute.xlu0 %v4654_v31 }
 0x117   : > { %2455 = vperm.xlu0 %4477, %v5368_v4   ;;  %4478 = vset.pattern.permute.xlu2 %v4652_v22  ;;  %v1155_v46 = vmax.f32 %v1147_v48, 0.0 }
 0x118   : > { %v5399_v62 = vpop.permute.xlu2 %2427  ;;  %2231 = vperm.xlu2 %4478, %v5393_v53  }
 0x119   : > { %v1159_v24 = vpack.c.bf16 %v1155_v46, %v1154_v47  ;;  %v5550_v47 = vperm.slane %v1162_v63, 1  ;;  %v1377_v63 = vld [vmem:[%s8946_s2 + $0x8] sm:$0xff] }
 0x11b   : > { %4346 = vmatmul.msk.bf16.gmra.mxu1 %vm1178_vm4, %v1159_v24  ;;  %4350 = vmatmul.msk.bf16.gmra.mxu2 %vm1178_vm4, %v1159_v24 }
 0x11e   : > { %4483 = vset.pattern.permute.xlu1 %v4654_v31 }
 0x11f   : > { %2459 = vperm.xlu1 %4483, %v5379_v25   ;;  %4493 = vset.pattern.permute.xlu0 %v4652_v22 }
 0x120   : > { %4479 = vset.pattern.permute.xlu2 %v4653_v59  ;;  %2306 = vperm.xlu0 %4493, %v5403_v8  }
 0x121   : > { %v5410_v57 = vpop.permute.xlu2 %2271  ;;  %2327 = vperm.xlu2 %4479, %v5393_v53  }
 0x126   : > { %v5416_v34 = vpop.permute.xlu0 %2261 }
 0x127   : > { %4484 = vset.pattern.permute.xlu1 %v4652_v22 }
 0x128   : > { %2236 = vperm.xlu1 %4484, %v5414_v33   ;;  %4494 = vset.pattern.permute.xlu0 %v4653_v59 }
 0x129   : > { %4480 = vset.pattern.permute.xlu2 %v4654_v31  ;;  %2387 = vperm.xlu0 %4494, %v5403_v8  }
 0x12a   : > { %v5423_v16 = vpop.permute.xlu2 %2359  ;;  %2407 = vperm.xlu2 %4480, %v5393_v53  }
 0x12e   : > { %v5427_v17 = vpop.permute.xlu1 %2266 }
 0x12f   : > { %v5433_v42 = vpop.permute.xlu0 %2351 }
 0x130   : > { %4485 = vset.pattern.permute.xlu1 %v4653_v59 }
 0x131   : > { %2331 = vperm.xlu1 %4485, %v5414_v33   ;;  %4495 = vset.pattern.permute.xlu0 %v4652_v22 }
 0x132   : > { %4487 = vset.pattern.permute.xlu2 %v4652_v22  ;;  %2246 = vperm.xlu0 %4495, %v5430_v40  }
 0x133   : > { %v5445_v49 = vpop.permute.xlu2 %2439  ;;  %2301 = vperm.xlu2 %4487, %v5438_v45  }
 0x137   : > { %v5448_v6 = vpop.permute.xlu1 %2355 }
 0x138   : > { %v5450_v51 = vpop.permute.xlu0 %2431 }
 0x139   : > { %9062 = vst [vmem:[#allocation6_spill] sm:$0xff] %v5450_v51  ;;  %4486 = vset.pattern.permute.xlu1 %v4654_v31 }
 0x13a   : > { %2411 = vperm.xlu1 %4486, %v5414_v33   ;;  %4496 = vset.pattern.permute.xlu0 %v4653_v59 }
 0x13b   : > { %4488 = vset.pattern.permute.xlu2 %v4653_v59  ;;  %2339 = vperm.xlu0 %4496, %v5430_v40  }
 0x13c   : > { %2383 = vperm.xlu2 %4488, %v5438_v45   ;;  %v5460_v35 = vpop.permute.xlu2 %2216 }
 0x13d   : > { %9063 = vst [vmem:[#allocation7_spill] sm:$0xff] %v5460_v35 }
 0x140   : > { %v5462_v14 = vpop.permute.xlu1 %2435 }
 0x141   : > { %9064 = vst [vmem:[#allocation8_spill] sm:$0xff] %v5462_v14  ;;  %v5467_v20 = vpop.permute.xlu0 %2276 }
 0x142   : > { %9065 = vst [vmem:[#allocation9_spill] sm:$0xff] %v5467_v20  ;;  %4498 = vset.pattern.permute.xlu1 %v4652_v22 }
 0x143   : > { %2311 = vperm.xlu1 %4498, %v5465_v19   ;;  %4497 = vset.pattern.permute.xlu0 %v4654_v31 }
 0x144   : > { %4489 = vset.pattern.permute.xlu2 %v4654_v31  ;;  %2419 = vperm.xlu0 %4497, %v5430_v40  }
 0x145   : > { %2463 = vperm.xlu2 %4489, %v5438_v45   ;;  %v5475_v43 = vpop.permute.xlu2 %2315 }
 0x146   : > { %9066 = vst [vmem:[#allocation10_spill] sm:$0xff] %v5475_v43 }
 0x149   : > { %v5477_v54 = vpop.permute.xlu1 %2281 }
 0x14a   : > { %9067 = vst [vmem:[#allocation11_spill] sm:$0xff] %v5477_v54  ;;  %v5479_v61 = vpop.permute.xlu0 %2363 }
 0x14b   : > { %9068 = vst [vmem:[#allocation12_spill] sm:$0xff] %v5479_v61  ;;  %4499 = vset.pattern.permute.xlu1 %v4653_v59 }
 0x14c   : > { %2391 = vperm.xlu1 %4499, %v5465_v19  }
 0x14d   : > { %4490 = vset.pattern.permute.xlu2 %v4652_v22 }
 0x14e   : > { %2241 = vperm.xlu2 %4490, %v5486_v10   ;;  %v5493_v2 = vpop.permute.xlu2 %2395  ;;  %v1200_v9 = vpop.f32.mrf.mxu1 }
 0x14f   : > { %9069 = vst [vmem:[#allocation13_spill] sm:$0xff] %v5493_v2  ;;  %v1201_v15 = vadd.f32 %v1200_v9, %v5489_v1 }
 0x151   : > { %v5504_v3 = vadd.f32 %v1376_v21, %v1201_v15 }
 0x152   : > { %v5499_v23 = vpop.permute.xlu1 %2367 }
 0x153   : > { %9070 = vst [vmem:[#allocation14_spill] sm:$0xff] %v5499_v23  ;;  %v5506_v12 = vpop.permute.xlu0 %2443  ;;  %1416 = vrot.lane.b32.xlu0 %v5504_v3, %s4655_s16 }
 0x154   : > { %9071 = vst [vmem:[#allocation15_spill] sm:$0xff] %v5506_v12  ;;  %4500 = vset.pattern.permute.xlu1 %v4652_v22  ;;  %v1229_v46 = vpop.f32.mrf.mxu2 }
 0x155   : > { %2251 = vperm.xlu1 %4500, %v5502_v58   ;;  %v1230_v24 = vadd.f32 %v1229_v46, %v5550_v47  ;;  %v1379_v46 = vld [vmem:[%s8946_s2 + $0x18] sm:$0xff] }
 0x156   : > { %4491 = vset.pattern.permute.xlu2 %v4653_v59  ;;  %v1202_v30 = vpop.f32.mrf.mxu1 }
 0x157   : > { %2335 = vperm.xlu2 %4491, %v5486_v10   ;;  %v5514_v27 = vpop.permute.xlu2 %2286  ;;  %v5566_v7 = vadd.f32 %v1377_v63, %v1230_v24 }
 0x158   : > { %9072 = vst [vmem:[#allocation16_spill] sm:$0xff] %v5514_v27 }
 0x159   : > { %9082 = vst [vmem:[#allocation26_spill] sm:$0xff] %v5566_v7 }
 0x15b   : > { %v5516_v0 = vpop.permute.xlu1 %2447  ;;  %1512 = vrot.lane.b32.xlu0 %v5504_v3, %s8967_s19 }
 0x15c   : > { %9073 = vst [vmem:[#allocation17_spill] sm:$0xff] %v5516_v0  ;;  %v5518_v32 = vpop.permute.xlu0 %2221  ;;  %v1387_v0 = vld [vmem:[%s8946_s2 + $0x58] sm:$0xff] }
 0x15d   : > { %9074 = vst [vmem:[#allocation18_spill] sm:$0xff] %v5518_v32  ;;  %4501 = vset.pattern.permute.xlu1 %v4653_v59  ;;  %v1203_v59 = vadd.f32 %v1202_v30, %v5489_v1  ;;  %v1231_v30 = vpop.f32.mrf.mxu2 }
 0x15e   : > { %2343 = vperm.xlu1 %4501, %v5502_v58  }
 0x15f   : > { %4492 = vset.pattern.permute.xlu2 %v4654_v31  ;;  %v5544_v41 = vadd.f32 %v1378_v26, %v1203_v59  ;;  %v1232_v59 = vadd.f32 %v1231_v30, %v5550_v47 }
 0x160   : > { %2415 = vperm.xlu2 %4492, %v5486_v10   ;;  %v5526_v22 = vpop.permute.xlu2 %2371 }
 0x161   : > { %9075 = vst [vmem:[#allocation19_spill] sm:$0xff] %v5526_v22  ;;  %v5590_v24 = vadd.f32 %v1379_v46, %v1232_v59 }
 0x163   : > { %1608 = vrot.lane.b32.xlu0 %v5504_v3, %s8959_s22  ;;  %s8964_s22 = smov 96   ;;  %9087 = vst [vmem:[#allocation31_spill] sm:$0xff] %v5590_v24 }
 0x164   : > { %v5528_v39 = vpop.permute.xlu1 %2226  ;;  %v1205_v30 = vpop.f32.mrf.mxu1 }
 0x165   : > { %9076 = vst [vmem:[#allocation20_spill] sm:$0xff] %v5528_v39  ;;  %v5532_v37 = vpop.permute.xlu0 %2319 }
 0x166   : > { %9077 = vst [vmem:[#allocation21_spill] sm:$0xff] %v5532_v37  ;;  %4502 = vset.pattern.permute.xlu1 %v4654_v31 }
 0x167   : > { %2423 = vperm.xlu1 %4502, %v5502_v58  }
 0x168   : > { %1448 = vrot.lane.b32.xlu2 %v5504_v3, %s8973_s17 }
 0x169   : > { %v5542_v36 = vpop.permute.xlu2 %2451 }
 0x16a   : > { %9078 = vst [vmem:[#allocation22_spill] sm:$0xff] %v5542_v36 }
 0x16b   : > { %1418 = vrot.lane.b32.xlu0 %v5544_v41, %s4655_s16 }
 0x16d   : > { %v5548_v31 = vpop.permute.xlu1 %2323 }
 0x16e   : > { %9079 = vst [vmem:[#allocation23_spill] sm:$0xff] %v5548_v31  ;;  %v5552_v48 = vpop.permute.xlu0 %2399 }
 0x16f   : > { %9080 = vst [vmem:[#allocation24_spill] sm:$0xff] %v5552_v48  ;;  %1480 = vrot.lane.b32.xlu1 %v5504_v3, %s8969_s24  ;;  %v1234_v48 = vpop.f32.mrf.mxu2 }
 0x170   : > { %1544 = vrot.lane.b32.xlu2 %v5504_v3, %s8962_s15 }
 0x172   : > { %v5559_v50 = vpop.permute.xlu2 %2231 }
 0x173   : > { %9081 = vst [vmem:[#allocation25_spill] sm:$0xff] %v5559_v50  ;;  %1450 = vrot.lane.b32.xlu0 %v5544_v41, %s8973_s17 }
 0x176   : > { %v5568_v9 = vpop.permute.xlu1 %2403 }
 0x177   : > { %9083 = vst [vmem:[#allocation27_spill] sm:$0xff] %v5568_v9  ;;  %1576 = vrot.lane.b32.xlu1 %v5504_v3, %s8964_s22  ;;  %v5574_v21 = vpop.permute.xlu0 %2291  ;;  %v1236_v50 = vpop.f32.mrf.mxu2 }
 0x178   : > { %1648 = vrot.lane.b32.xlu2 %v5566_v7, %s4655_s16  ;;  %9084 = vst [vmem:[#allocation28_spill] sm:$0xff] %v5574_v21  ;;  %v1380_v21 = vld [vmem:[%s8946_s2 + $0x20] sm:$0xff] }
 0x17b   : > { %v5576_v15 = vpop.permute.xlu2 %2327  ;;  %1546 = vrot.lane.b32.xlu0 %v5544_v41, %s8962_s15  ;;  %s9090_s15 = smov 80  }
 0x17c   : > { %9085 = vst [vmem:[#allocation29_spill] sm:$0xff] %v5576_v15 }
 0x17f   : > { %v5581_v26 = vpop.permute.xlu1 %2296  ;;  %1514 = vrot.lane.b32.xlu1 %v5544_v41, %s8967_s19 }
 0x180   : > { %9086 = vst [vmem:[#allocation30_spill] sm:$0xff] %v5581_v26  ;;  %1482 = vrot.lane.b32.xlu2 %v5544_v41, %s8969_s24  ;;  %v5592_v63 = vpop.permute.xlu0 %2375  ;;  %v1206_v26 = vadd.f32 %v1205_v30, %v5489_v1 }
 0x181   : > { %9088 = vst [vmem:[#allocation32_spill] sm:$0xff] %v5592_v63 }
 0x182   : > { %v5608_v59 = vadd.f32 %v1380_v21, %v1206_v26 }
 0x183   : > { %1650 = vrot.lane.b32.xlu0 %v5590_v24, %s4655_s16 }
 0x184   : > { %v5594_v7 = vpop.permute.xlu2 %2407 }
 0x185   : > { %9089 = vst [vmem:[#allocation33_spill] sm:$0xff] %v5594_v7 }
 0x187   : > { %1610 = vrot.lane.b32.xlu1 %v5544_v41, %s9090_s15 }
 0x188   : > { %v5604_v9 = vpop.permute.xlu1 %2379  ;;  %1578 = vrot.lane.b32.xlu2 %v5544_v41, %s8964_s22 }
 0x189   : > { %9091 = vst [vmem:[#allocation34_spill] sm:$0xff] %v5604_v9  ;;  %v5610_v46 = vpop.permute.xlu0 %2455  ;;  %v1207_v9 = vpop.f32.mrf.mxu1 }
 0x18a   : > { %9092 = vst [vmem:[#allocation35_spill] sm:$0xff] %v5610_v46  ;;  %v1208_v46 = vadd.f32 %v1207_v9, %v5489_v1 }
 0x18b   : > { %1484 = vrot.lane.b32.xlu0 %v5608_v59, %s8969_s24 }
 0x18d   : > { %v5614_v30 = vpop.permute.xlu2 %2301 }
 0x18e   : > { %9093 = vst [vmem:[#allocation36_spill] sm:$0xff] %v5614_v30  ;;  %v1382_v30 = vld [vmem:[%s8946_s2 + $0x30] sm:$0xff] }
 0x18f   : > { %1420 = vrot.lane.b32.xlu1 %v5608_v59, %s4655_s16  ;;  %v5638_v63 = vadd.f32 %v1382_v30, %v1208_v46  ;;  %v1381_v46 = vld [vmem:[%s8946_s2 + $0x28] sm:$0xff] }
 0x190   : > { %1516 = vrot.lane.b32.xlu2 %v5608_v59, %s8967_s19 }
 0x191   : > { %v5620_v7 = vpop.permute.xlu1 %2459  ;;  %v1210_v30 = vpop.f32.mrf.mxu1 }
 0x192   : > { %9094 = vst [vmem:[#allocation37_spill] sm:$0xff] %v5620_v7  ;;  %v5624_v21 = vpop.permute.xlu0 %2306 }
 0x193   : > { %1580 = vrot.lane.b32.xlu0 %v5608_v59, %s8964_s22  ;;  %9095 = vst [vmem:[#allocation38_spill] sm:$0xff] %v5624_v21  ;;  %s9099_s22 = smov 112  }
 0x196   : > { %v5626_v26 = vpop.permute.xlu2 %2383 }
 0x197   : > { %9096 = vst [vmem:[#allocation39_spill] sm:$0xff] %v5626_v26  ;;  %1452 = vrot.lane.b32.xlu1 %v5608_v59, %s8973_s17  ;;  %v1235_v26 = vadd.f32 %v1234_v48, %v5550_v47 }
 0x198   : > { %1612 = vrot.lane.b32.xlu2 %v5608_v59, %s9090_s15 }
 0x199   : > { %v5656_v24 = vadd.f32 %v1381_v46, %v1235_v26 }
 0x19a   : > { %v5636_v7 = vpop.permute.xlu1 %2236 }
 0x19b   : > { %9097 = vst [vmem:[#allocation40_spill] sm:$0xff] %v5636_v7  ;;  %1518 = vrot.lane.b32.xlu0 %v5638_v63, %s8967_s19  ;;  %v5646_v9 = vpop.permute.xlu0 %2387 }
 0x19c   : > { %9100 = vst [vmem:[#allocation42_spill] sm:$0xff] %v5646_v9  ;;  %v1384_v9 = vld [vmem:[%s8946_s2 + $0x40] sm:$0xff] }
 0x19d   : > { %9102 = vst [vmem:[#allocation44_spill] sm:$0xff] %v5656_v24 }
 0x19f   : > { %v5642_v21 = vpop.permute.xlu2 %2463  ;;  %1548 = vrot.lane.b32.xlu1 %v5608_v59, %s9099_s22 }
 0x1a0   : > { %9098 = vst [vmem:[#allocation41_spill] sm:$0xff] %v5642_v21  ;;  %1454 = vrot.lane.b32.xlu2 %v5638_v63, %s8973_s17  ;;  %v1211_v21 = vadd.f32 %v1210_v30, %v5489_v1  ;;  %v1383_v30 = vld [vmem:[%s8946_s2 + $0x38] sm:$0xff] }
 0x1a2   : > { %v5670_v26 = vadd.f32 %v1384_v9, %v1211_v21 }
 0x1a3   : > { %v5654_v7 = vpop.permute.xlu1 %2331  ;;  %1614 = vrot.lane.b32.xlu0 %v5638_v63, %s9090_s15 }
 0x1a4   : > { %9101 = vst [vmem:[#allocation43_spill] sm:$0xff] %v5654_v7  ;;  %v5672_v46 = vpop.permute.xlu0 %2246  ;;  %v1237_v7 = vadd.f32 %v1236_v50, %v5550_v47  ;;  %v1239_v50 = vpop.f32.mrf.mxu2 }
 0x1a5   : > { %9104 = vst [vmem:[#allocation46_spill] sm:$0xff] %v5672_v46 }
 0x1a7   : > { %1652 = vrot.lane.b32.xlu1 %v5656_v24, %s4655_s16  ;;  %v5682_v24 = vadd.f32 %v1383_v30, %v1237_v7  ;;  %v1385_v7 = vld [vmem:[%s8946_s2 + $0x48] sm:$0xff] }
 0x1a8   : > { %v5666_v48 = vpop.permute.xlu2 %2241  ;;  %1550 = vrot.lane.b32.xlu2 %v5638_v63, %s9099_s22 }
 0x1a9   : > { %9103 = vst [vmem:[#allocation45_spill] sm:$0xff] %v5666_v48  ;;  %v1240_v48 = vadd.f32 %v1239_v50, %v5550_v47 }
 0x1aa   : > { %9106 = vst [vmem:[#allocation48_spill] sm:$0xff] %v5682_v24 }
 0x1ab   : > { %1456 = vrot.lane.b32.xlu0 %v5670_v26, %s8973_s17  ;;  %v5704_v30 = vadd.f32 %v1385_v7, %v1240_v48  ;;  %v1386_v48 = vld [vmem:[%s8946_s2 + $0x50] sm:$0xff]  ;;  %s9117_s17 = smov 16  }
 0x1ac   : > { %v5678_v15 = vpop.permute.xlu1 %2411 }
 0x1ad   : > { %9105 = vst [vmem:[#allocation47_spill] sm:$0xff] %v5678_v15  ;;  %v5690_v9 = vpop.permute.xlu0 %2339 }
 0x1ae   : > { %9108 = vst [vmem:[#allocation50_spill] sm:$0xff] %v5690_v9 }
 0x1af   : > { %1422 = vrot.lane.b32.xlu1 %v5638_v63, %s4655_s16  ;;  %9111 = vst [vmem:[#allocation52_spill] sm:$0xff] %v5704_v30 }
 0x1b0   : > { %1654 = vrot.lane.b32.xlu2 %v5682_v24, %s4655_s16 }
 0x1b1   : > { %v5688_v21 = vpop.permute.xlu2 %2335 }
 0x1b2   : > { %9107 = vst [vmem:[#allocation49_spill] sm:$0xff] %v5688_v21  ;;  %v1212_v21 = vpop.f32.mrf.mxu1 }
 0x1b3   : > { %1552 = vrot.lane.b32.xlu0 %v5670_v26, %s9099_s22  ;;  %v1213_v46 = vadd.f32 %v1212_v21, %v5489_v1 }
 0x1b5   : > { %v5695_v15 = vpop.permute.xlu1 %2311 }
 0x1b6   : > { %9109 = vst [vmem:[#allocation51_spill] sm:$0xff] %v5695_v15  ;;  %v5710_v50 = vpop.permute.xlu0 %2419 }
 0x1b7   : > { %1486 = vrot.lane.b32.xlu1 %v5638_v63, %s9110_s23  ;;  %9113 = vst [vmem:[#allocation54_spill] sm:$0xff] %v5710_v50 }
 0x1b8   : > { %1424 = vrot.lane.b32.xlu2 %v5670_v26, %s4655_s16 }
 0x1ba   : > { %v5706_v24 = vpop.permute.xlu2 %2415 }
 0x1bb   : > { %9112 = vst [vmem:[#allocation53_spill] sm:$0xff] %v5706_v24  ;;  %1656 = vrot.lane.b32.xlu0 %v5704_v30, %s4655_s16  ;;  %v5722_v24 = vadd.f32 %v1386_v48, %v1213_v46  ;;  %v1215_v30 = vpop.f32.mrf.mxu1  ;;  %v1388_v48 = vld [vmem:[%s8946_s2 + $0x60] sm:$0xff] }
 0x1bc   : > { %v1216_v46 = vadd.f32 %v1215_v30, %v5489_v1 }
 0x1be   : > { %v5712_v15 = vpop.permute.xlu1 %2391  ;;  %v5746_v39 = vadd.f32 %v1388_v48, %v1216_v46 }
 0x1bf   : > { %9114 = vst [vmem:[#allocation55_spill] sm:$0xff] %v5712_v15  ;;  %1582 = vrot.lane.b32.xlu1 %v5638_v63, %s9115_s14 }
 0x1c0   : > { %1488 = vrot.lane.b32.xlu2 %v5670_v26, %s9110_s23 }
 0x1c2   : > { %v1449_v7 = vpop.permute.xlu2 %1448 }
 0x1c3   : > { %1490 = vrot.lane.b32.xlu0 %v5722_v24, %s9110_s23  ;;  %v1217_v12 = vpop.f32.mrf.mxu1 }
 0x1c4   : > { %v1218_v22 = vadd.f32 %v1217_v12, %v5489_v1 }
 0x1c5   : > { %v1417_v50 = vpop.permute.xlu0 %1416 }
 0x1c7   : > { %v5726_v15 = vpop.permute.xlu1 %2251  ;;  %1520 = vrot.lane.b32.xlu1 %v5670_v26, %s9117_s17 }
 0x1c8   : > { %9116 = vst [vmem:[#allocation56_spill] sm:$0xff] %v5726_v15  ;;  %1584 = vrot.lane.b32.xlu2 %v5670_v26, %s9115_s14 }
 0x1ca   : > { %v5732_v21 = vpop.permute.xlu2 %1544 }
 0x1cb   : > { %1586 = vrot.lane.b32.xlu0 %v5722_v24, %s9115_s14 }
 0x1cd   : > { %v1513_v9 = vpop.permute.xlu0 %1512 }
 0x1cf   : > { %1616 = vrot.lane.b32.xlu1 %v5670_v26, %s9090_s15 }
 0x1d0   : > { %v5742_v15 = vpop.permute.xlu1 %2343  ;;  %1426 = vrot.lane.b32.xlu2 %v5722_v24, %s4655_s16 }
 0x1d1   : > { %9118 = vst [vmem:[#allocation57_spill] sm:$0xff] %v5742_v15  ;;  %v1241_v15 = vpop.f32.mrf.mxu2 }
 0x1d2   : > { %v1649_v31 = vpop.permute.xlu2 %1648  ;;  %v1242_v48 = vadd.f32 %v1241_v15, %v5550_v47  ;;  %v1390_v15 = vld [vmem:[%s8946_s2 + $0x70] sm:$0xff] }
 0x1d3   : > { %1428 = vrot.lane.b32.xlu0 %v5746_v39, %s4655_s16  ;;  %v5779_v20 = vadd.f32 %v1390_v15, %v1218_v22  ;;  %v1389_v22 = vld [vmem:[%s8946_s2 + $0x68] sm:$0xff] }
 0x1d4   : > { %v5766_v27 = vadd.f32 %v1387_v0, %v1242_v48  ;;  %v1440_v48 = vmax.f32 %v5504_v3, %v1417_v50 }
 0x1d5   : > { %v1609_v30 = vpop.permute.xlu0 %1608 }
 0x1d6   : > { %9121 = vst [vmem:[#allocation59_spill] sm:$0xff] %v5766_v27  ;;  %v1472_v1 = vmax.f32 %v1440_v48, %v1449_v7 }
 0x1d7   : > { %1458 = vrot.lane.b32.xlu1 %v5722_v24, %s9119_s0 }
 0x1d8   : > { %1522 = vrot.lane.b32.xlu2 %v5722_v24, %s9117_s17 }
 0x1d9   : > { %v5754_v36 = vpop.permute.xlu1 %2423  ;;  %v1244_v2 = vpop.f32.mrf.mxu2 }
 0x1da   : > { %9120 = vst [vmem:[#allocation58_spill] sm:$0xff] %v5754_v36  ;;  %v1483_v32 = vpop.permute.xlu2 %1482  ;;  %v1245_v35 = vadd.f32 %v1244_v2, %v5550_v47  ;;  %v1391_v2 = vld [vmem:[%s8946_s2 + $0x78] sm:$0xff] }
 0x1db   : > { %1524 = vrot.lane.b32.xlu0 %v5746_v39, %s9117_s17 }
 0x1dc   : > { %v5795_v7 = vadd.f32 %v1389_v22, %v1245_v35 }
 0x1dd   : > { %v1419_v46 = vpop.permute.xlu0 %1418 }
 0x1de   : > { %9122 = vst [vmem:[#allocation60_spill] sm:$0xff] %v5795_v7 }
 0x1df   : > { %1554 = vrot.lane.b32.xlu1 %v5722_v24, %s9099_s22 }
 0x1e0   : > { %1618 = vrot.lane.b32.xlu2 %v5722_v24, %s9090_s15 }
 0x1e1   : > { %v1481_v37 = vpop.permute.xlu1 %1480  ;;  %v1246_v50 = vpop.f32.mrf.mxu2 }
 0x1e2   : > { %v1579_v36 = vpop.permute.xlu2 %1578  ;;  %v1247_v48 = vadd.f32 %v1246_v50, %v5550_v47  ;;  %v1441_v47 = vmax.f32 %v5544_v41, %v1419_v46 }
 0x1e3   : > { %1620 = vrot.lane.b32.xlu0 %v5746_v39, %s9090_s15 }
 0x1e5   : > { %v1451_v54 = vpop.permute.xlu0 %1450 }
 0x1e6   : > { %v1473_v22 = vmax.f32 %v1441_v47, %v1451_v54 }
 0x1e7   : > { %1658 = vrot.lane.b32.xlu1 %v5766_v27, %s4655_s16  ;;  %v1504_v27 = vmax.f32 %v1472_v1, %v1481_v37  ;;  %v5806_v1 = vadd.f32 %v1391_v2, %v1247_v48 }
 0x1e8   : > { %1460 = vrot.lane.b32.xlu2 %v5746_v39, %s9119_s0  ;;  %v1505_v48 = vmax.f32 %v1473_v22, %v1483_v32 }
 0x1e9   : > { %v1577_v23 = vpop.permute.xlu1 %1576  ;;  %v1536_v15 = vmax.f32 %v1504_v27, %v1513_v9  ;;  %9123 = vst [vmem:[#allocation61_spill] sm:$0xff] %v5806_v1 }
 0x1ea   : > { %v1517_v0 = vpop.permute.xlu2 %1516 }
 0x1eb   : > { %1462 = vrot.lane.b32.xlu0 %v5779_v20, %s9119_s0  ;;  %v1568_v27 = vmax.f32 %v1536_v15, %v5732_v21 }
 0x1ed   : > { %v1547_v12 = vpop.permute.xlu0 %1546  ;;  %v1600_v35 = vmax.f32 %v1568_v27, %v1577_v23 }
 0x1ef   : > { %1492 = vrot.lane.b32.xlu1 %v5746_v39, %s9110_s23  ;;  %v1632_v50 = vmax.f32 %v1600_v35, %v1609_v30 }
 0x1f0   : > { %1556 = vrot.lane.b32.xlu2 %v5746_v39, %s9099_s22 }
 0x1f1   : > { %v1515_v61 = vpop.permute.xlu1 %1514 }
 0x1f2   : > { %v5788_v43 = vpop.permute.xlu2 %1612  ;;  %v1537_v23 = vmax.f32 %v1505_v48, %v1515_v61 }
 0x1f3   : > { %1558 = vrot.lane.b32.xlu0 %v5779_v20, %s9099_s22 }
 0x1f4   : > { %v1569_v54 = vmax.f32 %v1537_v23, %v1547_v12 }
 0x1f5   : > { %v1651_v14 = vpop.permute.xlu0 %1650 }
 0x1f6   : > { %v1601_v27 = vmax.f32 %v1569_v54, %v1579_v36 }
 0x1f7   : > { %1588 = vrot.lane.b32.xlu1 %v5746_v39, %s9115_s14 }
 0x1f8   : > { %1660 = vrot.lane.b32.xlu2 %v5795_v7, %s4655_s16  ;;  %v5815_v7 = vmax.f32 %v1632_v50, %v1649_v31 }
 0x1f9   : > { %v1611_v37 = vpop.permute.xlu1 %1610 }
 0x1fa   : > { %v1455_v9 = vpop.permute.xlu2 %1454  ;;  %v1633_v61 = vmax.f32 %v1601_v27, %v1611_v37 }
 0x1fb   : > { %1662 = vrot.lane.b32.xlu0 %v5806_v1, %s4655_s16 }
 0x1fc   : > { %v5830_v12 = vmax.f32 %v1633_v61, %v1651_v14 }
 0x1fd   : > { %v1485_v51 = vpop.permute.xlu0 %1484 }
 0x1ff   : > { %1430 = vrot.lane.b32.xlu1 %v5779_v20, %s4655_s16 }
 0x200   : > { %1494 = vrot.lane.b32.xlu2 %v5779_v20, %s9110_s23 }
 0x201   : > { %v1421_v21 = vpop.permute.xlu1 %1420 }
 0x202   : > { %v1551_v15 = vpop.permute.xlu2 %1550  ;;  %v1442_v35 = vmax.f32 %v5608_v59, %v1421_v21 }
 0x203   : > { %1712 = vrot.lane.b32.xlu0 %v5815_v7, %s9090_s15 }
 0x205   : > { %v1581_v46 = vpop.permute.xlu0 %1580 }
 0x207   : > { %1526 = vrot.lane.b32.xlu1 %v5779_v20, %s9117_s17 }
 0x208   : > { %1590 = vrot.lane.b32.xlu2 %v5779_v20, %s9115_s14 }
 0x209   : > { %v1453_v30 = vpop.permute.xlu1 %1452 }
 0x20a   : > { %v1655_v2 = vpop.permute.xlu2 %1654  ;;  %v1474_v32 = vmax.f32 %v1442_v35, %v1453_v30 }
 0x20b   : > { %1784 = vrot.lane.b32.xlu0 %v5815_v7, %s9117_s17 }
 0x20c   : > { %v1506_v50 = vmax.f32 %v1474_v32, %v1485_v51 }
 0x20d   : > { %v1519_v31 = vpop.permute.xlu0 %1518 }
 0x20e   : > { %v1538_v36 = vmax.f32 %v1506_v50, %v1517_v0 }
 0x20f   : > { %1622 = vrot.lane.b32.xlu1 %v5779_v20, %s9090_s15 }
 0x210   : > { %1736 = vrot.lane.b32.xlu2 %v5815_v7, %s9115_s14 }
 0x211   : > { %v1549_v47 = vpop.permute.xlu1 %1548 }
 0x212   : > { %v1425_v22 = vpop.permute.xlu2 %1424  ;;  %v1570_v37 = vmax.f32 %v1538_v36, %v1549_v47 }
 0x213   : > { %1738 = vrot.lane.b32.xlu0 %v5830_v12, %s9115_s14 }
 0x214   : > { %v1602_v54 = vmax.f32 %v1570_v37, %v1581_v46 }
 0x215   : > { %v1615_v21 = vpop.permute.xlu0 %1614 }
 0x216   : > { %v1634_v51 = vmax.f32 %v1602_v54, %v5788_v43 }
 0x217   : > { %1688 = vrot.lane.b32.xlu1 %v5815_v7, %s4655_s16 }
 0x218   : > { %1808 = vrot.lane.b32.xlu2 %v5815_v7, %s9110_s23 }
 0x219   : > { %v1653_v48 = vpop.permute.xlu1 %1652 }
 0x21a   : > { %v1489_v23 = vpop.permute.xlu2 %1488  ;;  %v5845_v27 = vmax.f32 %v1634_v51, %v1653_v48 }
 0x21b   : > { %1810 = vrot.lane.b32.xlu0 %v5830_v12, %s9110_s23 }
 0x21d   : > { %v1457_v14 = vpop.permute.xlu0 %1456 }
 0x21f   : > { %1760 = vrot.lane.b32.xlu1 %v5815_v7, %s9099_s22 }
 0x220   : > { %1690 = vrot.lane.b32.xlu2 %v5830_v12, %s4655_s16 }
 0x221   : > { %v1423_v0 = vpop.permute.xlu1 %1422 }
 0x222   : > { %v1585_v30 = vpop.permute.xlu2 %1584  ;;  %v1443_v35 = vmax.f32 %v5638_v63, %v1423_v0 }
 0x223   : > { %1692 = vrot.lane.b32.xlu0 %v5845_v27, %s4655_s16 }
 0x224   : > { %v1475_v61 = vmax.f32 %v1443_v35, %v1455_v9  ;;  %v1444_v9 = vmax.f32 %v5670_v26, %v1425_v22 }
 0x225   : > { %v1553_v46 = vpop.permute.xlu0 %1552 }
 0x227   : > { %1832 = vrot.lane.b32.xlu1 %v5815_v7, %s9119_s0 }
 0x228   : > { %1762 = vrot.lane.b32.xlu2 %v5830_v12, %s9099_s22 }
 0x229   : > { %v1487_v32 = vpop.permute.xlu1 %1486 }
 0x22a   : > { %v1507_v47 = vmax.f32 %v1475_v61, %v1487_v32  ;;  %v1427_v43 = vpop.permute.xlu2 %1426 }
 0x22b   : > { %1764 = vrot.lane.b32.xlu0 %v5845_v27, %s9099_s22 }
 0x22c   : > { %v1539_v50 = vmax.f32 %v1507_v47, %v1519_v31  ;;  %v1476_v31 = vmax.f32 %v1444_v9, %v1457_v14 }
 0x22d   : > { %v1657_v36 = vpop.permute.xlu0 %1656 }
 0x22e   : > { %v1571_v37 = vmax.f32 %v1539_v50, %v1551_v15  ;;  %v1508_v47 = vmax.f32 %v1476_v31, %v1489_v23 }
 0x22f   : > { %1714 = vrot.lane.b32.xlu1 %v5830_v12, %s9090_s15 }
 0x230   : > { %1834 = vrot.lane.b32.xlu2 %v5830_v12, %s9119_s0 }
 0x231   : > { %v1583_v48 = vpop.permute.xlu1 %1582 }
 0x232   : > { %v1603_v54 = vmax.f32 %v1571_v37, %v1583_v48  ;;  %v1523_v51 = vpop.permute.xlu2 %1522 }
 0x233   : > { %1836 = vrot.lane.b32.xlu0 %v5845_v27, %s9119_s0 }
 0x234   : > { %v1635_v0 = vmax.f32 %v1603_v54, %v1615_v21  ;;  %v1445_v54 = vmax.f32 %v5722_v24, %v1427_v43 }
 0x235   : > { %v1491_v35 = vpop.permute.xlu0 %1490 }
 0x236   : > { %v5867_v61 = vmax.f32 %v1635_v0, %v1655_v2 }
 0x237   : > { %1786 = vrot.lane.b32.xlu1 %v5830_v12, %s9117_s17 }
 0x238   : > { %1716 = vrot.lane.b32.xlu2 %v5845_v27, %s9090_s15 }
 0x239   : > { %v1521_v15 = vpop.permute.xlu1 %1520 }
 0x23a   : > { %v1619_v32 = vpop.permute.xlu2 %1618  ;;  %v1540_v50 = vmax.f32 %v1508_v47, %v1521_v15 }
 0x23b   : > { %1718 = vrot.lane.b32.xlu0 %v5867_v61, %s9090_s15 }
 0x23c   : > { %v1572_v21 = vmax.f32 %v1540_v50, %v1553_v46 }
 0x23d   : > { %v1587_v22 = vpop.permute.xlu0 %1586 }
 0x23e   : > { %v1604_v48 = vmax.f32 %v1572_v21, %v1585_v30 }
 0x23f   : > { %1740 = vrot.lane.b32.xlu1 %v5845_v27, %s9115_s14 }
 0x240   : > { %1788 = vrot.lane.b32.xlu2 %v5845_v27, %s9117_s17 }
 0x241   : > { %v1617_v14 = vpop.permute.xlu1 %1616 }
 0x242   : > { %v1461_v37 = vpop.permute.xlu2 %1460  ;;  %v1636_v2 = vmax.f32 %v1604_v48, %v1617_v14 }
 0x243   : > { %1790 = vrot.lane.b32.xlu0 %v5867_v61, %s9117_s17 }
 0x244   : > { %v5882_v46 = vmax.f32 %v1636_v2, %v1657_v36 }
 0x245   : > { %v1429_v23 = vpop.permute.xlu0 %1428 }
 0x247   : > { %1812 = vrot.lane.b32.xlu1 %v5845_v27, %s9110_s23 }
 0x248   : > { %1742 = vrot.lane.b32.xlu2 %v5867_v61, %s9115_s14 }
 0x249   : > { %v1459_v9 = vpop.permute.xlu1 %1458 }
 0x24a   : > { %v1477_v0 = vmax.f32 %v1445_v54, %v1459_v9  ;;  %v1557_v31 = vpop.permute.xlu2 %1556 }
 0x24b   : > { %1744 = vrot.lane.b32.xlu0 %v5882_v46, %s9115_s14 }
 0x24c   : > { %v1509_v15 = vmax.f32 %v1477_v0, %v1491_v35 }
 0x24d   : > { %v1525_v30 = vpop.permute.xlu0 %1524 }
 0x24e   : > { %v1541_v43 = vmax.f32 %v1509_v15, %v1523_v51  ;;  %v1446_v51 = vmax.f32 %v5746_v39, %v1429_v23 }
 0x24f   : > { %1694 = vrot.lane.b32.xlu1 %v5867_v61, %s4655_s16 }
 0x250   : > { %1814 = vrot.lane.b32.xlu2 %v5867_v61, %s9110_s23  ;;  %v1478_v9 = vmax.f32 %v1446_v51, %v1461_v37 }
 0x251   : > { %v1555_v47 = vpop.permute.xlu1 %1554 }
 0x252   : > { %v1573_v50 = vmax.f32 %v1541_v43, %v1555_v47  ;;  %v1661_v21 = vpop.permute.xlu2 %1660 }
 0x253   : > { %1816 = vrot.lane.b32.xlu0 %v5882_v46, %s9110_s23 }
 0x254   : > { %v1605_v14 = vmax.f32 %v1573_v50, %v1587_v22 }
 0x255   : > { %v1621_v36 = vpop.permute.xlu0 %1620 }
 0x256   : > { %v1637_v35 = vmax.f32 %v1605_v14, %v1619_v32 }
 0x257   : > { %1766 = vrot.lane.b32.xlu1 %v5867_v61, %s9099_s22 }
 0x258   : > { %1696 = vrot.lane.b32.xlu2 %v5882_v46, %s4655_s16 }
 0x259   : > { %v1659_v48 = vpop.permute.xlu1 %1658 }
 0x25a   : > { %v5896_v2 = vmax.f32 %v1637_v35, %v1659_v48  ;;  %v1495_v54 = vpop.permute.xlu2 %1494 }
 0x25c   : > { %1698 = vrot.lane.b32.xlu0 %v5896_v2, %s4655_s16 }
 0x25d   : > { %v1463_v22 = vpop.permute.xlu0 %1462 }
 0x25f   : > { %1838 = vrot.lane.b32.xlu1 %v5867_v61, %s9119_s0 }
 0x260   : > { %1768 = vrot.lane.b32.xlu2 %v5882_v46, %s9099_s22 }
 0x261   : > { %v1493_v0 = vpop.permute.xlu1 %1492 }
 0x262   : > { %v1510_v15 = vmax.f32 %v1478_v9, %v1493_v0  ;;  %v1591_v32 = vpop.permute.xlu2 %1590 }
 0x264   : > { %v1542_v43 = vmax.f32 %v1510_v15, %v1525_v30  ;;  %1770 = vrot.lane.b32.xlu0 %v5896_v2, %s9099_s22 }
 0x265   : > { %v1559_v47 = vpop.permute.xlu0 %1558 }
 0x266   : > { %v1574_v50 = vmax.f32 %v1542_v43, %v1557_v31 }
 0x267   : > { %1720 = vrot.lane.b32.xlu1 %v5882_v46, %s9090_s15 }
 0x268   : > { %1840 = vrot.lane.b32.xlu2 %v5882_v46, %s9119_s0 }
 0x269   : > { %v1589_v23 = vpop.permute.xlu1 %1588 }
 0x26a   : > { %v1737_v14 = vpop.permute.xlu2 %1736  ;;  %v1606_v35 = vmax.f32 %v1574_v50, %v1589_v23 }
 0x26c   : > { %1842 = vrot.lane.b32.xlu0 %v5896_v2, %s9119_s0  ;;  %v1638_v37 = vmax.f32 %v1606_v35, %v1621_v36 }
 0x26d   : > { %v1663_v48 = vpop.permute.xlu0 %1662 }
 0x26e   : > { %v5918_v0 = vmax.f32 %v1638_v37, %v1661_v21 }
 0x26f   : > { %1792 = vrot.lane.b32.xlu1 %v5882_v46, %s9117_s17 }
 0x270   : > { %1722 = vrot.lane.b32.xlu2 %v5896_v2, %s9090_s15 }
 0x271   : > { %v1431_v30 = vpop.permute.xlu1 %1430 }
 0x272   : > { %v1447_v51 = vmax.f32 %v5779_v20, %v1431_v30  ;;  %v1809_v9 = vpop.permute.xlu2 %1808 }
 0x274   : > { %v1479_v31 = vmax.f32 %v1447_v51, %v1463_v22  ;;  %1724 = vrot.lane.b32.xlu0 %v5918_v0, %s9090_s15 }
 0x275   : > { %v1713_v15 = vpop.permute.xlu0 %1712 }
 0x276   : > { %v1511_v36 = vmax.f32 %v1479_v31, %v1495_v54 }
 0x277   : > { %1746 = vrot.lane.b32.xlu1 %v5896_v2, %s9115_s14 }
 0x278   : > { %1794 = vrot.lane.b32.xlu2 %v5896_v2, %s9117_s17 }
 0x279   : > { %v1527_v43 = vpop.permute.xlu1 %1526 }
 0x27a   : > { %v1543_v23 = vmax.f32 %v1511_v36, %v1527_v43  ;;  %v5926_v50 = vpop.permute.xlu2 %1690 }
 0x27c   : > { %v1575_v35 = vmax.f32 %v1543_v23, %v1559_v47  ;;  %1796 = vrot.lane.b32.xlu0 %v5918_v0, %s9117_s17 }
 0x27d   : > { %v1785_v21 = vpop.permute.xlu0 %1784 }
 0x27e   : > { %v1607_v22 = vmax.f32 %v1575_v35, %v1591_v32 }
 0x27f   : > { %1818 = vrot.lane.b32.xlu1 %v5896_v2, %s9110_s23 }
 0x280   : > { %1748 = vrot.lane.b32.xlu2 %v5918_v0, %s9115_s14 }
 0x281   : > { %v1623_v37 = vpop.permute.xlu1 %1622 }
 0x282   : > { %v1639_v30 = vmax.f32 %v1607_v22, %v1623_v37  ;;  %v1763_v51 = vpop.permute.xlu2 %1762 }
 0x284   : > { %v5934_v54 = vmax.f32 %v1639_v30, %v1663_v48 }
 0x285   : > { %v1739_v47 = vpop.permute.xlu0 %1738 }
 0x286   : > { %1750 = vrot.lane.b32.xlu0 %v5934_v54, %s9115_s14 }
 0x287   : > { %1700 = vrot.lane.b32.xlu1 %v5918_v0, %s4655_s16 }
 0x288   : > { %1820 = vrot.lane.b32.xlu2 %v5918_v0, %s9110_s23 }
 0x289   : > { %v5942_v31 = vpop.permute.xlu1 %1688 }
 0x28a   : > { %9124 = vst [vmem:[#allocation62_spill] sm:$0xff] %v5942_v31  ;;  %v1835_v36 = vpop.permute.xlu2 %1834  ;;  %v1856_v32 = vsel %vm1178_vm4, %v5942_v31, %v1713_v15 }
 0x28b   : > { %v1865_v23 = vsel %vm1864_vm6, %v1856_v32, %v1737_v14 }
 0x28d   : > { %v1811_v48 = vpop.permute.xlu0 %1810 }
 0x28e   : > { %1822 = vrot.lane.b32.xlu0 %v5934_v54, %s9110_s23 }
 0x28f   : > { %1772 = vrot.lane.b32.xlu1 %v5918_v0, %s9099_s22 }
 0x290   : > { %1702 = vrot.lane.b32.xlu2 %v5934_v54, %s4655_s16 }
 0x291   : > { %v1761_v43 = vpop.permute.xlu1 %1760 }
 0x292   : > { %v1874_v35 = vsel %vm1873_vm5, %v1865_v23, %v1761_v43  ;;  %v1717_v22 = vpop.permute.xlu2 %1716 }
 0x293   : > { %v1883_v15 = vsel %vm1882_vm7, %v1874_v35, %v5815_v7 }
 0x294   : > { %v1892_v37 = vsel %vm1891_vm8, %v1883_v15, %v1785_v21 }
 0x295   : > { %v5957_v30 = vpop.permute.xlu0 %1692  ;;  %v1901_v32 = vsel %vm1900_vm9, %v1892_v37, %v1809_v9 }
 0x297   : > { %1844 = vrot.lane.b32.xlu1 %v5918_v0, %s9119_s0 }
 0x298   : > { %1774 = vrot.lane.b32.xlu2 %v5934_v54, %s9099_s22 }
 0x299   : > { %v1833_v14 = vpop.permute.xlu1 %1832 }
 0x29a   : > { %v1910_v43 = vsel %vm1909_vm10, %v1901_v32, %v1833_v14  ;;  %v1789_v23 = vpop.permute.xlu2 %1788 }
 0x29b   : > { %v1918_v7 = vsub.f32 %v5504_v3, %v1910_v43 }
 0x29d   : > { %v1934_v35 = vmul.f32 1.442695, %v1918_v7  ;;  %v1765_v21 = vpop.permute.xlu0 %1764 }
 0x29f   : > { %4524 = vpow2.f32 %v1934_v35  ;;  %1726 = vrot.lane.b32.xlu1 %v5934_v54, %s9090_s15 }
 0x2a0   : > { %1846 = vrot.lane.b32.xlu2 %v5934_v54, %s9119_s0 }
 0x2a1   : > { %v1715_v15 = vpop.permute.xlu1 %1714 }
 0x2a2   : > { %v1857_v1 = vsel %vm1178_vm4, %v5926_v50, %v1715_v15  ;;  %v1743_v31 = vpop.permute.xlu2 %1742 }
 0x2a3   : > { %v1866_v9 = vsel %vm1864_vm6, %v1857_v1, %v1739_v47 }
 0x2a4   : > { %v1875_v3 = vsel %vm1873_vm5, %v1866_v9, %v1763_v51 }
 0x2a5   : > { %v5973_v37 = vpop.eup %4524  ;;  %v1837_v14 = vpop.permute.xlu0 %1836  ;;  %v1884_v43 = vsel %vm1882_vm7, %v1875_v3, %v5830_v12  ;;  %v1858_v12 = vsel %vm1178_vm4, %v5957_v30, %v1717_v22 }
 0x2a6   : > { %1974 = vrot.lane.b32.xlu0 %v5973_v37, %s9099_s22 }
 0x2a7   : > { %1798 = vrot.lane.b32.xlu1 %v5934_v54, %s9117_s17 }
 0x2a8   : > { %2006 = vrot.lane.b32.xlu2 %v5973_v37, %s9115_s14 }
 0x2a9   : > { %v1787_v32 = vpop.permute.xlu1 %1786 }
 0x2aa   : > { %v1893_v1 = vsel %vm1891_vm8, %v1884_v43, %v1787_v32  ;;  %v1815_v47 = vpop.permute.xlu2 %1814 }
 0x2ab   : > { %v1902_v7 = vsel %vm1900_vm9, %v1893_v1, %v1811_v48 }
 0x2ac   : > { %v1911_v35 = vsel %vm1909_vm10, %v1902_v7, %v1835_v36 }
 0x2ad   : > { %v1920_v51 = vsub.f32 %v5544_v41, %v1911_v35  ;;  %v1719_v9 = vpop.permute.xlu0 %1718 }
 0x2ae   : > { %2070 = vrot.lane.b32.xlu0 %v5973_v37, %s4655_s16 }
 0x2af   : > { %v1938_v15 = vmul.f32 1.442695, %v1920_v51  ;;  %2038 = vrot.lane.b32.xlu1 %v5973_v37, %s9090_s15 }
 0x2b0   : > { %2102 = vrot.lane.b32.xlu2 %v5973_v37, %s9119_s0 }
 0x2b1   : > { %4526 = vpow2.f32 %v1938_v15  ;;  %v1741_v48 = vpop.permute.xlu1 %1740 }
 0x2b2   : > { %v1867_v36 = vsel %vm1864_vm6, %v1858_v12, %v1741_v48  ;;  %v5997_v3 = vpop.permute.xlu2 %1696 }
 0x2b3   : > { %v1876_v41 = vsel %vm1873_vm5, %v1867_v36, %v1765_v21 }
 0x2b4   : > { %v1885_v32 = vsel %vm1882_vm7, %v1876_v41, %v5845_v27 }
 0x2b5   : > { %v1894_v1 = vsel %vm1891_vm8, %v1885_v32, %v1789_v23  ;;  %v1791_v7 = vpop.permute.xlu0 %1790 }
 0x2b6   : > { %2166 = vrot.lane.b32.xlu0 %v5973_v37, %s9117_s17 }
 0x2b7   : > { %v6004_v43 = vpop.eup %4526  ;;  %2134 = vrot.lane.b32.xlu1 %v5973_v37, %s9110_s23 }
 0x2b8   : > { %2040 = vrot.lane.b32.xlu2 %v6004_v43, %s9090_s15 }
 0x2b9   : > { %v1813_v22 = vpop.permute.xlu1 %1812 }
 0x2ba   : > { %v1903_v21 = vsel %vm1900_vm9, %v1894_v1, %v1813_v22  ;;  %v1769_v35 = vpop.permute.xlu2 %1768 }
 0x2bb   : > { %v1912_v51 = vsel %vm1909_vm10, %v1903_v21, %v1837_v14 }
 0x2bc   : > { %v1922_v15 = vsub.f32 %v5608_v59, %v1912_v51 }
 0x2bd   : > { %v1745_v48 = vpop.permute.xlu0 %1744 }
 0x2be   : > { %v1942_v27 = vmul.f32 1.442695, %v1922_v15  ;;  %2008 = vrot.lane.b32.xlu0 %v6004_v43, %s9115_s14 }
 0x2bf   : > { %1976 = vrot.lane.b32.xlu1 %v6004_v43, %s9099_s22 }
 0x2c0   : > { %4528 = vpow2.f32 %v1942_v27  ;;  %2136 = vrot.lane.b32.xlu2 %v6004_v43, %s9110_s23 }
 0x2c1   : > { %v6020_v23 = vpop.permute.xlu1 %1694 }
 0x2c2   : > { %v1841_v12 = vpop.permute.xlu2 %1840  ;;  %v1859_v59 = vsel %vm1178_vm4, %v6020_v23, %v1719_v9 }
 0x2c3   : > { %v1868_v41 = vsel %vm1864_vm6, %v1859_v59, %v1743_v31 }
 0x2c5   : > { %v1817_v21 = vpop.permute.xlu0 %1816 }
 0x2c6   : > { %v6022_v36 = vpop.eup %4528  ;;  %2104 = vrot.lane.b32.xlu0 %v6004_v43, %s9119_s0 }
 0x2c7   : > { %2072 = vrot.lane.b32.xlu1 %v6004_v43, %s4655_s16 }
 0x2c8   : > { %1978 = vrot.lane.b32.xlu2 %v6022_v36, %s9099_s22 }
 0x2c9   : > { %v1767_v14 = vpop.permute.xlu1 %1766 }
 0x2ca   : > { %v1877_v32 = vsel %vm1873_vm5, %v1868_v41, %v1767_v14  ;;  %v1723_v22 = vpop.permute.xlu2 %1722 }
 0x2cb   : > { %v1886_v1 = vsel %vm1882_vm7, %v1877_v32, %v5867_v61 }
 0x2cc   : > { %v1895_v9 = vsel %vm1891_vm8, %v1886_v1, %v1791_v7 }
 0x2cd   : > { %v1904_v31 = vsel %vm1900_vm9, %v1895_v9, %v1815_v47 }
 0x2ce   : > { %2042 = vrot.lane.b32.xlu0 %v6022_v36, %s9090_s15  ;;  %v6046_v14 = vpop.permute.xlu0 %1698 }
 0x2cf   : > { %2168 = vrot.lane.b32.xlu1 %v6004_v43, %s9117_s17 }
 0x2d0   : > { %2074 = vrot.lane.b32.xlu2 %v6022_v36, %s4655_s16 }
 0x2d1   : > { %v1839_v51 = vpop.permute.xlu1 %1838 }
 0x2d2   : > { %v1913_v15 = vsel %vm1909_vm10, %v1904_v31, %v1839_v51  ;;  %v1795_v27 = vpop.permute.xlu2 %1794 }
 0x2d3   : > { %v1924_v61 = vsub.f32 %v5638_v63, %v1913_v15 }
 0x2d5   : > { %v1946_v59 = vmul.f32 1.442695, %v1924_v61 }
 0x2d6   : > { %2138 = vrot.lane.b32.xlu0 %v6022_v36, %s9110_s23  ;;  %v1771_v9 = vpop.permute.xlu0 %1770 }
 0x2d7   : > { %4530 = vpow2.f32 %v1946_v59  ;;  %2010 = vrot.lane.b32.xlu1 %v6022_v36, %s9115_s14 }
 0x2d8   : > { %2170 = vrot.lane.b32.xlu2 %v6022_v36, %s9117_s17 }
 0x2d9   : > { %v1721_v7 = vpop.permute.xlu1 %1720 }
 0x2da   : > { %v1860_v47 = vsel %vm1178_vm4, %v5997_v3, %v1721_v7  ;;  %v1749_v41 = vpop.permute.xlu2 %1748 }
 0x2db   : > { %v1869_v63 = vsel %vm1864_vm6, %v1860_v47, %v1745_v48 }
 0x2dc   : > { %v1878_v1 = vsel %vm1873_vm5, %v1869_v63, %v1769_v35 }
 0x2dd   : > { %v6057_v32 = vpop.eup %4530  ;;  %v1887_v31 = vsel %vm1882_vm7, %v1878_v1, %v5882_v46  ;;  %v1861_v46 = vsel %vm1178_vm4, %v6046_v14, %v1723_v22 }
 0x2de   : > { %9125 = vst [vmem:[#allocation63_spill] sm:$0xff] %v6057_v32  ;;  %1980 = vrot.lane.b32.xlu0 %v6057_v32, %s9099_s22 }
 0x2df   : > { %2106 = vrot.lane.b32.xlu1 %v6022_v36, %s9119_s0 }
 0x2e0   : > { %2012 = vrot.lane.b32.xlu2 %v6057_v32, %s9115_s14 }
 0x2e1   : > { %v1793_v51 = vpop.permute.xlu1 %1792 }
 0x2e2   : > { %v1896_v48 = vsel %vm1891_vm8, %v1887_v31, %v1793_v51  ;;  %v1821_v15 = vpop.permute.xlu2 %1820 }
 0x2e3   : > { %v1905_v61 = vsel %vm1900_vm9, %v1896_v48, %v1817_v21  ;;  %v1843_v21 = vpop.permute.xlu0 %1842 }
 0x2e4   : > { %v1914_v59 = vsel %vm1909_vm10, %v1905_v61, %v1841_v12 }
 0x2e5   : > { %v1926_v35 = vsub.f32 %v5670_v26, %v1914_v59 }
 0x2e6   : > { %2076 = vrot.lane.b32.xlu0 %v6057_v32, %s4655_s16 }
 0x2e7   : > { %v1950_v7 = vmul.f32 1.442695, %v1926_v35  ;;  %2044 = vrot.lane.b32.xlu1 %v6057_v32, %s9090_s15 }
 0x2e8   : > { %2108 = vrot.lane.b32.xlu2 %v6057_v32, %s9119_s0 }
 0x2e9   : > { %4532 = vpow2.f32 %v1950_v7  ;;  %v1747_v47 = vpop.permute.xlu1 %1746 }
 0x2ea   : > { %v1870_v12 = vsel %vm1864_vm6, %v1861_v46, %v1747_v47  ;;  %v6081_v63 = vpop.permute.xlu2 %1702 }
 0x2eb   : > { %v1879_v26 = vsel %vm1873_vm5, %v1870_v12, %v1771_v9  ;;  %v1725_v59 = vpop.permute.xlu0 %1724 }
 0x2ec   : > { %v1888_v1 = vsel %vm1882_vm7, %v1879_v26, %v5896_v2 }
 0x2ed   : > { %v1897_v31 = vsel %vm1891_vm8, %v1888_v1, %v1795_v27 }
 0x2ee   : > { %2172 = vrot.lane.b32.xlu0 %v6057_v32, %s9117_s17 }
 0x2ef   : > { %v6088_v51 = vpop.eup %4532  ;;  %2140 = vrot.lane.b32.xlu1 %v6057_v32, %s9110_s23 }
 0x2f0   : > { %9126 = vst [vmem:[#allocation64_spill] sm:$0xff] %v6088_v51  ;;  %2046 = vrot.lane.b32.xlu2 %v6088_v51, %s9090_s15 }
 0x2f1   : > { %v1819_v22 = vpop.permute.xlu1 %1818 }
 0x2f2   : > { %v1906_v48 = vsel %vm1900_vm9, %v1897_v31, %v1819_v22  ;;  %v1775_v9 = vpop.permute.xlu2 %1774 }
 0x2f3   : > { %v1915_v61 = vsel %vm1909_vm10, %v1906_v48, %v1843_v21  ;;  %v1797_v47 = vpop.permute.xlu0 %1796 }
 0x2f4   : > { %v1928_v35 = vsub.f32 %v5722_v24, %v1915_v61 }
 0x2f6   : > { %v1954_v2 = vmul.f32 1.442695, %v1928_v35  ;;  %2014 = vrot.lane.b32.xlu0 %v6088_v51, %s9115_s14 }
 0x2f7   : > { %1982 = vrot.lane.b32.xlu1 %v6088_v51, %s9099_s22 }
 0x2f8   : > { %4534 = vpow2.f32 %v1954_v2  ;;  %2142 = vrot.lane.b32.xlu2 %v6088_v51, %s9110_s23 }
 0x2f9   : > { %v6104_v27 = vpop.permute.xlu1 %1700 }
 0x2fa   : > { %v1847_v7 = vpop.permute.xlu2 %1846  ;;  %v1862_v24 = vsel %vm1178_vm4, %v6104_v27, %v1725_v59 }
 0x2fb   : > { %v1871_v12 = vsel %vm1864_vm6, %v1862_v24, %v1749_v41  ;;  %v1751_v31 = vpop.permute.xlu0 %1750 }
 0x2fe   : > { %v6106_v46 = vpop.eup %4534  ;;  %2110 = vrot.lane.b32.xlu0 %v6088_v51, %s9119_s0 }
 0x2ff   : > { %9127 = vst [vmem:[#allocation65_spill] sm:$0xff] %v6106_v46  ;;  %2078 = vrot.lane.b32.xlu1 %v6088_v51, %s4655_s16 }
 0x300   : > { %1984 = vrot.lane.b32.xlu2 %v6106_v46, %s9099_s22 }
 0x301   : > { %v1773_v21 = vpop.permute.xlu1 %1772 }
 0x302   : > { %v1880_v26 = vsel %vm1873_vm5, %v1871_v12, %v1773_v21  ;;  %v6118_v1 = vpop.permute.xlu2 %2006 }
 0x303   : > { %v1889_v22 = vsel %vm1882_vm7, %v1880_v26, %v5918_v0 }
 0x304   : > { %v1898_v48 = vsel %vm1891_vm8, %v1889_v22, %v1797_v47  ;;  %v1823_v47 = vpop.permute.xlu0 %1822  ;;  %v4662_v22 = vmov 3  }
 0x305   : > { %v1907_v61 = vsel %vm1900_vm9, %v1898_v48, %v1821_v15  ;;  %4503 = vset.pattern.permute.xlu2 %v4662_v22 }
 0x306   : > { %2048 = vrot.lane.b32.xlu0 %v6106_v46, %s9090_s15 }
 0x307   : > { %2174 = vrot.lane.b32.xlu1 %v6088_v51, %s9117_s17 }
 0x308   : > { %2080 = vrot.lane.b32.xlu2 %v6106_v46, %s4655_s16 }
 0x309   : > { %v1845_v41 = vpop.permute.xlu1 %1844 }
 0x30a   : > { %v1916_v59 = vsel %vm1909_vm10, %v1907_v61, %v1845_v41  ;;  %v6131_v35 = vpop.permute.xlu2 %2102 }
 0x30b   : > { %v1930_v0 = vsub.f32 %v5746_v39, %v1916_v59 }
 0x30d   : > { %v1958_v2 = vmul.f32 1.442695, %v1930_v0 }
 0x30e   : > { %2144 = vrot.lane.b32.xlu0 %v6106_v46, %s9110_s23 }
 0x30f   : > { %4536 = vpow2.f32 %v1958_v2  ;;  %2016 = vrot.lane.b32.xlu1 %v6106_v46, %s9115_s14 }
 0x310   : > { %2176 = vrot.lane.b32.xlu2 %v6106_v46, %s9117_s17 }
 0x311   : > { %v1727_v24 = vpop.permute.xlu1 %1726 }
 0x312   : > { %v1863_v15 = vsel %vm1178_vm4, %v6081_v63, %v1727_v24  ;;  %v6142_v21 = vpop.permute.xlu2 %2040 }
 0x313   : > { %v1872_v39 = vsel %vm1864_vm6, %v1863_v15, %v1751_v31 }
 0x314   : > { %v1881_v26 = vsel %vm1873_vm5, %v1872_v39, %v1775_v9 }
 0x315   : > { %v6145_v12 = vpop.eup %4536  ;;  %v1890_v31 = vsel %vm1882_vm7, %v1881_v26, %v5934_v54 }
 0x316   : > { %9128 = vst [vmem:[#allocation66_spill] sm:$0xff] %v6145_v12  ;;  %1986 = vrot.lane.b32.xlu0 %v6145_v12, %s9099_s22 }
 0x317   : > { %2112 = vrot.lane.b32.xlu1 %v6106_v46, %s9119_s0 }
 0x318   : > { %2018 = vrot.lane.b32.xlu2 %v6145_v12, %s9115_s14  ;;  %v6154_v48 = vpop.permute.xlu0 %1974 }
 0x319   : > { %v1799_v41 = vpop.permute.xlu1 %1798 }
 0x31a   : > { %v1899_v61 = vsel %vm1891_vm8, %v1890_v31, %v1799_v41  ;;  %v6159_v59 = vpop.permute.xlu2 %2136 }
 0x31b   : > { %v1908_v9 = vsel %vm1900_vm9, %v1899_v61, %v1823_v47 }
 0x31c   : > { %v1917_v0 = vsel %vm1909_vm10, %v1908_v9, %v1847_v7 }
 0x31d   : > { %v1932_v2 = vsub.f32 %v5779_v20, %v1917_v0 }
 0x31e   : > { %2082 = vrot.lane.b32.xlu0 %v6145_v12, %s4655_s16 }
 0x31f   : > { %v1962_v24 = vmul.f32 1.442695, %v1932_v2  ;;  %2050 = vrot.lane.b32.xlu1 %v6145_v12, %s9090_s15 }
 0x320   : > { %2114 = vrot.lane.b32.xlu2 %v6145_v12, %s9119_s0  ;;  %v6170_v54 = vpop.permute.xlu0 %2070 }
 0x321   : > { %4538 = vpow2.f32 %v1962_v24  ;;  %v6172_v15 = vpop.permute.xlu1 %2038 }
 0x322   : > { %v6174_v47 = vpop.permute.xlu2 %1978 }
 0x326   : > { %2178 = vrot.lane.b32.xlu0 %v6145_v12, %s9117_s17 }
 0x327   : > { %v6178_v20 = vpop.eup %4538  ;;  %2146 = vrot.lane.b32.xlu1 %v6145_v12, %s9110_s23 }
 0x328   : > { %9129 = vst [vmem:[#allocation67_spill] sm:$0xff] %v6178_v20  ;;  %2052 = vrot.lane.b32.xlu2 %v6178_v20, %s9090_s15  ;;  %v6184_v7 = vpop.permute.xlu0 %2166 }
 0x329   : > { %v6186_v39 = vpop.permute.xlu1 %2134 }
 0x32a   : > { %v6188_v26 = vpop.permute.xlu2 %2074 }
 0x32b   : > { %9130 = vst [vmem:[#allocation68_spill] sm:$0xff] %v6188_v26 }
 0x32e   : > { %2020 = vrot.lane.b32.xlu0 %v6178_v20, %s9115_s14 }
 0x32f   : > { %1988 = vrot.lane.b32.xlu1 %v6178_v20, %s9099_s22 }
 0x330   : > { %2148 = vrot.lane.b32.xlu2 %v6178_v20, %s9110_s23  ;;  %v6196_v41 = vpop.permute.xlu0 %2008 }
 0x331   : > { %v6198_v31 = vpop.permute.xlu1 %1976 }
 0x332   : > { %v6200_v61 = vpop.permute.xlu2 %2170 }
 0x336   : > { %2116 = vrot.lane.b32.xlu0 %v6178_v20, %s9119_s0 }
 0x337   : > { %2084 = vrot.lane.b32.xlu1 %v6178_v20, %s4655_s16 }
 0x338   : > { %2475 = vperm.xlu2 %4503, %v5323_v18   ;;  %v6207_v9 = vpop.permute.xlu0 %2104 }
 0x339   : > { %v6209_v0 = vpop.permute.xlu1 %2072 }
 0x33a   : > { %v6211_v2 = vpop.permute.xlu2 %2012 }
 0x33b   : > { %9131 = vst [vmem:[#allocation69_spill] sm:$0xff] %v6211_v2 }
 0x33e   : > { %2467 = vperm.xlu0 %4497, %v5403_v8  }
 0x33f   : > { %2180 = vrot.lane.b32.xlu1 %v6178_v20, %s9117_s17 }
 0x340   : > { %2487 = vperm.xlu2 %4503, %v5393_v53   ;;  %v6217_v24 = vpop.permute.xlu0 %2042 }
 0x341   : > { %9132 = vst [vmem:[#allocation70_spill] sm:$0xff] %v6217_v24  ;;  %v6219_v12 = vpop.permute.xlu1 %2168  ;;  %v4663_v24 = vmov 4  }
 0x342   : > { %v6221_v51 = vpop.permute.xlu2 %2108 }
 0x343   : > { %9133 = vst [vmem:[#allocation71_spill] sm:$0xff] %v6221_v51 }
 0x346   : > { %4504 = vset.pattern.permute.xlu0 %v4662_v22 }
 0x347   : > { %2479 = vperm.xlu0 %4504, %v5335_v5   ;;  %2471 = vperm.xlu1 %4502, %v5465_v19  }
 0x348   : > { %2495 = vperm.xlu2 %4503, %v5486_v10   ;;  %v6226_v46 = vpop.permute.xlu0 %2138 }
 0x349   : > { %9134 = vst [vmem:[#allocation72_spill] sm:$0xff] %v6226_v46  ;;  %v6228_v2 = vpop.permute.xlu1 %2010 }
 0x34a   : > { %v6230_v20 = vpop.permute.xlu2 %2046 }
 0x34b   : > { %9135 = vst [vmem:[#allocation73_spill] sm:$0xff] %v6230_v20 }
 0x34f   : > { %2499 = vperm.xlu0 %4504, %v5430_v40   ;;  %4505 = vset.pattern.permute.xlu1 %v4662_v22 }
 0x350   : > { %2507 = vperm.xlu2 %4503, %v5249_v11   ;;  %2483 = vperm.xlu1 %4505, %v5346_v55   ;;  %v6235_v51 = vpop.permute.xlu0 %1980 }
 0x351   : > { %9136 = vst [vmem:[#allocation74_spill] sm:$0xff] %v6235_v51  ;;  %v6237_v32 = vpop.permute.xlu1 %2106 }
 0x352   : > { %9137 = vst [vmem:[#allocation75_spill] sm:$0xff] %v6237_v32  ;;  %v6239_v26 = vpop.permute.xlu2 %2142 }
 0x353   : > { %9138 = vst [vmem:[#allocation76_spill] sm:$0xff] %v6239_v26 }
 0x357   : > { %2511 = vperm.xlu0 %4504, %v5265_v29  }
 0x358   : > { %2519 = vperm.xlu2 %4503, %v5291_v28   ;;  %2491 = vperm.xlu1 %4505, %v5414_v33   ;;  %v6244_v20 = vpop.permute.xlu0 %2076 }
 0x359   : > { %9139 = vst [vmem:[#allocation77_spill] sm:$0xff] %v6244_v20  ;;  %v6246_v46 = vpop.permute.xlu1 %2044 }
 0x35a   : > { %9140 = vst [vmem:[#allocation78_spill] sm:$0xff] %v6246_v46  ;;  %v6248_v22 = vpop.permute.xlu2 %1984 }
 0x35b   : > { %9141 = vst [vmem:[#allocation79_spill] sm:$0xff] %v6248_v22 }
 0x35f   : > { %2523 = vperm.xlu0 %4504, %v5301_v38  }
 0x360   : > { %2531 = vperm.xlu2 %4503, %v5355_v56   ;;  %2503 = vperm.xlu1 %4505, %v5502_v58   ;;  %v6253_v51 = vpop.permute.xlu0 %2172 }
 0x361   : > { %9142 = vst [vmem:[#allocation80_spill] sm:$0xff] %v6253_v51  ;;  %v6255_v26 = vpop.permute.xlu1 %2140 }
 0x362   : > { %9143 = vst [vmem:[#allocation81_spill] sm:$0xff] %v6255_v26  ;;  %v6257_v32 = vpop.permute.xlu2 %2080 }
 0x363   : > { %9144 = vst [vmem:[#allocation82_spill] sm:$0xff] %v6257_v32 }
 0x367   : > { %2535 = vperm.xlu0 %4504, %v5368_v4  }
 0x368   : > { %2543 = vperm.xlu2 %4503, %v5438_v45   ;;  %2515 = vperm.xlu1 %4505, %v5271_v60   ;;  %v6262_v20 = vpop.permute.xlu0 %2014 }
 0x369   : > { %9145 = vst [vmem:[#allocation83_spill] sm:$0xff] %v6262_v20  ;;  %v6264_v22 = vpop.permute.xlu1 %1982 }
 0x36a   : > { %9146 = vst [vmem:[#allocation84_spill] sm:$0xff] %v6264_v22  ;;  %v6266_v46 = vpop.permute.xlu2 %2176 }
 0x36b   : > { %9147 = vst [vmem:[#allocation85_spill] sm:$0xff] %v6266_v46 }
 0x36f   : > { %2547 = vperm.xlu0 %4504, %v5403_v8  }
 0x370   : > { %4506 = vset.pattern.permute.xlu2 %v4663_v24  ;;  %2527 = vperm.xlu1 %4505, %v5313_v44   ;;  %v6270_v26 = vpop.permute.xlu0 %2110 }
 0x371   : > { %9148 = vst [vmem:[#allocation86_spill] sm:$0xff] %v6270_v26  ;;  %v6272_v32 = vpop.permute.xlu1 %2078  ;;  %2555 = vperm.xlu2 %4506, %v5323_v18  }
 0x372   : > { %9149 = vst [vmem:[#allocation87_spill] sm:$0xff] %v6272_v32  ;;  %v6275_v51 = vpop.permute.xlu2 %2018 }
 0x373   : > { %9150 = vst [vmem:[#allocation88_spill] sm:$0xff] %v6275_v51 }
 0x377   : > { %4507 = vset.pattern.permute.xlu0 %v4663_v24 }
 0x378   : > { %2559 = vperm.xlu0 %4507, %v5335_v5   ;;  %2539 = vperm.xlu1 %4505, %v5379_v25   ;;  %v6279_v46 = vpop.permute.xlu0 %2048 }
 0x379   : > { %9151 = vst [vmem:[#allocation89_spill] sm:$0xff] %v6279_v46  ;;  %v6281_v20 = vpop.permute.xlu1 %2174  ;;  %2567 = vperm.xlu2 %4506, %v5393_v53  }
 0x37a   : > { %9152 = vst [vmem:[#allocation90_spill] sm:$0xff] %v6281_v20  ;;  %v6284_v22 = vpop.permute.xlu2 %2114 }
 0x37b   : > { %9153 = vst [vmem:[#allocation91_spill] sm:$0xff] %v6284_v22 }
 0x380   : > { %2579 = vperm.xlu0 %4507, %v5430_v40   ;;  %2551 = vperm.xlu1 %4505, %v5465_v19   ;;  %v6288_v32 = vpop.permute.xlu0 %2144 }
 0x381   : > { %9154 = vst [vmem:[#allocation92_spill] sm:$0xff] %v6288_v32  ;;  %v6290_v51 = vpop.permute.xlu1 %2016  ;;  %2575 = vperm.xlu2 %4506, %v5486_v10  }
 0x382   : > { %9155 = vst [vmem:[#allocation93_spill] sm:$0xff] %v6290_v51  ;;  %v6293_v26 = vpop.permute.xlu2 %2052 }
 0x383   : > { %9156 = vst [vmem:[#allocation94_spill] sm:$0xff] %v6293_v26 }
 0x388   : > { %2591 = vperm.xlu0 %4507, %v5265_v29   ;;  %4508 = vset.pattern.permute.xlu1 %v4663_v24  ;;  %v6296_v46 = vpop.permute.xlu0 %1986 }
 0x389   : > { %9157 = vst [vmem:[#allocation95_spill] sm:$0xff] %v6296_v46  ;;  %v6298_v20 = vpop.permute.xlu1 %2112  ;;  %2587 = vperm.xlu2 %4506, %v5249_v11   ;;  %2563 = vperm.xlu1 %4508, %v5346_v55  }
 0x38a   : > { %9158 = vst [vmem:[#allocation96_spill] sm:$0xff] %v6298_v20  ;;  %v6302_v22 = vpop.permute.xlu2 %2148 }
 0x38b   : > { %9159 = vst [vmem:[#allocation97_spill] sm:$0xff] %v6302_v22 }
 0x390   : > { %2603 = vperm.xlu0 %4507, %v5301_v38   ;;  %v6305_v32 = vpop.permute.xlu0 %2082 }
 0x391   : > { %9160 = vst [vmem:[#allocation98_spill] sm:$0xff] %v6305_v32  ;;  %v6307_v51 = vpop.permute.xlu1 %2050  ;;  %2599 = vperm.xlu2 %4506, %v5291_v28   ;;  %2571 = vperm.xlu1 %4508, %v5414_v33  }
 0x392   : > { %9161 = vst [vmem:[#allocation99_spill] sm:$0xff] %v6307_v51  ;;  %v6311_v24 = vpop.permute.xlu2 %2475 }
 0x393   : > { %9162 = vst [vmem:[#allocation100_spill] sm:$0xff] %v6311_v24 }
 0x398   : > { %2615 = vperm.xlu0 %4507, %v5368_v4   ;;  %v6314_v26 = vpop.permute.xlu0 %2178 }
 0x399   : > { %9163 = vst [vmem:[#allocation101_spill] sm:$0xff] %v6314_v26  ;;  %v6316_v46 = vpop.permute.xlu1 %2146  ;;  %2611 = vperm.xlu2 %4506, %v5355_v56   ;;  %2583 = vperm.xlu1 %4508, %v5502_v58   ;;  %v4664_v26 = vmov 5  }
 0x39a   : > { %9164 = vst [vmem:[#allocation102_spill] sm:$0xff] %v6316_v46  ;;  %v6320_v22 = vpop.permute.xlu2 %2487 }
 0x39b   : > { %9165 = vst [vmem:[#allocation103_spill] sm:$0xff] %v6320_v22 }
 0x3a0   : > { %2627 = vperm.xlu0 %4507, %v5403_v8   ;;  %v6323_v32 = vpop.permute.xlu0 %2020 }
 0x3a1   : > { %9166 = vst [vmem:[#allocation104_spill] sm:$0xff] %v6323_v32  ;;  %2623 = vperm.xlu2 %4506, %v5438_v45   ;;  %2595 = vperm.xlu1 %4508, %v5271_v60   ;;  %v6327_v24 = vpop.permute.xlu1 %1988 }
 0x3a2   : > { %9167 = vst [vmem:[#allocation105_spill] sm:$0xff] %v6327_v24  ;;  %v6329_v51 = vpop.permute.xlu2 %2495 }
 0x3a3   : > { %9168 = vst [vmem:[#allocation106_spill] sm:$0xff] %v6329_v51 }
 0x3a8   : > { %4510 = vset.pattern.permute.xlu0 %v4664_v26  ;;  %v6331_v46 = vpop.permute.xlu0 %2116 }
 0x3a9   : > { %9169 = vst [vmem:[#allocation107_spill] sm:$0xff] %v6331_v46  ;;  %4509 = vset.pattern.permute.xlu2 %v4664_v26  ;;  %2639 = vperm.xlu0 %4510, %v5335_v5   ;;  %v6334_v22 = vpop.permute.xlu1 %2084 }
 0x3aa   : > { %9170 = vst [vmem:[#allocation108_spill] sm:$0xff] %v6334_v22  ;;  %2607 = vperm.xlu1 %4508, %v5313_v44   ;;  %2635 = vperm.xlu2 %4509, %v5323_v18   ;;  %v6338_v32 = vpop.permute.xlu2 %2507 }
 0x3ab   : > { %9171 = vst [vmem:[#allocation109_spill] sm:$0xff] %v6338_v32 }
 0x3b0   : > { %v6340_v20 = vpop.permute.xlu0 %2467 }
 0x3b1   : > { %9172 = vst [vmem:[#allocation110_spill] sm:$0xff] %v6340_v20  ;;  %2659 = vperm.xlu0 %4510, %v5430_v40   ;;  %v6343_v51 = vpop.permute.xlu1 %2180 }
 0x3b2   : > { %9173 = vst [vmem:[#allocation111_spill] sm:$0xff] %v6343_v51  ;;  %2619 = vperm.xlu1 %4508, %v5379_v25   ;;  %2647 = vperm.xlu2 %4509, %v5393_v53   ;;  %v6347_v46 = vpop.permute.xlu2 %2519 }
 0x3b3   : > { %9174 = vst [vmem:[#allocation112_spill] sm:$0xff] %v6347_v46 }
 0x3b9   : > { %2671 = vperm.xlu0 %4510, %v5265_v29   ;;  %v6350_v22 = vpop.permute.xlu1 %2471  ;;  %v6352_v24 = vpop.permute.xlu0 %2479 }
 0x3ba   : > { %9175 = vst [vmem:[#allocation113_spill] sm:$0xff] %v6350_v22  ;;  %2631 = vperm.xlu1 %4508, %v5465_v19   ;;  %2655 = vperm.xlu2 %4509, %v5486_v10   ;;  %v6356_v20 = vpop.permute.xlu2 %2531 }
 0x3bb   : > { %9176 = vst [vmem:[#allocation114_spill] sm:$0xff] %v6352_v24 }
 0x3bc   : > { %9177 = vst [vmem:[#allocation115_spill] sm:$0xff] %v6356_v20 }
 0x3c1   : > { %2683 = vperm.xlu0 %4510, %v5301_v38   ;;  %v6359_v51 = vpop.permute.xlu0 %2499 }
 0x3c2   : > { %9178 = vst [vmem:[#allocation116_spill] sm:$0xff] %v6359_v51  ;;  %4511 = vset.pattern.permute.xlu1 %v4664_v26  ;;  %2667 = vperm.xlu2 %4509, %v5249_v11   ;;  %v6362_v46 = vpop.permute.xlu2 %2543  ;;  %v6364_v32 = vpop.permute.xlu1 %2483 }
 0x3c3   : > { %9179 = vst [vmem:[#allocation117_spill] sm:$0xff] %v6362_v46  ;;  %2643 = vperm.xlu1 %4511, %v5346_v55  }
 0x3c4   : > { %9180 = vst [vmem:[#allocation118_spill] sm:$0xff] %v6364_v32 }
 0x3c9   : > { %2695 = vperm.xlu0 %4510, %v5368_v4   ;;  %v6368_v22 = vpop.permute.xlu0 %2511 }
 0x3ca   : > { %9181 = vst [vmem:[#allocation119_spill] sm:$0xff] %v6368_v22  ;;  %2679 = vperm.xlu2 %4509, %v5291_v28   ;;  %v6371_v20 = vpop.permute.xlu1 %2491  ;;  %v4665_v22 = vmov 6  }
 0x3cb   : > { %9182 = vst [vmem:[#allocation120_spill] sm:$0xff] %v6371_v20  ;;  %2651 = vperm.xlu1 %4511, %v5414_v33   ;;  %v6374_v51 = vpop.permute.xlu2 %2555 }
 0x3cc   : > { %9183 = vst [vmem:[#allocation121_spill] sm:$0xff] %v6374_v51 }
 0x3d1   : > { %2707 = vperm.xlu0 %4510, %v5403_v8   ;;  %v6377_v26 = vpop.permute.xlu0 %2523 }
 0x3d2   : > { %9184 = vst [vmem:[#allocation122_spill] sm:$0xff] %v6377_v26  ;;  %2691 = vperm.xlu2 %4509, %v5355_v56   ;;  %v6380_v32 = vpop.permute.xlu1 %2503 }
 0x3d3   : > { %9185 = vst [vmem:[#allocation123_spill] sm:$0xff] %v6380_v32  ;;  %2663 = vperm.xlu1 %4511, %v5502_v58   ;;  %v6383_v46 = vpop.permute.xlu2 %2567 }
 0x3d4   : > { %9186 = vst [vmem:[#allocation124_spill] sm:$0xff] %v6383_v46 }
 0x3d9   : > { %4513 = vset.pattern.permute.xlu0 %v4665_v22  ;;  %v6385_v24 = vpop.permute.xlu0 %2535 }
 0x3da   : > { %9187 = vst [vmem:[#allocation125_spill] sm:$0xff] %v6385_v24  ;;  %2703 = vperm.xlu2 %4509, %v5438_v45   ;;  %2719 = vperm.xlu0 %4513, %v5335_v5   ;;  %v6389_v20 = vpop.permute.xlu1 %2515 }
 0x3db   : > { %9188 = vst [vmem:[#allocation126_spill] sm:$0xff] %v6389_v20  ;;  %2675 = vperm.xlu1 %4511, %v5271_v60   ;;  %v6392_v26 = vpop.permute.xlu2 %2575 }
 0x3dc   : > { %9189 = vst [vmem:[#allocation127_spill] sm:$0xff] %v6392_v26 }
 0x3e1   : > { %v6394_v51 = vpop.permute.xlu0 %2547 }
 0x3e2   : > { %9190 = vst [vmem:[#allocation128_spill] sm:$0xff] %v6394_v51  ;;  %4512 = vset.pattern.permute.xlu2 %v4665_v22  ;;  %2739 = vperm.xlu0 %4513, %v5430_v40   ;;  %v6397_v32 = vpop.permute.xlu1 %2527 }
 0x3e3   : > { %9191 = vst [vmem:[#allocation129_spill] sm:$0xff] %v6397_v32  ;;  %2687 = vperm.xlu1 %4511, %v5313_v44   ;;  %2715 = vperm.xlu2 %4512, %v5323_v18   ;;  %v6401_v46 = vpop.permute.xlu2 %2587 }
 0x3e4   : > { %9192 = vst [vmem:[#allocation130_spill] sm:$0xff] %v6401_v46 }
 0x3ea   : > { %2751 = vperm.xlu0 %4513, %v5265_v29   ;;  %v6404_v20 = vpop.permute.xlu1 %2539  ;;  %v6406_v24 = vpop.permute.xlu0 %2559 }
 0x3eb   : > { %9193 = vst [vmem:[#allocation131_spill] sm:$0xff] %v6404_v20  ;;  %2699 = vperm.xlu1 %4511, %v5379_v25   ;;  %2727 = vperm.xlu2 %4512, %v5393_v53   ;;  %v6410_v26 = vpop.permute.xlu2 %2599 }
 0x3ec   : > { %9194 = vst [vmem:[#allocation132_spill] sm:$0xff] %v6406_v24 }
 0x3ed   : > { %9195 = vst [vmem:[#allocation133_spill] sm:$0xff] %v6410_v26 }
 0x3f2   : > { %2763 = vperm.xlu0 %4513, %v5301_v38   ;;  %v6413_v32 = vpop.permute.xlu1 %2551  ;;  %v6415_v51 = vpop.permute.xlu0 %2579 }
 0x3f3   : > { %9196 = vst [vmem:[#allocation134_spill] sm:$0xff] %v6413_v32  ;;  %2711 = vperm.xlu1 %4511, %v5465_v19   ;;  %2735 = vperm.xlu2 %4512, %v5486_v10   ;;  %v6419_v46 = vpop.permute.xlu2 %2611 }
 0x3f4   : > { %9197 = vst [vmem:[#allocation135_spill] sm:$0xff] %v6415_v51 }
 0x3f5   : > { %9198 = vst [vmem:[#allocation136_spill] sm:$0xff] %v6419_v46 }
 0x3fa   : > { %2775 = vperm.xlu0 %4513, %v5368_v4   ;;  %v6422_v20 = vpop.permute.xlu0 %2591 }
 0x3fb   : > { %9199 = vst [vmem:[#allocation137_spill] sm:$0xff] %v6422_v20  ;;  %4514 = vset.pattern.permute.xlu1 %v4665_v22  ;;  %2747 = vperm.xlu2 %4512, %v5249_v11   ;;  %v6425_v26 = vpop.permute.xlu2 %2623  ;;  %v6427_v24 = vpop.permute.xlu1 %2563  ;;  %v9029_v22 = vmov 7  }
 0x3fc   : > { %9200 = vst [vmem:[#allocation138_spill] sm:$0xff] %v6425_v26  ;;  %2723 = vperm.xlu1 %4514, %v5346_v55  }
 0x3fd   : > { %9201 = vst [vmem:[#allocation139_spill] sm:$0xff] %v6427_v24 }
 0x402   : > { %2787 = vperm.xlu0 %4513, %v5403_v8   ;;  %v6431_v32 = vpop.permute.xlu0 %2603 }
 0x403   : > { %9202 = vst [vmem:[#allocation140_spill] sm:$0xff] %v6431_v32  ;;  %2759 = vperm.xlu2 %4512, %v5291_v28   ;;  %v6434_v46 = vpop.permute.xlu1 %2571  ;;  %v2882_v32 = vsel %vm1178_vm4, %v5375_v13, %v5388_v52  ;;  %v2884_v13 = vsel %vm1178_vm4, %v5427_v17, %v5448_v6  ;;  %v9218_v6 = vld [vmem:[#allocation13_spill] sm:$0xff] }
 0x404   : > { %9203 = vst [vmem:[#allocation141_spill] sm:$0xff] %v6434_v46  ;;  %2731 = vperm.xlu1 %4514, %v5414_v33   ;;  %v6437_v20 = vpop.permute.xlu2 %2635  ;;  %v6454_v51 = vsel %vm1864_vm6, %v2882_v32, %v5399_v62  ;;  %v9212_v32 = vld [vmem:[#allocation8_spill] sm:$0xff] }
 0x405   : > { %9204 = vst [vmem:[#allocation142_spill] sm:$0xff] %v6437_v20  ;;  %v9235_v20 = vld [vmem:[#allocation25_spill] sm:$0xff] }
 0x406   : > { %9208 = vst [vmem:[#allocation146_spill] sm:$0xff] %v6454_v51  ;;  %v9223_v51 = vld [vmem:[#allocation16_spill] sm:$0xff] }
 0x40a   : > { %4516 = vset.pattern.permute.xlu0 %v9029_v22  ;;  %v6440_v26 = vpop.permute.xlu0 %2615  ;;  %v2885_v22 = vsel %vm1178_vm4, %v5410_v57, %v5423_v16  ;;  %v9214_v57 = vld [vmem:[#allocation10_spill] sm:$0xff]  ;;  %v9215_v16 = vld [vmem:[#allocation7_spill] sm:$0xff] }
 0x40b   : > { %9205 = vst [vmem:[#allocation143_spill] sm:$0xff] %v6440_v26  ;;  %2771 = vperm.xlu2 %4512, %v5355_v56   ;;  %2799 = vperm.xlu0 %4516, %v5335_v5   ;;  %v6444_v24 = vpop.permute.xlu1 %2583  ;;  %v2883_v5 = vsel %vm1178_vm4, %v5416_v34, %v5433_v42  ;;  %v6467_v52 = vsel %vm1864_vm6, %v2885_v22, %v5445_v49  ;;  %v9216_v42 = vld [vmem:[#allocation12_spill] sm:$0xff]  ;;  %v9217_v26 = vld [vmem:[#allocation9_spill] sm:$0xff]  ;;  %v9220_v22 = vld [vmem:[#allocation14_spill] sm:$0xff] }
 0x40c   : > { %9206 = vst [vmem:[#allocation144_spill] sm:$0xff] %v6444_v24  ;;  %2743 = vperm.xlu1 %4514, %v5502_v58   ;;  %v6450_v46 = vpop.permute.xlu2 %2647  ;;  %v9210_v24 = vld [vmem:[#allocation6_spill] sm:$0xff]  ;;  %v2874_v34 = vsel %vm1178_vm4, %v9215_v16, %v9214_v57  ;;  %v2886_v17 = vsel %vm1178_vm4, %v9217_v26, %v9216_v42  ;;  %v9226_v57 = vld [vmem:[#allocation17_spill] sm:$0xff] }
 0x40d   : > { %9207 = vst [vmem:[#allocation145_spill] sm:$0xff] %v6450_v46  ;;  %v6471_v62 = vsel %vm1864_vm6, %v2883_v5, %v9210_v24  ;;  %v6475_v46 = vsel %vm1864_vm6, %v2884_v13, %v9212_v32  ;;  %v6485_v49 = vsel %vm1864_vm6, %v2874_v34, %v9218_v6  ;;  %v9222_v5 = vld [vmem:[#allocation19_spill] sm:$0xff]  ;;  %v9228_v26 = vld [vmem:[#allocation21_spill] sm:$0xff]  ;;  %v9229_v42 = vld [vmem:[#allocation18_spill] sm:$0xff] }
 0x40e   : > { %9209 = vst [vmem:[#allocation147_spill] sm:$0xff] %v6467_v52  ;;  %v9221_v52 = vld [vmem:[#allocation11_spill] sm:$0xff]  ;;  %v2888_v13 = vsel %vm1178_vm4, %v9223_v51, %v9222_v5  ;;  %v2875_v34 = vsel %vm1178_vm4, %v9229_v42, %v9228_v26  ;;  %v9230_v6 = vld [vmem:[#allocation22_spill] sm:$0xff]  ;;  %v9234_v5 = vld [vmem:[#allocation29_spill] sm:$0xff] }
 0x40f   : > { %9211 = vst [vmem:[#allocation6_spill] sm:$0xff] %v6471_v62  ;;  %v2887_v24 = vsel %vm1178_vm4, %v9221_v52, %v9220_v22  ;;  %v9224_v32 = vld [vmem:[#allocation15_spill] sm:$0xff]  ;;  %v6506_v62 = vsel %vm1864_vm6, %v2888_v13, %v9230_v6  ;;  %v9233_v22 = vld [vmem:[#allocation20_spill] sm:$0xff] }
 0x410   : > { %9213 = vst [vmem:[#allocation8_spill] sm:$0xff] %v6475_v46  ;;  %v6495_v46 = vsel %vm1864_vm6, %v2886_v17, %v9224_v32  ;;  %v6499_v16 = vsel %vm1864_vm6, %v2887_v24, %v9226_v57  ;;  %v9232_v52 = vld [vmem:[#allocation23_spill] sm:$0xff]  ;;  %v2877_v17 = vsel %vm1178_vm4, %v9235_v20, %v9234_v5  ;;  %v1998_v57 = vadd.f32 %v5973_v37, %v6154_v48  ;;  %v9241_v6 = vld [vmem:[#allocation32_spill] sm:$0xff]  ;;  %v9246_v5 = vld [vmem:[#allocation34_spill] sm:$0xff] }
 0x411   : > { %9219 = vst [vmem:[#allocation10_spill] sm:$0xff] %v6485_v49  ;;  %v2876_v51 = vsel %vm1178_vm4, %v9233_v22, %v9232_v52  ;;  %v9236_v32 = vld [vmem:[#allocation31_spill] sm:$0xff]  ;;  %v9242_v52 = vld [vmem:[#allocation28_spill] sm:$0xff] }
 0x412   : > { %9225 = vst [vmem:[#allocation7_spill] sm:$0xff] %v6495_v46  ;;  %v1921_v24 = vsub.f32 %v9236_v32, %v5926_v50  ;;  %v9239_v13 = vld [vmem:[#allocation27_spill] sm:$0xff]  ;;  %v2889_v22 = vsel %vm1178_vm4, %v9242_v52, %v9241_v6  ;;  %v6533_v50 = vpop.permute.xlu0 %2627  ;;  %v9247_v32 = vld [vmem:[#allocation30_spill] sm:$0xff] }
 0x413   : > { %9227 = vst [vmem:[#allocation12_spill] sm:$0xff] %v6499_v16  ;;  %v9237_v16 = vld [vmem:[#allocation24_spill] sm:$0xff]  ;;  %v6524_v42 = vsel %vm1864_vm6, %v2876_v51, %v9239_v13  ;;  %v2890_v46 = vsel %vm1178_vm4, %v9247_v32, %v9246_v5  ;;  %v9250_v51 = vld [vmem:[#allocation62_spill] sm:$0xff]  ;;  %2783 = vperm.xlu2 %4512, %v5438_v45   ;;  %2819 = vperm.xlu0 %4516, %v5430_v40   ;;  %v6546_v6 = vpop.permute.xlu1 %2595  ;;  %v9255_v52 = vld [vmem:[#allocation39_spill] sm:$0xff] }
 0x414   : > { %9231 = vst [vmem:[#allocation9_spill] sm:$0xff] %v6506_v62  ;;  %v6520_v26 = vsel %vm1864_vm6, %v2875_v34, %v9237_v16  ;;  %v9243_v62 = vld [vmem:[#allocation33_spill] sm:$0xff]  ;;  %v9248_v16 = vld [vmem:[#allocation35_spill] sm:$0xff]  ;;  %v9251_v13 = vld [vmem:[#allocation26_spill] sm:$0xff]  ;;  %2755 = vperm.xlu1 %4514, %v5271_v60   ;;  %v6561_v40 = vpop.permute.xlu2 %2655 }
 0x415   : > { %9238 = vst [vmem:[#allocation13_spill] sm:$0xff] %v6520_v26  ;;  %v6531_v20 = vsel %vm1864_vm6, %v2877_v17, %v9243_v62  ;;  %v6540_v34 = vsel %vm1864_vm6, %v2889_v22, %v9248_v16  ;;  %v9253_v62 = vld [vmem:[#allocation37_spill] sm:$0xff]  ;;  %v9257_v32 = vld [vmem:[#allocation50_spill] sm:$0xff] }
 0x416   : > { %9240 = vst [vmem:[#allocation14_spill] sm:$0xff] %v6524_v42  ;;  %v1919_v42 = vsub.f32 %v9251_v13, %v9250_v51  ;;  %v6550_v17 = vsel %vm1864_vm6, %v2890_v46, %v9253_v62  ;;  %v9258_v22 = vld [vmem:[#allocation46_spill] sm:$0xff]  ;;  %v9259_v51 = vld [vmem:[#allocation44_spill] sm:$0xff]  ;;  %v9271_v26 = vld [vmem:[#allocation45_spill] sm:$0xff] }
 0x417   : > { %9244 = vst [vmem:[#allocation11_spill] sm:$0xff] %v6531_v20  ;;  %v2880_v16 = vsel %vm1178_vm4, %v9258_v22, %v9257_v32  ;;  %v1923_v13 = vsub.f32 %v9259_v51, %v5957_v30  ;;  %v9263_v62 = vld [vmem:[#allocation42_spill] sm:$0xff]  ;;  %v9266_v32 = vld [vmem:[#allocation41_spill] sm:$0xff]  ;;  %v9268_v30 = vld [vmem:[#allocation47_spill] sm:$0xff] }
 0x418   : > { %9245 = vst [vmem:[#allocation19_spill] sm:$0xff] %v6533_v50  ;;  %v9256_v50 = vld [vmem:[#allocation36_spill] sm:$0xff] }
 0x419   : > { %9249 = vst [vmem:[#allocation16_spill] sm:$0xff] %v6540_v34  ;;  %v2891_v5 = vsel %vm1178_vm4, %v9256_v50, %v9255_v52  ;;  %v9262_v34 = vld [vmem:[#allocation40_spill] sm:$0xff]  ;;  %v1940_v50 = vmul.f32 1.442695, %v1921_v24  ;;  %v2030_v52 = vadd.f32 %v6118_v1, %v1998_v57  ;;  %v9275_v57 = vld [vmem:[#allocation54_spill] sm:$0xff] }
 0x41a   : > { %9252 = vst [vmem:[#allocation15_spill] sm:$0xff] %v6546_v6  ;;  %v9261_v6 = vld [vmem:[#allocation43_spill] sm:$0xff]  ;;  %v6574_v22 = vsel %vm1864_vm6, %v2891_v5, %v9266_v32  ;;  %v1936_v5 = vmul.f32 1.442695, %v1919_v42 }
 0x41b   : > { %9254 = vst [vmem:[#allocation17_spill] sm:$0xff] %v6550_v17  ;;  %v2878_v46 = vsel %vm1178_vm4, %v9262_v34, %v9261_v6  ;;  %v9264_v17 = vld [vmem:[#allocation38_spill] sm:$0xff]  ;;  %v9272_v6 = vld [vmem:[#allocation52_spill] sm:$0xff]  ;;  %v2062_v32 = vadd.f32 %v6172_v15, %v2030_v52  ;;  %4540 = vpow2.f32 %v1940_v50  ;;  %v3086_v52 = vsel %vm1178_vm4, %v6154_v48, %v5973_v37  ;;  %2831 = vperm.xlu0 %4516, %v5265_v29  }
 0x41c   : > { %9260 = vst [vmem:[#allocation21_spill] sm:$0xff] %v6561_v40  ;;  %v6569_v20 = vsel %vm1178_vm4, %v9264_v17, %v9263_v62  ;;  %v6578_v51 = vsel %vm1864_vm6, %v2878_v46, %v9268_v30  ;;  %v9270_v40 = vld [vmem:[#allocation49_spill] sm:$0xff]  ;;  %v1927_v49 = vsub.f32 %v9272_v6, %v5997_v3  ;;  %v6591_v62 = vsel %vm1864_vm6, %v2880_v16, %v9275_v57  ;;  %v9276_v46 = vld [vmem:[#allocation55_spill] sm:$0xff]  ;;  %v9281_v16 = vld [vmem:[#allocation48_spill] sm:$0xff] }
 0x41d   : > { %9265 = vst [vmem:[#allocation18_spill] sm:$0xff] %v6569_v20  ;;  %v2879_v34 = vsel %vm1178_vm4, %v9271_v26, %v9270_v40  ;;  %v9273_v17 = vld [vmem:[#allocation53_spill] sm:$0xff]  ;;  %v9277_v30 = vld [vmem:[#allocation51_spill] sm:$0xff]  ;;  %v9280_v40 = vld [vmem:[#allocation56_spill] sm:$0xff]  ;;  %v1944_v6 = vmul.f32 1.442695, %v1923_v13  ;;  %v1925_v42 = vsub.f32 %v9281_v16, %v6020_v23  ;;  %v3310_v50 = vsel %vm1178_vm4, %v6172_v15, %v6118_v1  ;;  %2767 = vperm.xlu1 %4514, %v5313_v44  }
 0x41e   : > { %9267 = vst [vmem:[#allocation22_spill] sm:$0xff] %v6574_v22  ;;  %v6587_v24 = vsel %vm1864_vm6, %v2879_v34, %v9273_v17  ;;  %v9279_v26 = vld [vmem:[#allocation57_spill] sm:$0xff]  ;;  %v3014_v34 = vsel %vm1178_vm4, %v5973_v37, %v6184_v7  ;;  %v3206_v17 = vsel %vm1178_vm4, %v6118_v1, %v6154_v48  ;;  %v1952_v57 = vmul.f32 1.442695, %v1927_v49  ;;  %v6625_v49 = vpop.permute.xlu0 %2639  ;;  %v9289_v20 = vld [vmem:[#allocation60_spill] sm:$0xff] }
 0x41f   : > { %9269 = vst [vmem:[#allocation23_spill] sm:$0xff] %v6578_v51  ;;  %v6597_v51 = vsel %vm1178_vm4, %v9277_v30, %v9276_v46  ;;  %v2881_v3 = vsel %vm1178_vm4, %v9280_v40, %v9279_v26  ;;  %v9282_v46 = vld [vmem:[#allocation59_spill] sm:$0xff]  ;;  %v3094_v30 = vsel %vm1864_vm6, %v3086_v52, %v6184_v7  ;;  %4542 = vpow2.f32 %v1936_v5  ;;  %v9283_v23 = vld [vmem:[#allocation61_spill] sm:$0xff]  ;;  %v6630_v52 = vpop.permute.xlu1 %2607  ;;  %v6633_v5 = vpop.permute.xlu2 %2667 }
 0x420   : > { %9274 = vst [vmem:[#allocation20_spill] sm:$0xff] %v6587_v24  ;;  %v1929_v13 = vsub.f32 %v9282_v46, %v6046_v14  ;;  %v1933_v26 = vsub.f32 %v9283_v23, %v6081_v63  ;;  %v2094_v40 = vadd.f32 %v6170_v54, %v2062_v32  ;;  %v9284_v16 = vmov 7   ;;  %v9287_v23 = vld [vmem:[#allocation58_spill] sm:$0xff] }
 0x421   : > { %9278 = vst [vmem:[#allocation29_spill] sm:$0xff] %v6597_v51  ;;  %4515 = vset.pattern.permute.xlu2 %v9284_v16  ;;  %v3022_v14 = vsel %vm1864_vm6, %v3014_v34, %v6186_v39  ;;  %4544 = vpow2.f32 %v1944_v6  ;;  %v3214_v63 = vsel %vm1864_vm6, %v3206_v17, %v5973_v37  ;;  %v3382_v29 = vsel %vm1178_vm4, %v6170_v54, %v6172_v15  ;;  %v6655_v22 = vpop.eup %4540 }
 0x422   : > { %9285 = vst [vmem:[#allocation25_spill] sm:$0xff] %v6630_v52  ;;  %2795 = vperm.xlu2 %4515, %v5323_v18   ;;  %v3460_v32 = vsel %vm1178_vm4, %v6131_v35, %v6170_v54  ;;  %v1948_v6 = vmul.f32 1.442695, %v1925_v42  ;;  %v3102_v34 = vsel %vm1873_vm5, %v3094_v30, %v6186_v39  ;;  %v3222_v18 = vsel %vm1873_vm5, %v3214_v63, %v6184_v7 }
 0x423   : > { %9286 = vst [vmem:[#allocation31_spill] sm:$0xff] %v6633_v5  ;;  %v3318_v46 = vsel %vm1864_vm6, %v3310_v50, %v6154_v48  ;;  %v6651_v17 = vsel %vm1864_vm6, %v2881_v3, %v9287_v23  ;;  %4546 = vpow2.f32 %v1952_v57  ;;  %v1956_v51 = vmul.f32 1.442695, %v1929_v13  ;;  %2843 = vperm.xlu0 %4516, %v5301_v38  }
 0x424   : > { %9288 = vst [vmem:[#allocation24_spill] sm:$0xff] %v6651_v17  ;;  %v3030_v52 = vsel %vm1873_vm5, %v3022_v14, %v6131_v35  ;;  %v1964_v42 = vmul.f32 1.442695, %v1933_v26  ;;  %v2126_v30 = vadd.f32 %v6131_v35, %v2094_v40  ;;  %v3390_v63 = vsel %vm1864_vm6, %v3382_v29, %v6118_v1 }
 0x425   : > { %v3468_v50 = vsel %vm1864_vm6, %v3460_v32, %v6172_v15  ;;  %v1931_v3 = vsub.f32 %v9289_v20, %v6104_v27  ;;  %v3110_v57 = vsel %vm1882_vm7, %v3102_v34, %v6131_v35  ;;  %v3230_v13 = vsel %vm1882_vm7, %v3222_v18, %v6186_v39  ;;  %v6670_v14 = vpop.eup %4542  ;;  %2779 = vperm.xlu1 %4514, %v5379_v25  }
 0x426   : > { %v3326_v26 = vsel %vm1873_vm5, %v3318_v46, %v5973_v37  ;;  %4548 = vpow2.f32 %v1948_v6  ;;  %v2158_v40 = vadd.f32 %v6186_v39, %v2126_v30  ;;  %v3038_v29 = vsel %vm1882_vm7, %v3030_v52, %v6170_v54  ;;  %v6689_v52 = vpop.permute.xlu0 %2659 }
 0x427   : > { %v3334_v27 = vsel %vm1882_vm7, %v3326_v26, %v6184_v7  ;;  %v6677_v20 = vpop.eup %4544  ;;  %4550 = vpow2.f32 %v1956_v51  ;;  %v3398_v32 = vsel %vm1873_vm5, %v3390_v63, %v6154_v48  ;;  %v3476_v34 = vsel %vm1873_vm5, %v3468_v50, %v6118_v1  ;;  %9290 = vst [vmem:[#allocation27_spill] sm:$0xff] %v6689_v52  ;;  %v6701_v50 = vpop.permute.xlu1 %2619 }
 0x428   : > { %v3536_v6 = vsel %vm1178_vm4, %v6186_v39, %v6131_v35  ;;  %v1999_v18 = vadd.f32 %v6004_v43, %v6198_v31  ;;  %v3118_v51 = vsel %vm1891_vm8, %v3110_v57, %v6170_v54  ;;  %v3238_v46 = vsel %vm1891_vm8, %v3230_v13, %v6131_v35  ;;  %9291 = vst [vmem:[#allocation32_spill] sm:$0xff] %v6701_v50  ;;  %v6704_v38 = vpop.permute.xlu2 %2679 }
 0x429   : > { %v3608_v23 = vsel %vm1178_vm4, %v6184_v7, %v6186_v39  ;;  %v6698_v30 = vpop.eup %4546  ;;  %4552 = vpow2.f32 %v1964_v42  ;;  %v1960_v63 = vmul.f32 1.442695, %v1931_v3  ;;  %9292 = vst [vmem:[#allocation28_spill] sm:$0xff] %v6704_v38  ;;  %v3046_v57 = vsel %vm1891_vm8, %v3038_v29, %v6172_v15 }
 0x42a   : > { %2807 = vperm.xlu2 %4515, %v5393_v53   ;;  %v3342_v13 = vsel %vm1891_vm8, %v3334_v27, %v6186_v39  ;;  %v6712_v26 = vadd.f32 %v6022_v36, %v6174_v47  ;;  %v2190_v42 = vadd.f32 %v6184_v7, %v2158_v40  ;;  %v3484_v3 = vsel %vm1882_vm7, %v3476_v34, %v6154_v48 }
 0x42b   : > { %v3544_v53 = vsel %vm1864_vm6, %v3536_v6, %v6170_v54  ;;  %v3126_v50 = vsel %vm1900_vm9, %v3118_v51, %v6172_v15  ;;  %v3246_v29 = vsel %vm1900_vm9, %v3238_v46, %v6170_v54  ;;  %v3406_v27 = vsel %vm1882_vm7, %v3398_v32, %v5973_v37  ;;  %2855 = vperm.xlu0 %4516, %v5368_v4  }
 0x42c   : > { %v3616_v17 = vsel %vm1864_vm6, %v3608_v23, %v6131_v35  ;;  %v6727_v38 = vpop.eup %4548  ;;  %v2031_v40 = vadd.f32 %v6196_v41, %v1999_v18  ;;  %v3054_v34 = vsel %vm1900_vm9, %v3046_v57, %v6118_v1  ;;  %v3537_v6 = vsel %vm1178_vm4, %v6159_v59, %v6207_v9 }
 0x42d   : > { %v3350_v51 = vsel %vm1900_vm9, %v3342_v13, %v6131_v35  ;;  %v6737_v46 = vpop.eup %4550  ;;  %v3414_v32 = vsel %vm1891_vm8, %v3406_v27, %v6184_v7  ;;  %v3492_v23 = vsel %vm1891_vm8, %v3484_v3, %v5973_v37  ;;  %v3088_v18 = vsel %vm1178_vm4, %v6174_v47, %v6022_v36  ;;  %2791 = vperm.xlu1 %4514, %v5465_v19  }
 0x42e   : > { %v3552_v57 = vsel %vm1873_vm5, %v3544_v53, %v6172_v15  ;;  %v2198_v24 = vadd.f32 %v6670_v14, %v2190_v42  ;;  %v6751_v13 = vsel %vm1909_vm10, %v3126_v50, %v6118_v1  ;;  %v6755_v5 = vsel %vm1909_vm10, %v3246_v29, %v6172_v15 }
 0x42f   : > { %v3624_v3 = vsel %vm1873_vm5, %v3616_v17, %v6170_v54  ;;  %v6759_v27 = vpop.eup %4552  ;;  %v6763_v52 = vsel %vm1909_vm10, %v3054_v34, %v6154_v48  ;;  %v3545_v42 = vsel %vm1864_vm6, %v3537_v6, %v6209_v0  ;;  %v6769_v50 = vsel %vm1909_vm10, %v3350_v51, %v6170_v54  ;;  %v6775_v17 = vpop.permute.xlu0 %2671 }
 0x430   : > { %9293 = vst [vmem:[#allocation33_spill] sm:$0xff] %v6769_v50  ;;  %v3500_v53 = vsel %vm1900_vm9, %v3492_v23, %v6184_v7  ;;  %v2063_v29 = vadd.f32 %v6142_v21, %v2031_v40  ;;  %v3087_v34 = vsel %vm1178_vm4, %v6198_v31, %v6004_v43  ;;  %v3422_v6 = vsel %vm1900_vm9, %v3414_v32, %v6186_v39  ;;  %v6785_v51 = vpop.permute.xlu1 %2631  ;;  %v6788_v4 = vpop.permute.xlu2 %2691 }
 0x431   : > { %v3560_v54 = vsel %vm1882_vm7, %v3552_v57, %v6118_v1  ;;  %4554 = vpow2.f32 %v1960_v63  ;;  %9294 = vst [vmem:[#allocation34_spill] sm:$0xff] %v6785_v51  ;;  %v3015_v40 = vsel %vm1178_vm4, %v6004_v43, %v6219_v12  ;;  %v3461_v32 = vsel %vm1178_vm4, %v6207_v9, %v6209_v0 }
 0x432   : > { %2815 = vperm.xlu2 %4515, %v5486_v10   ;;  %9295 = vst [vmem:[#allocation30_spill] sm:$0xff] %v6788_v4  ;;  %v3632_v23 = vsel %vm1882_vm7, %v3624_v3, %v6172_v15  ;;  %v3553_v63 = vsel %vm1873_vm5, %v3545_v42, %v6142_v21  ;;  %v3095_v57 = vsel %vm1864_vm6, %v3087_v34, %v6219_v12  ;;  %4556 = vrcp.f32 %v2198_v24 }
 0x433   : > { %v3207_v10 = vsel %vm1178_vm4, %v6196_v41, %v6198_v31  ;;  %v3383_v51 = vsel %vm1178_vm4, %v6209_v0, %v6142_v21  ;;  %v2095_v50 = vadd.f32 %v6209_v0, %v2063_v29  ;;  %v6811_v4 = vsel %vm1909_vm10, %v3500_v53, %v6186_v39  ;;  %2867 = vperm.xlu0 %4516, %v5403_v8  }
 0x434   : > { %9296 = vst [vmem:[#allocation35_spill] sm:$0xff] %v6811_v4  ;;  %v3311_v15 = vsel %vm1178_vm4, %v6142_v21, %v6196_v41  ;;  %v3568_v3 = vsel %vm1891_vm8, %v3560_v54, %v6154_v48  ;;  %v3023_v42 = vsel %vm1864_vm6, %v3015_v40, %v6159_v59  ;;  %v6822_v34 = vsel %vm1909_vm10, %v3422_v6, %v6131_v35 }
 0x435   : > { %9297 = vst [vmem:[#allocation62_spill] sm:$0xff] %v6822_v34  ;;  %v3469_v29 = vsel %vm1864_vm6, %v3461_v32, %v6142_v21  ;;  %v3640_v39 = vsel %vm1891_vm8, %v3632_v23, %v6118_v1  ;;  %v3561_v53 = vsel %vm1882_vm7, %v3553_v63, %v6196_v41  ;;  %v3103_v4 = vsel %vm1873_vm5, %v3095_v57, %v6159_v59 }
 0x436   : > { %v3215_v54 = vsel %vm1864_vm6, %v3207_v10, %v6004_v43  ;;  %v3391_v40 = vsel %vm1864_vm6, %v3383_v51, %v6196_v41  ;;  %v3016_v6 = vsel %vm1178_vm4, %v6022_v36, %v6200_v61  ;;  %v3319_v1 = vsel %vm1864_vm6, %v3311_v15, %v6198_v31  ;;  %4517 = vset.pattern.permute.xlu1 %v9284_v16 }
 0x437   : > { %v3223_v35 = vsel %vm1873_vm5, %v3215_v54, %v6219_v12  ;;  %v3576_v32 = vsel %vm1900_vm9, %v3568_v3, %v5973_v37  ;;  %v6845_v23 = vpop.eup %4554  ;;  %v2127_v63 = vadd.f32 %v6207_v9, %v2095_v50  ;;  %v3031_v51 = vsel %vm1873_vm5, %v3023_v42, %v6207_v9  ;;  %v6855_v54 = vpop.permute.xlu0 %2683  ;;  %2803 = vperm.xlu1 %4517, %v5346_v55  }
 0x438   : > { %v3477_v57 = vsel %vm1873_vm5, %v3469_v29, %v6196_v41  ;;  %v3648_v10 = vsel %vm1900_vm9, %v3640_v39, %v6154_v48  ;;  %v3569_v15 = vsel %vm1891_vm8, %v3561_v53, %v6198_v31  ;;  %v3111_v3 = vsel %vm1882_vm7, %v3103_v4, %v6207_v9  ;;  %v6869_v8 = vpop.permute.xlu2 %2703 }
 0x439   : > { %v3096_v50 = vsel %vm1864_vm6, %v3088_v18, %v6200_v61  ;;  %v3399_v42 = vsel %vm1873_vm5, %v3391_v40, %v6198_v31  ;;  %v2032_v48 = vadd.f32 %v6228_v2, %v6712_v26  ;;  %9298 = vst [vmem:[#allocation26_spill] sm:$0xff] %v6869_v8  ;;  %v3231_v29 = vsel %vm1882_vm7, %v3223_v35, %v6159_v59  ;;  %v6876_v18 = vpop.permute.xlu1 %2643  ;;  %v9341_v8 = vld [vmem:[#allocation76_spill] sm:$0xff] }
 0x43a   : > { %2827 = vperm.xlu2 %4515, %v5249_v11   ;;  %v3327_v4 = vsel %vm1873_vm5, %v3319_v1, %v6004_v43  ;;  %9299 = vst [vmem:[#allocation37_spill] sm:$0xff] %v6876_v18  ;;  %v3039_v24 = vsel %vm1882_vm7, %v3031_v51, %v6209_v0  ;;  %v6882_v16 = vsel %vm1909_vm10, %v3576_v32, %v6184_v7  ;;  %v9302_v7 = vld [vmem:[#allocation70_spill] sm:$0xff]  ;;  %v9303_v32 = vld [vmem:[#allocation68_spill] sm:$0xff] }
 0x43b   : > { %9300 = vst [vmem:[#allocation39_spill] sm:$0xff] %v6882_v16  ;;  %v3485_v11 = vsel %vm1882_vm7, %v3477_v57, %v6198_v31  ;;  %v6888_v26 = vsel %vm1909_vm10, %v3648_v10, %v5973_v37  ;;  %v2159_v39 = vadd.f32 %v6159_v59, %v2127_v63  ;;  %v3577_v55 = vsel %vm1900_vm9, %v3569_v15, %v6004_v43 }
 0x43c   : > { %9301 = vst [vmem:[#allocation36_spill] sm:$0xff] %v6888_v26  ;;  %v3119_v53 = vsel %vm1891_vm8, %v3111_v3, %v6209_v0  ;;  %v3407_v40 = vsel %vm1882_vm7, %v3399_v42, %v6004_v43  ;;  %v3312_v35 = vsel %vm1178_vm4, %v9302_v7, %v6228_v2  ;;  %v3239_v1 = vsel %vm1891_vm8, %v3231_v29, %v6207_v9  ;;  %v9306_v29 = vld [vmem:[#allocation75_spill] sm:$0xff]  ;;  %v6926_v26 = vpop.eup %4556 }
 0x43d   : > { %v3335_v37 = vsel %vm1882_vm7, %v3327_v4, %v6219_v12  ;;  %v3384_v63 = vsel %vm1178_vm4, %v9303_v32, %v9302_v7  ;;  %v2064_v51 = vadd.f32 %v9302_v7, %v2032_v48  ;;  %v3047_v57 = vsel %vm1891_vm8, %v3039_v24, %v6142_v21  ;;  %v9307_v4 = vld [vmem:[#allocation72_spill] sm:$0xff]  ;;  %9308 = vst [vmem:[#allocation44_spill] sm:$0xff] %v6926_v26 }
 0x43e   : > { %v3392_v10 = vsel %vm1864_vm6, %v3384_v63, %v6228_v2  ;;  %v3493_v15 = vsel %vm1891_vm8, %v3485_v11, %v6004_v43  ;;  %v6915_v3 = vadd.f32 %v6219_v12, %v2159_v39  ;;  %v6919_v42 = vsel %vm1909_vm10, %v3577_v55, %v6219_v12  ;;  %3696 = vrot.lane.b32.xlu0 %v6655_v22, %s9117_s17 }
 0x43f   : > { %9305 = vst [vmem:[#allocation46_spill] sm:$0xff] %v6919_v42  ;;  %v3538_v48 = vsel %vm1178_vm4, %v9307_v4, %v9306_v29  ;;  %v3127_v24 = vsel %vm1900_vm9, %v3119_v53, %v6142_v21  ;;  %v3320_v63 = vsel %vm1864_vm6, %v3312_v35, %v6174_v47  ;;  %v3247_v11 = vsel %vm1900_vm9, %v3239_v1, %v6209_v0 }
 0x440   : > { %9304 = vst [vmem:[#allocation50_spill] sm:$0xff] %v6915_v3  ;;  %v3343_v39 = vsel %vm1891_vm8, %v3335_v37, %v6159_v59  ;;  %v3415_v55 = vsel %vm1891_vm8, %v3407_v40, %v6219_v12  ;;  %v6938_v3 = vpop.permute.xlu0 %2695  ;;  %v3055_v53 = vsel %vm1900_vm9, %v3047_v57, %v6196_v41  ;;  %v3208_v35 = vsel %vm1178_vm4, %v6228_v2, %v6174_v47  ;;  %v6962_v16 = vpop.permute.xlu2 %2715 }
 0x441   : > { %9309 = vst [vmem:[#allocation43_spill] sm:$0xff] %v6938_v3  ;;  %v3024_v1 = vsel %vm1864_vm6, %v3016_v6, %v9307_v4  ;;  %v3400_v37 = vsel %vm1873_vm5, %v3392_v10, %v6174_v47  ;;  %v2096_v40 = vadd.f32 %v9303_v32, %v2064_v51  ;;  %v3546_v26 = vsel %vm1864_vm6, %v3538_v48, %v9303_v32  ;;  %v6960_v6 = vpop.permute.xlu1 %2651 }
 0x442   : > { %2839 = vperm.xlu2 %4515, %v5291_v28   ;;  %v6955_v57 = vsel %vm1909_vm10, %v3127_v24, %v6196_v41  ;;  %v3032_v42 = vsel %vm1873_vm5, %v3024_v1, %v9306_v29  ;;  %2811 = vperm.xlu1 %4517, %v5414_v33   ;;  %9311 = vst [vmem:[#allocation42_spill] sm:$0xff] %v6960_v6 }
 0x443   : > { %9310 = vst [vmem:[#allocation40_spill] sm:$0xff] %v6955_v57  ;;  %v3328_v51 = vsel %vm1873_vm5, %v3320_v63, %v6022_v36  ;;  %v3104_v28 = vsel %vm1873_vm5, %v3096_v50, %v9307_v4  ;;  %v3351_v10 = vsel %vm1900_vm9, %v3343_v39, %v6207_v9  ;;  %v3423_v48 = vsel %vm1900_vm9, %v3415_v55, %v6159_v59 }
 0x444   : > { %v2128_v24 = vadd.f32 %v9306_v29, %v2096_v40  ;;  %v3216_v33 = vsel %vm1864_vm6, %v3208_v35, %v6022_v36  ;;  %v3408_v1 = vsel %vm1882_vm7, %v3400_v37, %v6022_v36  ;;  %v3609_v63 = vsel %vm1178_vm4, %v6219_v12, %v6159_v59 }
 0x445   : > { %v3554_v50 = vsel %vm1873_vm5, %v3546_v26, %v9302_v7  ;;  %v6984_v39 = vsel %vm1909_vm10, %v3247_v11, %v6142_v21  ;;  %v3040_v55 = vsel %vm1882_vm7, %v3032_v42, %v9303_v32  ;;  %v3112_v35 = vsel %vm1882_vm7, %v3104_v28, %v9306_v29 }
 0x446   : > { %9312 = vst [vmem:[#allocation38_spill] sm:$0xff] %v6984_v39  ;;  %v3336_v37 = vsel %vm1882_vm7, %v3328_v51, %v6200_v61  ;;  %v6994_v40 = vsel %vm1909_vm10, %v3055_v53, %v6198_v31  ;;  %v6998_v26 = vsel %vm1909_vm10, %v3351_v10, %v6209_v0  ;;  %v3501_v11 = vsel %vm1900_vm9, %v3493_v15, %v6219_v12 }
 0x447   : > { %9313 = vst [vmem:[#allocation41_spill] sm:$0xff] %v6994_v40  ;;  %v3224_v42 = vsel %vm1873_vm5, %v3216_v33, %v6200_v61  ;;  %v7006_v28 = vsel %vm1909_vm10, %v3423_v48, %v6207_v9  ;;  %v3416_v51 = vsel %vm1891_vm8, %v3408_v1, %v6200_v61  ;;  %v3617_v53 = vsel %vm1864_vm6, %v3609_v63, %v6207_v9  ;;  %v9316_v33 = vld [vmem:[#allocation74_spill] sm:$0xff]  ;;  %v9317_v48 = vld [vmem:[#allocation63_spill] sm:$0xff] }
 0x448   : > { %9314 = vst [vmem:[#allocation47_spill] sm:$0xff] %v6998_v26  ;;  %v2160_v39 = vadd.f32 %v9307_v4, %v2128_v24  ;;  %v3562_v10 = vsel %vm1882_vm7, %v3554_v50, %v6228_v2  ;;  %v3048_v12 = vsel %vm1891_vm8, %v3040_v55, %v9302_v7  ;;  %v3120_v15 = vsel %vm1891_vm8, %v3112_v35, %v9303_v32  ;;  %v7023_v1 = vpop.permute.xlu0 %2707  ;;  %v7047_v6 = vpop.permute.xlu2 %2727 }
 0x449   : > { %9315 = vst [vmem:[#allocation49_spill] sm:$0xff] %v7006_v28  ;;  %v2001_v28 = vadd.f32 %v9317_v48, %v9316_v33  ;;  %3702 = vrot.lane.b32.xlu0 %v6698_v30, %s9117_s17  ;;  %v3344_v9 = vsel %vm1891_vm8, %v3336_v37, %v9307_v4  ;;  %v3462_v24 = vsel %vm1178_vm4, %v9306_v29, %v9303_v32  ;;  %v7045_v26 = vpop.permute.xlu1 %2663 }
 0x44a   : > { %9318 = vst [vmem:[#allocation45_spill] sm:$0xff] %v7023_v1  ;;  %v3610_v63 = vsel %vm1178_vm4, %v6200_v61, %v9307_v4  ;;  %2851 = vperm.xlu2 %4515, %v5355_v56   ;;  %v3352_v50 = vsel %vm1900_vm9, %v3344_v9, %v9306_v29  ;;  %v3232_v55 = vsel %vm1882_vm7, %v3224_v42, %v9307_v4  ;;  %v9345_v1 = vld [vmem:[#allocation87_spill] sm:$0xff] }
 0x44b   : > { %v7040_v35 = vsel %vm1909_vm10, %v3501_v11, %v6159_v59  ;;  %v3625_v37 = vsel %vm1873_vm5, %v3617_v53, %v6209_v0  ;;  %2823 = vperm.xlu1 %4517, %v5502_v58   ;;  %9320 = vst [vmem:[#allocation53_spill] sm:$0xff] %v7045_v26  ;;  %v3570_v56 = vsel %vm1891_vm8, %v3562_v10, %v6174_v47  ;;  %v9322_v10 = vld [vmem:[#allocation69_spill] sm:$0xff] }
 0x44c   : > { %9319 = vst [vmem:[#allocation52_spill] sm:$0xff] %v7040_v35  ;;  %v3056_v9 = vsel %vm1900_vm9, %v3048_v12, %v6228_v2  ;;  %v3128_v42 = vsel %vm1900_vm9, %v3120_v15, %v9302_v7  ;;  %v3424_v59 = vsel %vm1900_vm9, %v3416_v51, %v9307_v4  ;;  %v2192_v0 = vadd.f32 %v6200_v61, %v2160_v39 }
 0x44d   : > { %9321 = vst [vmem:[#allocation54_spill] sm:$0xff] %v7047_v6  ;;  %v3240_v58 = vsel %vm1891_vm8, %v3232_v55, %v9306_v29  ;;  %v3089_v11 = vsel %vm1178_vm4, %v9316_v33, %v9317_v48  ;;  %v3470_v53 = vsel %vm1864_vm6, %v3462_v24, %v9302_v7  ;;  %v2033_v12 = vadd.f32 %v9322_v10, %v2001_v28  ;;  %v9324_v55 = vld [vmem:[#allocation80_spill] sm:$0xff] }
 0x44e   : > { %v7068_v15 = vsel %vm1909_vm10, %v3352_v50, %v9303_v32  ;;  %v3209_v39 = vsel %vm1178_vm4, %v9322_v10, %v9316_v33  ;;  %v7075_v51 = vsel %vm1882_vm7, %v3625_v37, %v6142_v21  ;;  %v3017_v35 = vsel %vm1178_vm4, %v9317_v48, %v9324_v55 }
 0x44f   : > { %9323 = vst [vmem:[#allocation55_spill] sm:$0xff] %v7068_v15  ;;  %v3578_v24 = vsel %vm1900_vm9, %v3570_v56, %v6022_v36  ;;  %v7084_v28 = vsel %vm1909_vm10, %v3056_v9, %v6174_v47  ;;  %v7088_v50 = vsel %vm1909_vm10, %v3128_v42, %v6228_v2  ;;  %v9327_v15 = vld [vmem:[#allocation78_spill] sm:$0xff]  ;;  %v3248_v37 = vsel %vm1900_vm9, %v3240_v58, %v9303_v32  ;;  %v9329_v42 = vld [vmem:[#allocation77_spill] sm:$0xff] }
 0x450   : > { %9325 = vst [vmem:[#allocation51_spill] sm:$0xff] %v7084_v28  ;;  %v2065_v26 = vadd.f32 %v9327_v15, %v2033_v12  ;;  %v3313_v21 = vsel %vm1178_vm4, %v9327_v15, %v9322_v10  ;;  %v3478_v56 = vsel %vm1873_vm5, %v3470_v53, %v6228_v2  ;;  %v2200_v34 = vadd.f32 %v6677_v20, %v2192_v0  ;;  %v9331_v58 = vld [vmem:[#allocation81_spill] sm:$0xff]  ;;  %v7123_v57 = vpop.permute.xlu0 %2719  ;;  %v7139_v18 = vpop.permute.xlu2 %2735 }
 0x451   : > { %9326 = vst [vmem:[#allocation57_spill] sm:$0xff] %v7088_v50  ;;  %v7101_v9 = vsel %vm1909_vm10, %v3424_v59, %v9306_v29  ;;  %v3385_v12 = vsel %vm1178_vm4, %v9329_v42, %v9327_v15  ;;  %v9330_v50 = vld [vmem:[#allocation71_spill] sm:$0xff]  ;;  %3708 = vrot.lane.b32.xlu0 %v6759_v27, %s9117_s17  ;;  %v3025_v53 = vsel %vm1864_vm6, %v3017_v35, %v9331_v58 }
 0x452   : > { %9328 = vst [vmem:[#allocation56_spill] sm:$0xff] %v7101_v9  ;;  %v3463_v28 = vsel %vm1178_vm4, %v9330_v50, %v9329_v42  ;;  %v7115_v0 = vsel %vm1909_vm10, %v3578_v24, %v6200_v61  ;;  %v3097_v59 = vsel %vm1864_vm6, %v3089_v11, %v9324_v55  ;;  %v3539_v9 = vsel %vm1178_vm4, %v9331_v58, %v9330_v50 }
 0x453   : > { %9332 = vst [vmem:[#allocation48_spill] sm:$0xff] %v7115_v0  ;;  %2863 = vperm.xlu2 %4515, %v5438_v45   ;;  %v3321_v40 = vsel %vm1864_vm6, %v3313_v21, %v9316_v33  ;;  %v7129_v35 = vsel %vm1909_vm10, %v3248_v37, %v9302_v7  ;;  %v3217_v24 = vsel %vm1864_vm6, %v3209_v39, %v9317_v48  ;;  %v7137_v45 = vpop.permute.xlu1 %2675  ;;  %4558 = vrcp.f32 %v2200_v34 }
 0x454   : > { %9333 = vst [vmem:[#allocation59_spill] sm:$0xff] %v7129_v35  ;;  %v3486_v11 = vsel %vm1882_vm7, %v3478_v56, %v6174_v47  ;;  %v2097_v0 = vadd.f32 %v9329_v42, %v2065_v26  ;;  %2835 = vperm.xlu1 %4517, %v5271_v60   ;;  %v3393_v21 = vsel %vm1864_vm6, %v3385_v12, %v9322_v10  ;;  %v9336_v12 = vld [vmem:[#allocation79_spill] sm:$0xff]  ;;  %v9337_v35 = vld [vmem:[#allocation65_spill] sm:$0xff] }
 0x455   : > { %9334 = vst [vmem:[#allocation61_spill] sm:$0xff] %v7137_v45  ;;  %v3471_v37 = vsel %vm1864_vm6, %v3463_v28, %v9327_v15  ;;  %v3618_v39 = vsel %vm1864_vm6, %v3610_v63, %v9306_v29  ;;  %v3033_v56 = vsel %vm1873_vm5, %v3025_v53, %v9330_v50  ;;  %v3105_v26 = vsel %vm1873_vm5, %v3097_v59, %v9331_v58 }
 0x456   : > { %9335 = vst [vmem:[#allocation58_spill] sm:$0xff] %v7139_v18  ;;  %v3547_v60 = vsel %vm1864_vm6, %v3539_v9, %v9329_v42  ;;  %v3225_v45 = vsel %vm1873_vm5, %v3217_v24, %v9324_v55  ;;  %v7157_v18 = vadd.f32 %v9337_v35, %v9336_v12  ;;  %v3329_v29 = vsel %vm1873_vm5, %v3321_v40, %v9317_v48 }
 0x457   : > { %v3494_v63 = vsel %vm1891_vm8, %v3486_v11, %v6022_v36  ;;  %v3337_v28 = vsel %vm1882_vm7, %v3329_v29, %v9324_v55  ;;  %v3401_v9 = vsel %vm1873_vm5, %v3393_v21, %v9316_v33  ;;  %v3479_v53 = vsel %vm1873_vm5, %v3471_v37, %v9322_v10 }
 0x458   : > { %v3626_v34 = vsel %vm1873_vm5, %v3618_v39, %v9303_v32  ;;  %v3041_v59 = vsel %vm1882_vm7, %v3033_v56, %v9329_v42  ;;  %v3113_v40 = vsel %vm1882_vm7, %v3105_v26, %v9330_v50  ;;  %v3555_v24 = vsel %vm1873_vm5, %v3547_v60, %v9327_v15 }
 0x459   : > { %v3233_v11 = vsel %vm1882_vm7, %v3225_v45, %v9331_v58  ;;  %v2129_v21 = vadd.f32 %v9330_v50, %v2097_v0  ;;  %v7183_v37 = vsel %vm1178_vm4, %v9336_v12, %v9337_v35  ;;  %v3502_v32 = vsel %vm1900_vm9, %v3494_v63, %v6200_v61  ;;  %3722 = vrot.lane.b32.xlu0 %v6677_v20, %s9110_s23  ;;  %v7202_v61 = vpop.permute.xlu0 %2739 }
 0x45a   : > { %v3611_v39 = vsel %vm1178_vm4, %v9324_v55, %v9331_v58  ;;  %v3345_v45 = vsel %vm1891_vm8, %v3337_v28, %v9331_v58  ;;  %v3409_v0 = vsel %vm1882_vm7, %v3401_v9, %v9317_v48  ;;  %v3487_v56 = vsel %vm1882_vm7, %v3479_v53, %v9316_v33  ;;  %v7212_v9 = vpop.eup %4558 }
 0x45b   : > { %v3634_v26 = vsel %vm1882_vm7, %v3626_v34, %v9302_v7  ;;  %3694 = vrot.lane.b32.xlu2 %v6670_v14, %s9117_s17  ;;  %v3049_v60 = vsel %vm1891_vm8, %v3041_v59, %v9327_v15  ;;  %v3121_v29 = vsel %vm1891_vm8, %v3113_v40, %v9329_v42  ;;  %v3563_v63 = vsel %vm1882_vm7, %v3555_v24, %v9322_v10  ;;  %v7216_v53 = vpop.permute.xlu1 %2687  ;;  %v7218_v34 = vpop.permute.xlu2 %2747  ;;  %v9340_v59 = vld [vmem:[#allocation86_spill] sm:$0xff] }
 0x45c   : > { %v3241_v28 = vsel %vm1891_vm8, %v3233_v11, %v9330_v50  ;;  %9338 = vst [vmem:[#allocation60_spill] sm:$0xff] %v7212_v9  ;;  %v2161_v7 = vadd.f32 %v9331_v58, %v2129_v21  ;;  %2847 = vperm.xlu1 %4517, %v5313_v44   ;;  %v3540_v40 = vsel %vm1178_vm4, %v9341_v8, %v9340_v59 }
 0x45d   : > { %9339 = vst [vmem:[#allocation70_spill] sm:$0xff] %v7216_v53  ;;  %v3417_v24 = vsel %vm1891_vm8, %v3409_v0, %v9324_v55  ;;  %v3619_v11 = vsel %vm1864_vm6, %v3611_v39, %v9330_v50  ;;  %v3353_v9 = vsel %vm1900_vm9, %v3345_v45, %v9330_v50  ;;  %v7231_v44 = vsel %vm1909_vm10, %v3502_v32, %v9307_v4  ;;  %v9343_v4 = vld [vmem:[#allocation84_spill] sm:$0xff] }
 0x45e   : > { %9342 = vst [vmem:[#allocation68_spill] sm:$0xff] %v7231_v44  ;;  %v3495_v21 = vsel %vm1891_vm8, %v3487_v56, %v9317_v48  ;;  %v3642_v53 = vsel %vm1891_vm8, %v3634_v26, %v6228_v2  ;;  %v3057_v6 = vsel %vm1900_vm9, %v3049_v60, %v9322_v10  ;;  %v3129_v0 = vsel %vm1900_vm9, %v3121_v29, %v9327_v15  ;;  %v9344_v32 = vld [vmem:[#allocation64_spill] sm:$0xff] }
 0x45f   : > { %v3571_v39 = vsel %vm1891_vm8, %v3563_v63, %v9316_v33  ;;  %v3249_v45 = vsel %vm1900_vm9, %v3241_v28, %v9329_v42  ;;  %v2002_v44 = vadd.f32 %v9344_v32, %v9343_v4  ;;  %v3548_v56 = vsel %vm1864_vm6, %v3540_v40, %v9345_v1  ;;  %v9348_v63 = vld [vmem:[#allocation83_spill] sm:$0xff]  ;;  %v9349_v28 = vld [vmem:[#allocation73_spill] sm:$0xff] }
 0x460   : > { %v3425_v2 = vsel %vm1900_vm9, %v3417_v24, %v9331_v58  ;;  %v3627_v26 = vsel %vm1873_vm5, %v3619_v11, %v9329_v42  ;;  %v7254_v60 = vadd.f32 %v9324_v55, %v2161_v7  ;;  %v7258_v29 = vsel %vm1909_vm10, %v3353_v9, %v9329_v42  ;;  %v9351_v11 = vld [vmem:[#allocation90_spill] sm:$0xff] }
 0x461   : > { %9347 = vst [vmem:[#allocation72_spill] sm:$0xff] %v7258_v29  ;;  %v3314_v3 = vsel %vm1178_vm4, %v9349_v28, %v9348_v63  ;;  %v3641_v40 = vsel %vm1891_vm8, %v7075_v51, %v6196_v41  ;;  %v7268_v24 = vsel %vm1909_vm10, %v3057_v6, %v9316_v33  ;;  %v3018_v7 = vsel %vm1178_vm4, %v9344_v32, %v9351_v11 }
 0x462   : > { %9346 = vst [vmem:[#allocation75_spill] sm:$0xff] %v7254_v60  ;;  %v7275_v42 = vsel %vm1909_vm10, %v3129_v0, %v9322_v10  ;;  %v3579_v9 = vsel %vm1900_vm9, %v3571_v39, %v9317_v48  ;;  %3728 = vrot.lane.b32.xlu0 %v6737_v46, %s9110_s23  ;;  %v3556_v41 = vsel %vm1873_vm5, %v3548_v56, %v9349_v28  ;;  %v7296_v39 = vpop.permute.xlu0 %2751 }
 0x463   : > { %9350 = vst [vmem:[#allocation74_spill] sm:$0xff] %v7268_v24  ;;  %v7285_v6 = vsel %vm1909_vm10, %v3249_v45, %v9327_v15  ;;  %v7289_v51 = vsel %vm1909_vm10, %v3425_v2, %v9330_v50  ;;  %v3635_v0 = vsel %vm1882_vm7, %v3627_v26, %v9327_v15  ;;  %v2034_v60 = vadd.f32 %v9348_v63, %v2002_v44  ;;  %v7307_v15 = vpop.permute.xlu1 %2699  ;;  %v7309_v44 = vpop.permute.xlu2 %2759  ;;  %v9377_v24 = vld [vmem:[#allocation66_spill] sm:$0xff] }
 0x464   : > { %9352 = vst [vmem:[#allocation63_spill] sm:$0xff] %v7275_v42  ;;  %3700 = vrot.lane.b32.xlu2 %v6727_v38, %s9117_s17  ;;  %v3090_v56 = vsel %vm1178_vm4, %v9343_v4, %v9344_v32  ;;  %v3322_v45 = vsel %vm1864_vm6, %v3314_v3, %v9343_v4  ;;  %v3210_v50 = vsel %vm1178_vm4, %v9348_v63, %v9343_v4 }
 0x465   : > { %9353 = vst [vmem:[#allocation69_spill] sm:$0xff] %v7285_v6  ;;  %2859 = vperm.xlu1 %4517, %v5379_v25   ;;  %v3026_v2 = vsel %vm1864_vm6, %v3018_v7, %v9341_v8  ;;  %v3098_v26 = vsel %vm1864_vm6, %v3090_v56, %v9351_v11  ;;  %v3503_v3 = vsel %vm1900_vm9, %v3495_v21, %v9324_v55  ;;  %v9358_v6 = vld [vmem:[#allocation85_spill] sm:$0xff] }
 0x466   : > { %9354 = vst [vmem:[#allocation80_spill] sm:$0xff] %v7289_v51  ;;  %v7317_v51 = vsel %vm1909_vm10, %v3579_v9, %v9324_v55  ;;  %v3564_v25 = vsel %vm1882_vm7, %v3556_v41, %v9348_v63  ;;  %v7329_v7 = vsel %vm1864_vm6, %v7183_v37, %v9358_v6  ;;  %v3643_v56 = vsel %vm1891_vm8, %v3635_v0, %v9322_v10 }
 0x467   : > { %9355 = vst [vmem:[#allocation78_spill] sm:$0xff] %v7307_v15  ;;  %v3019_v15 = vsel %vm1178_vm4, %v9337_v35, %v9358_v6  ;;  %v3330_v9 = vsel %vm1873_vm5, %v3322_v45, %v9344_v32  ;;  %v3218_v55 = vsel %vm1864_vm6, %v3210_v50, %v9344_v32  ;;  %v3650_v21 = vsel %vm1900_vm9, %v3642_v53, %v6174_v47  ;;  %v9360_v45 = vld [vmem:[#allocation93_spill] sm:$0xff] }
 0x468   : > { %9356 = vst [vmem:[#allocation77_spill] sm:$0xff] %v7309_v44  ;;  %v3649_v41 = vsel %vm1900_vm9, %v3641_v40, %v6198_v31  ;;  %v3106_v37 = vsel %vm1873_vm5, %v3098_v26, %v9341_v8  ;;  %v3034_v10 = vsel %vm1873_vm5, %v3026_v2, %v9340_v59  ;;  %v7348_v0 = vsel %vm1909_vm10, %v3503_v3, %v9331_v58 }
 0x469   : > { %9357 = vst [vmem:[#allocation71_spill] sm:$0xff] %v7317_v51  ;;  %v2066_v51 = vadd.f32 %v9349_v28, %v2034_v60  ;;  %v2035_v50 = vadd.f32 %v9360_v45, %v7157_v18  ;;  %v3572_v47 = vsel %vm1891_vm8, %v3564_v25, %v9343_v4  ;;  %v3386_v31 = vsel %vm1178_vm4, %v9345_v1, %v9349_v28 }
 0x46a   : > { %9359 = vst [vmem:[#allocation81_spill] sm:$0xff] %v7348_v0  ;;  %v3651_v53 = vsel %vm1900_vm9, %v3643_v56, %v9316_v33  ;;  %v3338_v60 = vsel %vm1882_vm7, %v3330_v9, %v9351_v11  ;;  %v3226_v58 = vsel %vm1873_vm5, %v3218_v55, %v9351_v11  ;;  %v7365_v40 = vsel %vm1909_vm10, %v3650_v21, %v6022_v36 }
 0x46b   : > { %9361 = vst [vmem:[#allocation65_spill] sm:$0xff] %v7365_v40  ;;  %v7369_v18 = vsel %vm1909_vm10, %v3649_v41, %v6004_v43  ;;  %v7372_v2 = vadd.f32 %v9345_v1, %v2066_v51  ;;  %3742 = vrot.lane.b32.xlu0 %v6670_v14, %s9119_s0  ;;  %v3042_v33 = vsel %vm1882_vm7, %v3034_v10, %v9345_v1  ;;  %v7385_v43 = vpop.permute.xlu0 %2763  ;;  %v9364_v51 = vld [vmem:[#allocation89_spill] sm:$0xff]  ;;  %v7400_v21 = vpop.permute.xlu1 %2711  ;;  %v9369_v10 = vld [vmem:[#allocation92_spill] sm:$0xff] }
 0x46c   : > { %9362 = vst [vmem:[#allocation64_spill] sm:$0xff] %v7369_v18  ;;  %v3114_v26 = vsel %vm1882_vm7, %v3106_v37, %v9340_v59  ;;  %v3464_v36 = vsel %vm1178_vm4, %v9340_v59, %v9345_v1  ;;  %3706 = vrot.lane.b32.xlu2 %v6845_v23, %s9117_s17  ;;  %v3315_v3 = vsel %vm1178_vm4, %v9364_v51, %v9360_v45  ;;  %v7402_v41 = vpop.permute.xlu2 %2771  ;;  %v9368_v37 = vld [vmem:[#allocation96_spill] sm:$0xff] }
 0x46d   : > { %9363 = vst [vmem:[#allocation87_spill] sm:$0xff] %v7372_v2  ;;  %v3580_v25 = vsel %vm1900_vm9, %v3572_v47, %v9344_v32  ;;  %v3394_v56 = vsel %vm1864_vm6, %v3386_v31, %v9348_v63  ;;  %v7396_v9 = vsel %vm1909_vm10, %v3651_v53, %v9317_v48  ;;  %v2067_v55 = vadd.f32 %v9364_v51, %v2035_v50  ;;  %v9370_v50 = vld [vmem:[#allocation82_spill] sm:$0xff] }
 0x46e   : > { %9365 = vst [vmem:[#allocation73_spill] sm:$0xff] %v7396_v9  ;;  %2871 = vperm.xlu1 %4517, %v5465_v19   ;;  %v3541_v2 = vsel %vm1178_vm4, %v9369_v10, %v9368_v37  ;;  %v3346_v47 = vsel %vm1891_vm8, %v3338_v60, %v9341_v8  ;;  %v3234_v31 = vsel %vm1882_vm7, %v3226_v58, %v9341_v8 }
 0x46f   : > { %9366 = vst [vmem:[#allocation85_spill] sm:$0xff] %v7400_v21  ;;  %v3050_v48 = vsel %vm1891_vm8, %v3042_v33, %v9349_v28  ;;  %v3122_v19 = vsel %vm1891_vm8, %v3114_v26, %v9345_v1  ;;  %v3387_v53 = vsel %vm1178_vm4, %v9370_v50, %v9364_v51  ;;  %v3472_v21 = vsel %vm1864_vm6, %v3464_v36, %v9349_v28 }
 0x470   : > { %9367 = vst [vmem:[#allocation93_spill] sm:$0xff] %v7402_v41  ;;  %v3323_v9 = vsel %vm1864_vm6, %v3315_v3, %v9336_v12  ;;  %v7424_v60 = vsel %vm1909_vm10, %v3580_v25, %v9351_v11  ;;  %v3211_v58 = vsel %vm1178_vm4, %v9360_v45, %v9336_v12  ;;  %v3395_v33 = vsel %vm1864_vm6, %v3387_v53, %v9360_v45 }
 0x471   : > { %9371 = vst [vmem:[#allocation89_spill] sm:$0xff] %v7424_v60  ;;  %v3549_v26 = vsel %vm1864_vm6, %v3541_v2, %v9370_v50  ;;  %v3354_v36 = vsel %vm1900_vm9, %v3346_v47, %v9340_v59  ;;  %v3242_v3 = vsel %vm1891_vm8, %v3234_v31, %v9340_v59  ;;  %v3402_v25 = vsel %vm1873_vm5, %v3394_v56, %v9343_v4 }
 0x472   : > { %v2099_v60 = vadd.f32 %v9370_v50, %v2067_v55  ;;  %v3058_v0 = vsel %vm1900_vm9, %v3050_v48, %v9348_v63  ;;  %v3130_v53 = vsel %vm1900_vm9, %v3122_v19, %v9349_v28  ;;  %v3027_v2 = vsel %vm1864_vm6, %v3019_v15, %v9369_v10 }
 0x473   : > { %v3331_v47 = vsel %vm1873_vm5, %v3323_v9, %v9337_v35  ;;  %v3219_v31 = vsel %vm1864_vm6, %v3211_v58, %v9337_v35  ;;  %v3035_v56 = vsel %vm1873_vm5, %v3027_v2, %v9368_v37  ;;  %v3403_v55 = vsel %vm1873_vm5, %v3395_v33, %v9336_v12  ;;  %3748 = vrot.lane.b32.xlu0 %v6727_v38, %s9119_s0  ;;  %v7465_v58 = vpop.permute.xlu0 %2775  ;;  %v7492_v18 = vpop.permute.xlu1 %2723 }
 0x474   : > { %v2131_v48 = vadd.f32 %v9368_v37, %v2099_v60  ;;  %v3557_v15 = vsel %vm1873_vm5, %v3549_v26, %v9364_v51  ;;  %v3250_v9 = vsel %vm1900_vm9, %v3242_v3, %v9345_v1  ;;  %v3410_v19 = vsel %vm1882_vm7, %v3402_v25, %v9344_v32  ;;  %3720 = vrot.lane.b32.xlu2 %v6655_v22, %s9110_s23  ;;  %v7482_v25 = vpop.permute.xlu2 %2783 }
 0x475   : > { %9372 = vst [vmem:[#allocation96_spill] sm:$0xff] %v7465_v58  ;;  %v7469_v60 = vsel %vm1909_vm10, %v3130_v53, %v9348_v63  ;;  %v3107_v33 = vsel %vm1873_vm5, %v7329_v7, %v9369_v10  ;;  %v7476_v26 = vsel %vm1909_vm10, %v3354_v36, %v9345_v1  ;;  %v3418_v3 = vsel %vm1891_vm8, %v3410_v19, %v9351_v11 }
 0x476   : > { %9373 = vst [vmem:[#allocation92_spill] sm:$0xff] %v7476_v26  ;;  %3698 = vrot.lane.b32.xlu1 %v6677_v20, %s9117_s17  ;;  %v3339_v53 = vsel %vm1882_vm7, %v3331_v47, %v9358_v6  ;;  %v3227_v2 = vsel %vm1873_vm5, %v3219_v31, %v9358_v6  ;;  %v3043_v7 = vsel %vm1882_vm7, %v3035_v56, %v9370_v50 }
 0x477   : > { %9374 = vst [vmem:[#allocation82_spill] sm:$0xff] %v7482_v25  ;;  %v3411_v36 = vsel %vm1882_vm7, %v3403_v55, %v9337_v35  ;;  %v7496_v19 = vsel %vm1909_vm10, %v3058_v0, %v9343_v4  ;;  %v3565_v40 = vsel %vm1882_vm7, %v3557_v15, %v9360_v45  ;;  %v3115_v47 = vsel %vm1882_vm7, %v3107_v33, %v9368_v37 }
 0x478   : > { %9375 = vst [vmem:[#allocation148_spill] sm:$0xff] %v7492_v18  ;;  %v7504_v31 = vsel %vm1909_vm10, %v3250_v9, %v9349_v28  ;;  %v2163_v56 = vadd.f32 %v9369_v10, %v2131_v48  ;;  %v3465_v55 = vsel %vm1178_vm4, %v9368_v37, %v9370_v50  ;;  %v7513_v0 = vsel %vm1178_vm4, %v9358_v6, %v9369_v10 }
 0x479   : > { %v3426_v15 = vsel %vm1900_vm9, %v3418_v3, %v9341_v8  ;;  %v3347_v33 = vsel %vm1891_vm8, %v3339_v53, %v9369_v10  ;;  %v3051_v9 = vsel %vm1891_vm8, %v3043_v7, %v9364_v51  ;;  %v3235_v48 = vsel %vm1882_vm7, %v3227_v2, %v9369_v10  ;;  %v9376_v7 = vld [vmem:[#allocation95_spill] sm:$0xff] }
 0x47a   : > { %v3419_v26 = vsel %vm1891_vm8, %v3411_v36, %v9358_v6  ;;  %v3573_v29 = vsel %vm1891_vm8, %v3565_v40, %v9336_v12  ;;  %v3123_v42 = vsel %vm1891_vm8, %v3115_v47, %v9370_v50  ;;  %v3480_v3 = vsel %vm1873_vm5, %v3472_v21, %v9348_v63  ;;  %v9389_v63 = vld [vmem:[#allocation10_spill] sm:$0xff] }
 0x47b   : > { %v3612_v53 = vsel %vm1178_vm4, %v9351_v11, %v9341_v8  ;;  %v2004_v18 = vadd.f32 %v9377_v24, %v9376_v7  ;;  %v3243_v2 = vsel %vm1891_vm8, %v3235_v48, %v9368_v37  ;;  %v3473_v36 = vsel %vm1864_vm6, %v3465_v55, %v9364_v51  ;;  %3754 = vrot.lane.b32.xlu0 %v6845_v23, %s9119_s0  ;;  %v7555_v55 = vpop.permute.xlu0 %2787 }
 0x47c   : > { %v7542_v40 = vsel %vm1909_vm10, %v3426_v15, %v9340_v59  ;;  %v2195_v47 = vadd.f32 %v9358_v6, %v2163_v56  ;;  %v3355_v21 = vsel %vm1900_vm9, %v3347_v33, %v9368_v37  ;;  %v3059_v25 = vsel %vm1900_vm9, %v3051_v9, %v9360_v45  ;;  %3726 = vrot.lane.b32.xlu2 %v6698_v30, %s9110_s23 }
 0x47d   : > { %9378 = vst [vmem:[#allocation149_spill] sm:$0xff] %v7542_v40  ;;  %v3427_v48 = vsel %vm1900_vm9, %v3419_v26, %v9369_v10  ;;  %v3581_v56 = vsel %vm1900_vm9, %v3573_v29, %v9337_v35  ;;  %v3131_v15 = vsel %vm1900_vm9, %v3123_v42, %v9364_v51  ;;  %v7563_v33 = vsel %vm1882_vm7, %v3480_v3, %v9343_v4  ;;  %v9380_v42 = vld [vmem:[#allocation88_spill] sm:$0xff] }
 0x47e   : > { %9379 = vst [vmem:[#allocation150_spill] sm:$0xff] %v7555_v55  ;;  %v7567_v9 = vsel %vm1864_vm6, %v3612_v53, %v9340_v59  ;;  %3704 = vrot.lane.b32.xlu1 %v6737_v46, %s9117_s17  ;;  %v3251_v26 = vsel %vm1900_vm9, %v3243_v2, %v9370_v50  ;;  %v3092_v29 = vsel %vm1178_vm4, %v9376_v7, %v9377_v24  ;;  %v7582_v59 = vpop.permute.xlu1 %2731  ;;  %v2796_v55 = vpop.permute.xlu2 %2795  ;;  %v9383_v2 = vld [vmem:[#allocation99_spill] sm:$0xff] }
 0x47f   : > { %v3212_v40 = vsel %vm1178_vm4, %v9380_v42, %v9376_v7  ;;  %v3481_v3 = vsel %vm1873_vm5, %v3473_v36, %v9360_v45  ;;  %v2036_v53 = vadd.f32 %v9380_v42, %v2004_v18  ;;  %9381 = vst [vmem:[#allocation151_spill] sm:$0xff] %v7582_v59  ;;  %v7586_v41 = vsel %vm1909_vm10, %v3355_v21, %v9370_v50  ;;  %v9388_v59 = vld [vmem:[#allocation100_spill] sm:$0xff] }
 0x480   : > { %9382 = vst [vmem:[#allocation152_spill] sm:$0xff] %v7586_v41  ;;  %v3316_v58 = vsel %vm1178_vm4, %v9383_v2, %v9380_v42  ;;  %v7593_v4 = vsel %vm1909_vm10, %v3059_v25, %v9336_v12  ;;  %v2203_v8 = vadd.f32 %v6737_v46, %v2195_v47  ;;  %v7598_v18 = vsel %vm1909_vm10, %v3581_v56, %v9358_v6 }
 0x481   : > { %9384 = vst [vmem:[#allocation99_spill] sm:$0xff] %v7593_v4  ;;  %v7602_v36 = vsel %vm1909_vm10, %v3131_v15, %v9360_v45  ;;  %v7606_v21 = vsel %vm1909_vm10, %v3427_v48, %v9368_v37  ;;  %v2068_v41 = vadd.f32 %v9383_v2, %v2036_v53  ;;  %v2914_v25 = vsel %vm1873_vm5, %v9389_v63, %v9388_v59  ;;  %v9394_v63 = vld [vmem:[#allocation114_spill] sm:$0xff] }
 0x482   : > { %9385 = vst [vmem:[#allocation153_spill] sm:$0xff] %v7598_v18  ;;  %v7614_v47 = vsel %vm1909_vm10, %v3251_v26, %v9364_v51  ;;  %v3489_v56 = vsel %vm1882_vm7, %v3481_v3, %v9336_v12  ;;  %v9391_v18 = vld [vmem:[#allocation121_spill] sm:$0xff]  ;;  %v3324_v48 = vsel %vm1864_vm6, %v3316_v58, %v9376_v7  ;;  %v7624_v53 = vsel %vm1864_vm6, %v3212_v40, %v9377_v24  ;;  %v9396_v4 = vld [vmem:[#allocation142_spill] sm:$0xff]  ;;  %v9398_v40 = vld [vmem:[#allocation132_spill] sm:$0xff] }
 0x483   : > { %9386 = vst [vmem:[#allocation154_spill] sm:$0xff] %v7602_v36  ;;  %v2934_v15 = vsel %vm1882_vm7, %v2914_v25, %v9391_v18  ;;  %v9393_v36 = vld [vmem:[#allocation91_spill] sm:$0xff]  ;;  %v9395_v26 = vld [vmem:[#allocation13_spill] sm:$0xff]  ;;  %3768 = vrot.lane.b32.xlu0 %v6655_v22, %s4655_s16  ;;  %4560 = vrcp.f32 %v2203_v8 }
 0x484   : > { %9387 = vst [vmem:[#allocation155_spill] sm:$0xff] %v7606_v21  ;;  %v9392_v21 = vld [vmem:[#allocation98_spill] sm:$0xff]  ;;  %v2954_v3 = vsel %vm1891_vm8, %v2934_v15, %v9396_v4  ;;  %v9397_v12 = vld [vmem:[#allocation101_spill] sm:$0xff]  ;;  %v3497_v15 = vsel %vm1891_vm8, %v3489_v56, %v9337_v35  ;;  %3732 = vrot.lane.b32.xlu2 %v6759_v27, %s9110_s23 }
 0x485   : > { %9390 = vst [vmem:[#allocation100_spill] sm:$0xff] %v7614_v47  ;;  %v3466_v59 = vsel %vm1178_vm4, %v9393_v36, %v9392_v21  ;;  %v2915_v47 = vsel %vm1873_vm5, %v9395_v26, %v9394_v63  ;;  %v3020_v18 = vsel %vm1178_vm4, %v9377_v24, %v9397_v12  ;;  %v3388_v58 = vsel %vm1178_vm4, %v9392_v21, %v9383_v2  ;;  %v9400_v56 = vld [vmem:[#allocation102_spill] sm:$0xff] }
 0x486   : > { %v2935_v25 = vsel %vm1882_vm7, %v2915_v47, %v9398_v40  ;;  %v2974_v44 = vsel %vm1900_vm9, %v2954_v3, %v6962_v16  ;;  %v3100_v4 = vsel %vm1864_vm6, %v3092_v29, %v9397_v12  ;;  %v7651_v63 = vadd.f32 %v9392_v21, %v2068_v41  ;;  %3718 = vrot.lane.b32.xlu1 %v6670_v14, %s9110_s23  ;;  %v2800_v29 = vpop.permute.xlu0 %2799  ;;  %v7671_v3 = vpop.permute.xlu2 %2807 }
 0x487   : > { %v2955_v26 = vsel %vm1891_vm8, %v2935_v25, %v6625_v49  ;;  %v2994_v47 = vsel %vm1909_vm10, %v2974_v44, %v2796_v55  ;;  %v3028_v8 = vsel %vm1864_vm6, %v3020_v18, %v9400_v56  ;;  %v3396_v41 = vsel %vm1864_vm6, %v3388_v58, %v9380_v42  ;;  %v7668_v44 = vpop.permute.xlu1 %2743 }
 0x488   : > { %9399 = vst [vmem:[#allocation10_spill] sm:$0xff] %v7651_v63  ;;  %v2975_v16 = vsel %vm1900_vm9, %v2955_v26, %v7123_v57  ;;  %v3474_v49 = vsel %vm1864_vm6, %v3466_v59, %v9383_v2  ;;  %v3332_v57 = vsel %vm1873_vm5, %v3324_v48, %v9377_v24  ;;  %v3108_v40 = vsel %vm1873_vm5, %v3100_v4, %v9400_v56 }
 0x489   : > { %9401 = vst [vmem:[#allocation121_spill] sm:$0xff] %v7668_v44  ;;  %v2995_v55 = vsel %vm1909_vm10, %v2975_v16, %v2800_v29  ;;  %v3505_v18 = vsel %vm1900_vm9, %v3497_v15, %v9358_v6  ;;  %v3158_v25 = vrot.slane %v2994_v47, 1  ;;  %v3262_v58 = vrot.slane %v2994_v47, 2 }
 0x48a   : > { %v3159_v26 = vrot.slane %v2995_v55, 1  ;;  %v3263_v63 = vrot.slane %v2995_v55, 2  ;;  %v3036_v59 = vsel %vm1873_vm5, %v3028_v8, %v9393_v36  ;;  %v3404_v16 = vsel %vm1873_vm5, %v3396_v41, %v9376_v7  ;;  %v7694_v55 = vpop.eup %4560  ;;  %v9403_v41 = vld [vmem:[#allocation116_spill] sm:$0xff] }
 0x48b   : > { %v3482_v29 = vsel %vm1873_vm5, %v3474_v49, %v9380_v42  ;;  %v3621_v48 = vsel %vm1864_vm6, %v7513_v0, %v9368_v37  ;;  %v3340_v15 = vsel %vm1882_vm7, %v3332_v57, %v9397_v12  ;;  %v3116_v8 = vsel %vm1882_vm7, %v3108_v40, %v9393_v36  ;;  %9402 = vst [vmem:[#allocation98_spill] sm:$0xff] %v7694_v55  ;;  %v9426_v55 = vld [vmem:[#allocation7_spill] sm:$0xff] }
 0x48c   : > { %v3160_v4 = vsel %vm600_vm2, %v3158_v25, %v3159_v26  ;;  %v3264_v6 = vsel %vm674_vm3, %v3262_v58, %v3263_v63  ;;  %v2920_v49 = vsel %vm1873_vm5, %v6591_v62, %v9403_v41  ;;  %v3070_v44 = vmul.f32 %v6763_v52, %v2994_v47  ;;  %v9404_v63 = vld [vmem:[#allocation135_spill] sm:$0xff]  ;;  %3774 = vrot.lane.b32.xlu0 %v6698_v30, %s4655_s16 }
 0x48d   : > { %v3190_v37 = vmul.f32 %v3160_v4, %v6751_v13  ;;  %v3542_v0 = vsel %vm1178_vm4, %v9400_v56, %v9393_v36  ;;  %v2940_v57 = vsel %vm1882_vm7, %v2920_v49, %v9404_v63  ;;  %v3044_v40 = vsel %vm1882_vm7, %v3036_v59, %v9392_v21  ;;  %v9405_v13 = vld [vmem:[#allocation27_spill] sm:$0xff]  ;;  %3746 = vrot.lane.b32.xlu2 %v6677_v20, %s9119_s0 }
 0x48e   : > { %v3490_v62 = vsel %vm1882_vm7, %v3482_v29, %v9376_v7  ;;  %v3629_v52 = vsel %vm1873_vm5, %v3621_v48, %v9370_v50  ;;  %v2960_v47 = vsel %vm1891_vm8, %v2940_v57, %v9405_v13  ;;  %v3294_v58 = vmul.f32 %v3264_v6, %v6755_v5  ;;  %3724 = vrot.lane.b32.xlu1 %v6727_v38, %s9110_s23  ;;  %v2820_v29 = vpop.permute.xlu0 %2819  ;;  %v9407_v57 = vld [vmem:[#allocation103_spill] sm:$0xff] }
 0x48f   : > { %v3198_v25 = vadd.f32 %v3190_v37, %v3070_v44  ;;  %v3348_v26 = vsel %vm1891_vm8, %v3340_v15, %v9400_v56  ;;  %v2980_v59 = vsel %vm1900_vm9, %v2960_v47, %v7202_v61  ;;  %v3124_v50 = vsel %vm1891_vm8, %v3116_v8, %v9392_v21  ;;  %v7732_v48 = vpop.permute.xlu1 %2755  ;;  %v7737_v61 = vpop.permute.xlu2 %2815 }
 0x490   : > { %v3550_v44 = vsel %vm1864_vm6, %v3542_v0, %v9392_v21  ;;  %v3628_v5 = vsel %vm1873_vm5, %v7567_v9, %v9345_v1  ;;  %v7735_v4 = vsel %vm1909_vm10, %v2980_v59, %v2820_v29  ;;  %v3052_v6 = vsel %vm1891_vm8, %v3044_v40, %v9383_v2  ;;  %v9408_v40 = vld [vmem:[#allocation11_spill] sm:$0xff]  ;;  %v9413_v59 = vld [vmem:[#allocation137_spill] sm:$0xff] }
 0x491   : > { %v7741_v15 = vadd.f32 %v3294_v58, %v3198_v25  ;;  %v3228_v8 = vsel %vm1873_vm5, %v7624_v53, %v9397_v12  ;;  %v3356_v41 = vsel %vm1900_vm9, %v3348_v26, %v9393_v36  ;;  %v7750_v1 = vsel %vm1909_vm10, %v3505_v18, %v9369_v10  ;;  %v9411_v58 = vld [vmem:[#allocation109_spill] sm:$0xff]  ;;  %v9412_v26 = vld [vmem:[#allocation146_spill] sm:$0xff] }
 0x492   : > { %9406 = vst [vmem:[#allocation114_spill] sm:$0xff] %v7750_v1  ;;  %v3412_v9 = vsel %vm1882_vm7, %v3404_v16, %v9377_v24  ;;  %v3496_v49 = vsel %vm1891_vm8, %v7563_v33, %v9344_v32  ;;  %v3132_v37 = vsel %vm1900_vm9, %v3124_v50, %v9383_v2  ;;  %v3558_v53 = vsel %vm1873_vm5, %v3550_v44, %v9383_v2  ;;  %v9462_v1 = vld [vmem:[#allocation128_spill] sm:$0xff] }
 0x493   : > { %v3498_v0 = vsel %vm1891_vm8, %v3490_v62, %v9377_v24  ;;  %v7765_v10 = vsel %vm1882_vm7, %v3629_v52, %v9364_v51  ;;  %v3060_v18 = vsel %vm1900_vm9, %v3052_v6, %v9380_v42  ;;  %v3236_v16 = vsel %vm1882_vm7, %v3228_v8, %v9400_v56  ;;  %v9409_v51 = vld [vmem:[#allocation119_spill] sm:$0xff]  ;;  %v9410_v52 = vld [vmem:[#allocation6_spill] sm:$0xff] }
 0x494   : > { %v7773_v33 = vsel %vm1900_vm9, %v3496_v49, %v9351_v11  ;;  %v7777_v63 = vsel %vm1882_vm7, %v3628_v5, %v9349_v28  ;;  %v7782_v62 = vsel %vm1873_vm5, %v9408_v40, %v9407_v57  ;;  %v2923_v13 = vsel %vm1873_vm5, %v9410_v52, %v9409_v51  ;;  %3780 = vrot.lane.b32.xlu0 %v6759_v27, %s4655_s16  ;;  %v9414_v5 = vld [vmem:[#allocation130_spill] sm:$0xff]  ;;  %v9415_v49 = vld [vmem:[#allocation31_spill] sm:$0xff]  ;;  %v9416_v57 = vld [vmem:[#allocation104_spill] sm:$0xff] }
 0x495   : > { %v7789_v47 = vsel %vm1909_vm10, %v3356_v41, %v9392_v21  ;;  %v3420_v25 = vsel %vm1891_vm8, %v3412_v9, %v9397_v12  ;;  %v2922_v28 = vsel %vm1873_vm5, %v9412_v26, %v9411_v58  ;;  %v2943_v29 = vsel %vm1882_vm7, %v2923_v13, %v9413_v59  ;;  %3752 = vrot.lane.b32.xlu2 %v6737_v46, %s9119_s0  ;;  %v9417_v40 = vld [vmem:[#allocation94_spill] sm:$0xff]  ;;  %v9419_v26 = vld [vmem:[#allocation67_spill] sm:$0xff] }
 0x496   : > { %v7802_v50 = vsel %vm1909_vm10, %v3132_v37, %v9380_v42  ;;  %v3566_v44 = vsel %vm1882_vm7, %v3558_v53, %v9380_v42  ;;  %v2942_v6 = vsel %vm1882_vm7, %v2922_v28, %v9414_v5  ;;  %v2963_v8 = vsel %vm1891_vm8, %v2943_v29, %v6775_v17  ;;  %3730 = vrot.lane.b32.xlu1 %v6845_v23, %s9110_s23  ;;  %v2832_v17 = vpop.permute.xlu0 %2831 }
 0x497   : > { %v7814_v41 = vsel %vm1909_vm10, %v3060_v18, %v9376_v7  ;;  %v3244_v9 = vsel %vm1891_vm8, %v3236_v16, %v9393_v36  ;;  %v2962_v37 = vsel %vm1891_vm8, %v2942_v6, %v9415_v49  ;;  %v2983_v53 = vsel %vm1900_vm9, %v2963_v8, %v7296_v39  ;;  %v7831_v52 = vpop.permute.xlu1 %2767  ;;  %v2828_v58 = vpop.permute.xlu2 %2827  ;;  %v9418_v39 = vld [vmem:[#allocation111_spill] sm:$0xff]  ;;  %v9421_v49 = vld [vmem:[#allocation105_spill] sm:$0xff] }
 0x498   : > { %v3317_v51 = vsel %vm1178_vm4, %v9417_v40, %v9416_v57  ;;  %v3428_v18 = vsel %vm1900_vm9, %v3420_v25, %v9400_v56  ;;  %v2982_v16 = vsel %vm1900_vm9, %v2962_v37, %v7218_v34  ;;  %v3003_v13 = vsel %vm1909_vm10, %v2983_v53, %v2832_v17  ;;  %v9422_v53 = vld [vmem:[#allocation106_spill] sm:$0xff]  ;;  %v9423_v17 = vld [vmem:[#allocation20_spill] sm:$0xff] }
 0x499   : > { %v3021_v28 = vsel %vm1178_vm4, %v9419_v26, %v9418_v39  ;;  %v7839_v59 = vsel %vm1891_vm8, %v3566_v44, %v9376_v7  ;;  %v3171_v29 = vrot.slane %v3003_v13, 1  ;;  %v3275_v5 = vrot.slane %v3003_v13, 2  ;;  %v9424_v13 = vld [vmem:[#allocation97_spill] sm:$0xff]  ;;  %v9425_v7 = vld [vmem:[#allocation122_spill] sm:$0xff] }
 0x49a   : > { %9420 = vst [vmem:[#allocation13_spill] sm:$0xff] %v7839_v59  ;;  %v7842_v25 = vsel %vm1909_vm10, %v2982_v16, %v2828_v58  ;;  %v3252_v34 = vsel %vm1900_vm9, %v3244_v9, %v9392_v21  ;;  %v3093_v37 = vsel %vm1178_vm4, %v9421_v49, %v9419_v26  ;;  %v3213_v44 = vsel %vm1178_vm4, %v9416_v57, %v9421_v49 }
 0x49b   : > { %v3170_v6 = vrot.slane %v7842_v25, 1  ;;  %v3274_v8 = vrot.slane %v7842_v25, 2  ;;  %v7857_v16 = vsel %vm1873_vm5, %v9423_v17, %v9422_v53  ;;  %v3029_v9 = vsel %vm1864_vm6, %v3021_v28, %v9424_v13  ;;  %v9427_v28 = vld [vmem:[#allocation140_spill] sm:$0xff] }
 0x49c   : > { %v3101_v58 = vsel %vm1864_vm6, %v3093_v37, %v9418_v39  ;;  %v3325_v11 = vsel %vm1864_vm6, %v3317_v51, %v9421_v49  ;;  %v2926_v42 = vsel %vm1873_vm5, %v9426_v55, %v9425_v7  ;;  %v3506_v53 = vsel %vm1900_vm9, %v3498_v0, %v9397_v12  ;;  %3794 = vrot.lane.b32.xlu0 %v6677_v20, %s9090_s15  ;;  %v9428_v55 = vld [vmem:[#allocation112_spill] sm:$0xff] }
 0x49d   : > { %v7869_v59 = vsel %vm600_vm2, %v3170_v6, %v3171_v29  ;;  %v7872_v24 = vsel %vm674_vm3, %v3274_v8, %v3275_v5  ;;  %v2946_v17 = vsel %vm1882_vm7, %v2926_v42, %v9427_v28  ;;  %v3074_v37 = vmul.f32 %v7496_v19, %v7842_v25  ;;  %v9429_v29 = vld [vmem:[#allocation147_spill] sm:$0xff]  ;;  %3766 = vrot.lane.b32.xlu2 %v6670_v14, %s4655_s16  ;;  %v9431_v6 = vld [vmem:[#allocation133_spill] sm:$0xff] }
 0x49e   : > { %v3194_v51 = vmul.f32 %v7869_v59, %v7469_v60  ;;  %v3221_v7 = vsel %vm1864_vm6, %v3213_v44, %v9419_v26  ;;  %v2925_v5 = vsel %vm1873_vm5, %v9429_v29, %v9428_v55  ;;  %v2966_v0 = vsel %vm1891_vm8, %v2946_v17, %v6855_v54  ;;  %v9430_v19 = vld [vmem:[#allocation107_spill] sm:$0xff]  ;;  %3744 = vrot.lane.b32.xlu1 %v6655_v22, %s9119_s0  ;;  %v2844_v54 = vpop.permute.xlu0 %2843  ;;  %v9432_v55 = vld [vmem:[#allocation28_spill] sm:$0xff] }
 0x49f   : > { %v3037_v42 = vsel %vm1873_vm5, %v3029_v9, %v9430_v19  ;;  %v3109_v60 = vsel %vm1873_vm5, %v3101_v58, %v9424_v13  ;;  %v2945_v8 = vsel %vm1882_vm7, %v2925_v5, %v9431_v6  ;;  %v2986_v44 = vsel %vm1900_vm9, %v2966_v0, %v7385_v43  ;;  %v7907_v29 = vpop.permute.xlu1 %2779  ;;  %v2840_v5 = vpop.permute.xlu2 %2839 }
 0x4a0   : > { %v3202_v28 = vadd.f32 %v3194_v51, %v3074_v37  ;;  %v3229_v17 = vsel %vm1873_vm5, %v3221_v7, %v9418_v39  ;;  %v2965_v9 = vsel %vm1891_vm8, %v2945_v8, %v9432_v55  ;;  %v7910_v58 = vsel %vm1909_vm10, %v2986_v44, %v2844_v54  ;;  %v9433_v51 = vld [vmem:[#allocation77_spill] sm:$0xff]  ;;  %v9435_v44 = vld [vmem:[#allocation108_spill] sm:$0xff] }
 0x4a1   : > { %v3298_v43 = vmul.f32 %v7872_v24, %v7504_v31  ;;  %v3645_v37 = vsel %vm1891_vm8, %v7765_v10, %v9360_v45  ;;  %v2985_v0 = vsel %vm1900_vm9, %v2965_v9, %v9433_v51  ;;  %v3117_v7 = vsel %vm1882_vm7, %v3109_v60, %v9430_v19  ;;  %v9439_v9 = vld [vmem:[#allocation83_spill] sm:$0xff] }
 0x4a2   : > { %v7923_v6 = vsel %vm1873_vm5, %v3325_v11, %v9419_v26  ;;  %v7927_v8 = vsel %vm1909_vm10, %v3252_v34, %v9383_v2  ;;  %v7930_v31 = vsel %vm1909_vm10, %v2985_v0, %v2840_v5  ;;  %v3045_v45 = vsel %vm1882_vm7, %v3037_v42, %v9435_v44  ;;  %v9438_v34 = vld [vmem:[#allocation79_spill] sm:$0xff]  ;;  %v9441_v5 = vld [vmem:[#allocation16_spill] sm:$0xff]  ;;  %v9445_v0 = vld [vmem:[#allocation9_spill] sm:$0xff] }
 0x4a3   : > { %9434 = vst [vmem:[#allocation142_spill] sm:$0xff] %v7927_v8  ;;  %v7934_v10 = vadd.f32 %v3298_v43, %v3202_v28  ;;  %v3237_v54 = vsel %vm1882_vm7, %v3229_v17, %v9424_v13  ;;  %v7940_v60 = vsel %vm1909_vm10, %v3428_v18, %v9393_v36  ;;  %v7944_v11 = vsel %vm1909_vm10, %v3506_v53, %v9400_v56  ;;  %v9440_v28 = vld [vmem:[#allocation125_spill] sm:$0xff]  ;;  %v9442_v18 = vld [vmem:[#allocation76_spill] sm:$0xff] }
 0x4a4   : > { %9436 = vst [vmem:[#allocation132_spill] sm:$0xff] %v7940_v60  ;;  %v3653_v55 = vsel %vm1900_vm9, %v3645_v37, %v9438_v34  ;;  %v3644_v42 = vsel %vm1891_vm8, %v7777_v63, %v9439_v9  ;;  %v2929_v43 = vsel %vm1873_vm5, %v9441_v5, %v9440_v28  ;;  %v3125_v17 = vsel %vm1891_vm8, %v3117_v7, %v9435_v44  ;;  %v9444_v37 = vld [vmem:[#allocation115_spill] sm:$0xff]  ;;  %v9447_v28 = vld [vmem:[#allocation136_spill] sm:$0xff] }
 0x4a5   : > { %9437 = vst [vmem:[#allocation116_spill] sm:$0xff] %v7944_v11  ;;  %v7959_v51 = vsel %vm1909_vm10, %v7773_v33, %v9442_v18  ;;  %v3614_v53 = vsel %vm1178_vm4, %v9397_v12, %v9400_v56  ;;  %v2928_v63 = vsel %vm1873_vm5, %v9445_v0, %v9444_v37  ;;  %v9446_v34 = vld [vmem:[#allocation143_spill] sm:$0xff]  ;;  %3800 = vrot.lane.b32.xlu0 %v6737_v46, %s9090_s15  ;;  %v9450_v37 = vld [vmem:[#allocation84_spill] sm:$0xff] }
 0x4a6   : > { %9443 = vst [vmem:[#allocation135_spill] sm:$0xff] %v7959_v51  ;;  %v2949_v9 = vsel %vm1882_vm7, %v2929_v43, %v9446_v34  ;;  %v3053_v7 = vsel %vm1891_vm8, %v3045_v45, %v9417_v40  ;;  %v3245_v33 = vsel %vm1891_vm8, %v3237_v54, %v9430_v19  ;;  %v2948_v5 = vsel %vm1882_vm7, %v2928_v63, %v9447_v28  ;;  %v9448_v18 = vld [vmem:[#allocation43_spill] sm:$0xff]  ;;  %v9451_v45 = vld [vmem:[#allocation30_spill] sm:$0xff]  ;;  %v9452_v54 = vld [vmem:[#allocation96_spill] sm:$0xff] }
 0x4a7   : > { %v2969_v12 = vsel %vm1891_vm8, %v2949_v9, %v9448_v18  ;;  %3772 = vrot.lane.b32.xlu2 %v6727_v38, %s4655_s16  ;;  %v7983_v43 = vsel %vm1909_vm10, %v3653_v55, %v9337_v35  ;;  %v3652_v0 = vsel %vm1900_vm9, %v3644_v42, %v9450_v37  ;;  %v2968_v34 = vsel %vm1891_vm8, %v2948_v5, %v9451_v45  ;;  %v2856_v18 = vpop.permute.xlu0 %2855  ;;  %v9453_v55 = vld [vmem:[#allocation93_spill] sm:$0xff]  ;;  %v8001_v9 = vpop.permute.xlu1 %2791 }
 0x4a8   : > { %9449 = vst [vmem:[#allocation27_spill] sm:$0xff] %v7983_v43  ;;  %v2989_v56 = vsel %vm1900_vm9, %v2969_v12, %v9452_v54  ;;  %3750 = vrot.lane.b32.xlu1 %v6698_v30, %s9119_s0  ;;  %v3133_v63 = vsel %vm1900_vm9, %v3125_v17, %v9417_v40  ;;  %v7997_v35 = vsel %vm1864_vm6, %v3614_v53, %v9393_v36  ;;  %v2852_v5 = vpop.permute.xlu2 %2851  ;;  %v9457_v36 = vld [vmem:[#allocation117_spill] sm:$0xff] }
 0x4a9   : > { %v2988_v42 = vsel %vm1900_vm9, %v2968_v34, %v9453_v55  ;;  %9454 = vst [vmem:[#allocation103_spill] sm:$0xff] %v8001_v9  ;;  %v3009_v28 = vsel %vm1909_vm10, %v2989_v56, %v2856_v18  ;;  %v3061_v12 = vsel %vm1900_vm9, %v3053_v7, %v9416_v57  ;;  %v3253_v37 = vsel %vm1900_vm9, %v3245_v33, %v9435_v44  ;;  %v9455_v34 = vld [vmem:[#allocation110_spill] sm:$0xff] }
 0x4aa   : > { %v3180_v45 = vrot.slane %v3009_v28, 1  ;;  %v3284_v17 = vrot.slane %v3009_v28, 2  ;;  %v8009_v54 = vsel %vm1909_vm10, %v2988_v42, %v2852_v5  ;;  %v3543_v53 = vsel %vm1178_vm4, %v9424_v13, %v9430_v19  ;;  %v9456_v55 = vld [vmem:[#allocation18_spill] sm:$0xff] }
 0x4ab   : > { %v2912_v56 = vsel %vm1864_vm6, %v9456_v55, %v9455_v34  ;;  %v3141_v18 = vsel %vm1909_vm10, %v3133_v63, %v9416_v57  ;;  %v3179_v7 = vrot.slane %v8009_v54, 1  ;;  %v3283_v33 = vrot.slane %v8009_v54, 2  ;;  %v9458_v28 = vld [vmem:[#allocation22_spill] sm:$0xff]  ;;  %v9461_v55 = vld [vmem:[#allocation124_spill] sm:$0xff] }
 0x4ac   : > { %v2931_v42 = vsel %vm1873_vm5, %v9458_v28, %v9457_v36  ;;  %v9459_v5 = vld [vmem:[#allocation118_spill] sm:$0xff]  ;;  %v3069_v51 = vsel %vm1909_vm10, %v3061_v12, %v9421_v49  ;;  %v3261_v34 = vsel %vm1909_vm10, %v3253_v37, %v9417_v40  ;;  %v2937_v63 = vsel %vm1882_vm7, %v7782_v62, %v9461_v55  ;;  %v9465_v12 = vld [vmem:[#allocation19_spill] sm:$0xff] }
 0x4ad   : > { %v9460_v9 = vld [vmem:[#allocation14_spill] sm:$0xff]  ;;  %v2932_v8 = vsel %vm1873_vm5, %v2912_v56, %v9462_v1  ;;  %v8037_v43 = vsel %vm600_vm2, %v3179_v7, %v3180_v45  ;;  %v8040_v36 = vsel %vm674_vm3, %v3283_v33, %v3284_v17  ;;  %v3077_v37 = vmul.f32 %v3069_v51, %v8009_v54  ;;  %3814 = vrot.lane.b32.xlu0 %v6670_v14, %s9115_s14  ;;  %v9467_v45 = vld [vmem:[#allocation139_spill] sm:$0xff]  ;;  %v9468_v56 = vld [vmem:[#allocation45_spill] sm:$0xff] }
 0x4ae   : > { %v2916_v11 = vsel %vm1873_vm5, %v9460_v9, %v9459_v5  ;;  %9463 = vst [vmem:[#allocation11_spill] sm:$0xff] %v8040_v36  ;;  %v9464_v9 = vld [vmem:[#allocation145_spill] sm:$0xff]  ;;  %v2952_v5 = vsel %vm1882_vm7, %v2932_v8, %v9465_v12  ;;  %v3197_v60 = vmul.f32 %v8037_v43, %v3141_v18  ;;  %v9466_v1 = vld [vmem:[#allocation138_spill] sm:$0xff] }
 0x4af   : > { %v2957_v28 = vsel %vm1891_vm8, %v2937_v63, %v9464_v9  ;;  %v2951_v62 = vsel %vm1882_vm7, %v2931_v42, %v9466_v1  ;;  %v2936_v17 = vsel %vm1882_vm7, %v2916_v11, %v9467_v45  ;;  %v2972_v7 = vsel %vm1891_vm8, %v2952_v5, %v9468_v56  ;;  %v9469_v33 = vld [vmem:[#allocation54_spill] sm:$0xff]  ;;  %3778 = vrot.lane.b32.xlu2 %v6845_v23, %s4655_s16  ;;  %v2868_v11 = vpop.permute.xlu0 %2867  ;;  %v9472_v12 = vld [vmem:[#allocation37_spill] sm:$0xff] }
 0x4b0   : > { %v2977_v55 = vsel %vm1900_vm9, %v2957_v28, %v9469_v33  ;;  %v9470_v8 = vld [vmem:[#allocation26_spill] sm:$0xff]  ;;  %v3205_v9 = vadd.f32 %v3197_v60, %v3077_v37  ;;  %3756 = vrot.lane.b32.xlu1 %v6759_v27, %s9119_s0  ;;  %v2956_v28 = vsel %vm1891_vm8, %v2936_v17, %v9472_v12  ;;  %v3301_v56 = vmul.f32 %v8040_v36, %v3261_v34  ;;  %v2804_v37 = vpop.permute.xlu1 %2803  ;;  %v9477_v12 = vld [vmem:[#allocation33_spill] sm:$0xff] }
 0x4b1   : > { %v2971_v51 = vsel %vm1891_vm8, %v2951_v62, %v9470_v8  ;;  %v9471_v18 = vld [vmem:[#allocation150_spill] sm:$0xff]  ;;  %v2997_v42 = vsel %vm1909_vm10, %v2977_v55, %v7671_v3  ;;  %v2864_v62 = vpop.permute.xlu2 %2863  ;;  %v3389_v17 = vsel %vm1178_vm4, %v9435_v44, %v9417_v40  ;;  %v8086_v33 = vsel %vm1909_vm10, %v3652_v0, %v9344_v32 }
 0x4b2   : > { %v2992_v63 = vsel %vm1900_vm9, %v2972_v7, %v9471_v18  ;;  %v9473_v5 = vld [vmem:[#allocation82_spill] sm:$0xff]  ;;  %v9475_v7 = vld [vmem:[#allocation148_spill] sm:$0xff]  ;;  %9476 = vst [vmem:[#allocation6_spill] sm:$0xff] %v8086_v33  ;;  %v3162_v55 = vrot.slane %v2997_v42, 1  ;;  %v3551_v8 = vsel %vm1864_vm6, %v3543_v53, %v9435_v44  ;;  %v3266_v18 = vrot.slane %v2997_v42, 2  ;;  %v9481_v42 = vld [vmem:[#allocation21_spill] sm:$0xff] }
 0x4b3   : > { %v2991_v1 = vsel %vm1900_vm9, %v2971_v51, %v9473_v5  ;;  %v8073_v45 = vsel %vm1909_vm10, %v2992_v63, %v2868_v11  ;;  %v2976_v3 = vsel %vm1900_vm9, %v2956_v28, %v9475_v7  ;;  %v8091_v51 = vadd.f32 %v3301_v56, %v3205_v9  ;;  %v9478_v5 = vld [vmem:[#allocation120_spill] sm:$0xff]  ;;  %v9480_v7 = vld [vmem:[#allocation127_spill] sm:$0xff] }
 0x4b4   : > { %9474 = vst [vmem:[#allocation119_spill] sm:$0xff] %v8073_v45  ;;  %v8079_v60 = vsel %vm1909_vm10, %v2991_v1, %v2864_v62  ;;  %v2996_v34 = vsel %vm1909_vm10, %v2976_v3, %v2804_v37  ;;  %v9479_v1 = vld [vmem:[#allocation23_spill] sm:$0xff]  ;;  %v2939_v32 = vsel %vm1882_vm7, %v7857_v16, %v9480_v7  ;;  %v3397_v0 = vsel %vm1864_vm6, %v3389_v17, %v9416_v57  ;;  %v9482_v16 = vld [vmem:[#allocation58_spill] sm:$0xff]  ;;  %v9483_v17 = vld [vmem:[#allocation41_spill] sm:$0xff] }
 0x4b5   : > { %v3161_v63 = vrot.slane %v2996_v34, 1  ;;  %v3265_v11 = vrot.slane %v2996_v34, 2  ;;  %v3366_v28 = vmul.f32 %v9477_v12, %v2996_v34  ;;  %v2918_v62 = vsel %vm1873_vm5, %v9479_v1, %v9478_v5  ;;  %3820 = vrot.lane.b32.xlu0 %v6727_v38, %s9115_s14  ;;  %v9484_v1 = vld [vmem:[#allocation40_spill] sm:$0xff]  ;;  %v9485_v45 = vld [vmem:[#allocation62_spill] sm:$0xff] }
 0x4b6   : > { %v3467_v53 = vsel %vm1178_vm4, %v9430_v19, %v9435_v44  ;;  %v2959_v9 = vsel %vm1891_vm8, %v2939_v32, %v9481_v42  ;;  %v3071_v5 = vmul.f32 %v9483_v17, %v2996_v34 }
 0x4b7   : > { %v3163_v56 = vsel %vm600_vm2, %v3161_v63, %v3162_v55  ;;  %v3267_v3 = vsel %vm674_vm3, %v3265_v11, %v3266_v18  ;;  %v3374_v37 = vadd.f32 %v3366_v28, %v7741_v15  ;;  %v2979_v12 = vsel %vm1900_vm9, %v2959_v9, %v9482_v16  ;;  %3792 = vrot.lane.b32.xlu2 %v6655_v22, %s9090_s15  ;;  %v9486_v55 = vld [vmem:[#allocation141_spill] sm:$0xff]  ;;  %v8127_v34 = vpop.permute.xlu0 %3696  ;;  %v9487_v11 = vld [vmem:[#allocation42_spill] sm:$0xff] }
 0x4b8   : > { %v3191_v7 = vmul.f32 %v3163_v56, %v9484_v1  ;;  %v3444_v33 = vmul.f32 %v9485_v45, %v3163_v56  ;;  %v2938_v18 = vsel %vm1882_vm7, %v2918_v62, %v9486_v55  ;;  %v2999_v15 = vsel %vm1909_vm10, %v2979_v12, %v7737_v61  ;;  %3770 = vrot.lane.b32.xlu1 %v6677_v20, %s4655_s16  ;;  %v9488_v62 = vld [vmem:[#allocation38_spill] sm:$0xff]  ;;  %v9490_v56 = vld [vmem:[#allocation151_spill] sm:$0xff]  ;;  %v2812_v16 = vpop.permute.xlu1 %2811 }
 0x4b9   : > { %v3559_v63 = vsel %vm1873_vm5, %v3551_v8, %v9417_v40  ;;  %v3630_v45 = vsel %vm1873_vm5, %v7997_v35, %v9392_v21  ;;  %v2958_v28 = vsel %vm1891_vm8, %v2938_v18, %v9487_v11  ;;  %v3295_v42 = vmul.f32 %v3267_v3, %v9488_v62  ;;  %v8135_v61 = vpop.permute.xlu2 %3694  ;;  %v9492_v18 = vld [vmem:[#allocation47_spill] sm:$0xff] }
 0x4ba   : > { %v3199_v32 = vadd.f32 %v3191_v7, %v3071_v5  ;;  %v3452_v9 = vadd.f32 %v3444_v33, %v3374_v37  ;;  %9489 = vst [vmem:[#allocation109_spill] sm:$0xff] %v8135_v61  ;;  %v2978_v8 = vsel %vm1900_vm9, %v2958_v28, %v9490_v56  ;;  %v3341_v12 = vsel %vm1882_vm7, %v7923_v6, %v9418_v39 }
 0x4bb   : > { %v3405_v21 = vsel %vm1873_vm5, %v3397_v0, %v9421_v49  ;;  %v3475_v35 = vsel %vm1864_vm6, %v3467_v53, %v9417_v40  ;;  %v3165_v17 = vrot.slane %v2999_v15, 1  ;;  %v2998_v33 = vsel %vm1909_vm10, %v2978_v8, %v2812_v16  ;;  %v9498_v8 = vld [vmem:[#allocation51_spill] sm:$0xff] }
 0x4bc   : > { %v3303_v5 = vadd.f32 %v3295_v42, %v3199_v32  ;;  %v8149_v37 = vsel %vm1882_vm7, %v3630_v45, %v9383_v2  ;;  %v3269_v1 = vrot.slane %v2999_v15, 2  ;;  %v3164_v7 = vrot.slane %v2998_v33, 1  ;;  %v9494_v2 = vld [vmem:[#allocation123_spill] sm:$0xff]  ;;  %v9495_v15 = vld [vmem:[#allocation24_spill] sm:$0xff] }
 0x4bd   : > { %9491 = vst [vmem:[#allocation146_spill] sm:$0xff] %v8149_v37  ;;  %v3268_v55 = vrot.slane %v2998_v33, 2  ;;  %v3367_v11 = vmul.f32 %v9492_v18, %v2998_v33  ;;  %v8154_v6 = vsel %vm1882_vm7, %v3559_v63, %v9416_v57  ;;  %v3349_v0 = vsel %vm1891_vm8, %v3341_v12, %v9424_v13  ;;  %3826 = vrot.lane.b32.xlu0 %v6845_v23, %s9115_s14  ;;  %v9497_v42 = vld [vmem:[#allocation144_spill] sm:$0xff]  ;;  %v9499_v12 = vld [vmem:[#allocation57_spill] sm:$0xff] }
 0x4be   : > { %9493 = vst [vmem:[#allocation137_spill] sm:$0xff] %v8154_v6  ;;  %v3413_v53 = vsel %vm1882_vm7, %v3405_v21, %v9419_v26  ;;  %v8162_v28 = vsel %vm1873_vm5, %v3475_v35, %v9416_v57  ;;  %v2921_v45 = vsel %vm1873_vm5, %v9495_v15, %v9494_v2  ;;  %v3166_v32 = vsel %vm600_vm2, %v3164_v7, %v3165_v17  ;;  %v9500_v35 = vld [vmem:[#allocation49_spill] sm:$0xff]  ;;  %v9501_v17 = vld [vmem:[#allocation126_spill] sm:$0xff]  ;;  %v9502_v7 = vld [vmem:[#allocation8_spill] sm:$0xff] }
 0x4bf   : > { %v8169_v62 = vsel %vm674_vm3, %v3268_v55, %v3269_v1  ;;  %v3375_v63 = vadd.f32 %v3367_v11, %v3303_v5  ;;  %v2941_v56 = vsel %vm1882_vm7, %v2921_v45, %v9497_v42  ;;  %v3072_v16 = vmul.f32 %v9498_v8, %v2998_v33  ;;  %3798 = vrot.lane.b32.xlu2 %v6698_v30, %s9090_s15  ;;  %v9503_v5 = vld [vmem:[#allocation53_spill] sm:$0xff]  ;;  %v8187_v11 = vpop.permute.xlu0 %3702  ;;  %v9505_v42 = vld [vmem:[#allocation59_spill] sm:$0xff] }
 0x4c0   : > { %9496 = vst [vmem:[#allocation130_spill] sm:$0xff] %v8169_v62  ;;  %v3192_v21 = vmul.f32 %v3166_v32, %v9499_v12  ;;  %v3445_v18 = vmul.f32 %v9500_v35, %v3166_v32  ;;  %v2924_v1 = vsel %vm1873_vm5, %v9502_v7, %v9501_v17  ;;  %v2961_v55 = vsel %vm1891_vm8, %v2941_v56, %v9503_v5  ;;  %v9507_v56 = vld [vmem:[#allocation52_spill] sm:$0xff]  ;;  %v9508_v7 = vld [vmem:[#allocation121_spill] sm:$0xff]  ;;  %v9509_v57 = vld [vmem:[#allocation35_spill] sm:$0xff]  ;;  %v2824_v37 = vpop.permute.xlu1 %2823 }
 0x4c1   : > { %3776 = vrot.lane.b32.xlu1 %v6737_v46, %s4655_s16  ;;  %v8191_v2 = vsel %vm1900_vm9, %v3349_v0, %v9430_v19  ;;  %v8195_v15 = vsel %vm1891_vm8, %v3413_v53, %v9418_v39  ;;  %v3296_v8 = vmul.f32 %v8169_v62, %v9505_v42  ;;  %v8199_v35 = vpop.permute.xlu2 %3700  ;;  %v3521_v17 = vmul.f32 %v9507_v56, %v8169_v62 }
 0x4c2   : > { %9504 = vst [vmem:[#allocation31_spill] sm:$0xff] %v8195_v15  ;;  %v3200_v45 = vadd.f32 %v3192_v21, %v3072_v16  ;;  %v3453_v12 = vadd.f32 %v3445_v18, %v3375_v63  ;;  %v2981_v5 = vsel %vm1900_vm9, %v2961_v55, %v9508_v7  ;;  %v3167_v0 = vrot.slane %v7735_v4, 1  ;;  %v9510_v16 = vld [vmem:[#allocation55_spill] sm:$0xff]  ;;  %v9512_v55 = vld [vmem:[#allocation129_spill] sm:$0xff]  ;;  %v9513_v7 = vld [vmem:[#allocation12_spill] sm:$0xff] }
 0x4c3   : > { %9506 = vst [vmem:[#allocation105_spill] sm:$0xff] %v8199_v35  ;;  %v3271_v61 = vrot.slane %v7735_v4, 2  ;;  %v3520_v53 = vmul.f32 %v9509_v57, %v3267_v3  ;;  %v3368_v21 = vmul.f32 %v9510_v16, %v7735_v4  ;;  %v3001_v63 = vsel %vm1909_vm10, %v2981_v5, %v2824_v37  ;;  %v9511_v35 = vld [vmem:[#allocation39_spill] sm:$0xff]  ;;  %v9515_v37 = vld [vmem:[#allocation25_spill] sm:$0xff] }
 0x4c4   : > { %v3304_v42 = vadd.f32 %v3296_v8, %v3200_v45  ;;  %v3529_v18 = vadd.f32 %v3521_v17, %v3453_v12  ;;  %v3592_v6 = vmul.f32 %v9511_v35, %v2998_v33  ;;  %v3168_v56 = vrot.slane %v3001_v63, 1  ;;  %v9514_v15 = vld [vmem:[#allocation15_spill] sm:$0xff]  ;;  %v9516_v33 = vld [vmem:[#allocation61_spill] sm:$0xff] }
 0x4c5   : > { %v3272_v62 = vrot.slane %v3001_v63, 2  ;;  %v3528_v40 = vadd.f32 %v3520_v53, %v3452_v9  ;;  %v2927_v26 = vsel %vm1873_vm5, %v9513_v7, %v9512_v55  ;;  %v2944_v57 = vsel %vm1882_vm7, %v2924_v1, %v9514_v15  ;;  %3840 = vrot.lane.b32.xlu0 %v6655_v22, %s9099_s22  ;;  %v9517_v15 = vld [vmem:[#allocation74_spill] sm:$0xff]  ;;  %v9518_v5 = vld [vmem:[#allocation63_spill] sm:$0xff] }
 0x4c6   : > { %v3376_v3 = vadd.f32 %v3368_v21, %v3304_v42  ;;  %v8220_v45 = vsel %vm1178_vm4, %v9418_v39, %v9424_v13  ;;  %v2947_v8 = vsel %vm1882_vm7, %v2927_v26, %v9515_v37  ;;  %v2964_v12 = vsel %vm1891_vm8, %v2944_v57, %v9516_v33  ;;  %v9519_v26 = vld [vmem:[#allocation56_spill] sm:$0xff]  ;;  %v9523_v37 = vld [vmem:[#allocation69_spill] sm:$0xff] }
 0x4c7   : > { %v3169_v9 = vsel %vm600_vm2, %v3167_v0, %v3168_v56  ;;  %v8230_v35 = vsel %vm674_vm3, %v3271_v61, %v3272_v62  ;;  %v2984_v1 = vsel %vm1900_vm9, %v2964_v12, %v7732_v48  ;;  %v3073_v17 = vmul.f32 %v9517_v15, %v7735_v4  ;;  %3804 = vrot.lane.b32.xlu2 %v6759_v27, %s9090_s15  ;;  %v9520_v0 = vld [vmem:[#allocation46_spill] sm:$0xff]  ;;  %v9521_v42 = vld [vmem:[#allocation72_spill] sm:$0xff]  ;;  %v8246_v48 = vpop.permute.xlu0 %3708 }
 0x4c8   : > { %v3193_v53 = vmul.f32 %v3169_v9, %v9518_v5  ;;  %v3446_v16 = vmul.f32 %v9519_v26, %v3169_v9  ;;  %v3593_v21 = vmul.f32 %v9520_v0, %v7735_v4  ;;  %v3369_v61 = vmul.f32 %v9521_v42, %v7842_v25  ;;  %v9522_v62 = vld [vmem:[#allocation36_spill] sm:$0xff]  ;;  %v2836_v26 = vpop.permute.xlu1 %2835 }
 0x4c9   : > { %3790 = vrot.lane.b32.xlu1 %v6670_v14, %s9090_s15  ;;  %v3670_v63 = vmul.f32 %v9522_v62, %v3166_v32  ;;  %v3600_v56 = vadd.f32 %v3592_v6, %v3528_v40  ;;  %v8249_v57 = vpop.permute.xlu2 %3706  ;;  %v3297_v33 = vmul.f32 %v8230_v35, %v9523_v37  ;;  %v9524_v4 = vld [vmem:[#allocation68_spill] sm:$0xff]  ;;  %v3174_v40 = vrot.slane %v7930_v31, 1 }
 0x4ca   : > { %v3201_v55 = vadd.f32 %v3193_v53, %v3073_v17  ;;  %v3454_v7 = vadd.f32 %v3446_v16, %v3376_v3  ;;  %v3522_v12 = vmul.f32 %v9524_v4, %v8230_v35  ;;  %v9525_v15 = vld [vmem:[#allocation48_spill] sm:$0xff]  ;;  %v3601_v39 = vadd.f32 %v3593_v21, %v3529_v18  ;;  %v9528_v21 = vld [vmem:[#allocation65_spill] sm:$0xff] }
 0x4cb   : > { %v3594_v5 = vmul.f32 %v9525_v15, %v7842_v25  ;;  %v9526_v0 = vld [vmem:[#allocation80_spill] sm:$0xff]  ;;  %v8259_v32 = vadd.f32 %v3670_v63, %v3600_v56  ;;  %v8263_v6 = vsel %vm1909_vm10, %v2984_v1, %v2836_v26  ;;  %v3278_v53 = vrot.slane %v7930_v31, 2 }
 0x4cc   : > { %v3447_v42 = vmul.f32 %v9526_v0, %v7869_v59  ;;  %v3305_v3 = vadd.f32 %v3297_v33, %v3201_v55  ;;  %v3530_v17 = vadd.f32 %v3522_v12, %v3454_v7  ;;  %v3173_v16 = vrot.slane %v8263_v6, 1  ;;  %v9527_v62 = vld [vmem:[#allocation92_spill] sm:$0xff]  ;;  %v9530_v7 = vld [vmem:[#allocation81_spill] sm:$0xff]  ;;  %v9531_v33 = vld [vmem:[#allocation99_spill] sm:$0xff] }
 0x4cd   : > { %v3277_v25 = vrot.slane %v8263_v6, 2  ;;  %v3370_v37 = vmul.f32 %v9527_v62, %v8263_v6  ;;  %v3672_v63 = vmul.f32 %v9528_v21, %v7869_v59  ;;  %v9529_v56 = vld [vmem:[#allocation64_spill] sm:$0xff]  ;;  %3846 = vrot.lane.b32.xlu0 %v6698_v30, %s9099_s22  ;;  %v3075_v12 = vmul.f32 %v9531_v33, %v8263_v6  ;;  %v9532_v59 = vld [vmem:[#allocation154_spill] sm:$0xff]  ;;  %v9534_v0 = vld [vmem:[#allocation131_spill] sm:$0xff] }
 0x4ce   : > { %v3377_v4 = vadd.f32 %v3369_v61, %v3305_v3  ;;  %v3602_v18 = vadd.f32 %v3594_v5, %v3530_v17  ;;  %v3671_v15 = vmul.f32 %v9529_v56, %v3169_v9  ;;  %v8274_v1 = vsel %vm600_vm2, %v3173_v16, %v3174_v40  ;;  %v9535_v40 = vld [vmem:[#allocation17_spill] sm:$0xff]  ;;  %v9538_v21 = vld [vmem:[#allocation32_spill] sm:$0xff] }
 0x4cf   : > { %v8277_v55 = vsel %vm674_vm3, %v3277_v25, %v3278_v53  ;;  %v3378_v31 = vadd.f32 %v3370_v37, %v7934_v10  ;;  %v3523_v61 = vmul.f32 %v9530_v7, %v7872_v24  ;;  %v3195_v9 = vmul.f32 %v8274_v1, %v9532_v59  ;;  %3818 = vrot.lane.b32.xlu2 %v6677_v20, %s9115_s14  ;;  %v9536_v10 = vld [vmem:[#allocation70_spill] sm:$0xff]  ;;  %v8299_v53 = vpop.permute.xlu0 %3722  ;;  %v9537_v37 = vld [vmem:[#allocation100_spill] sm:$0xff] }
 0x4d0   : > { %v3455_v5 = vadd.f32 %v3447_v42, %v3377_v4  ;;  %v8290_v26 = vadd.f32 %v3672_v63, %v3602_v18  ;;  %v2930_v3 = vsel %vm1873_vm5, %v9535_v40, %v9534_v0  ;;  %v2967_v17 = vsel %vm1891_vm8, %v2947_v8, %v9536_v10  ;;  %v9540_v33 = vld [vmem:[#allocation152_spill] sm:$0xff]  ;;  %v9541_v40 = vld [vmem:[#allocation113_spill] sm:$0xff] }
 0x4d1   : > { %3796 = vrot.lane.b32.xlu1 %v6727_v38, %s9090_s15  ;;  %v3365_v16 = vsel %vm1909_vm10, %v8191_v2, %v9435_v44  ;;  %v8304_v25 = vadd.f32 %v3671_v15, %v3601_v39  ;;  %v3863_v42 = vsel %vm1178_vm4, %v6655_v22, %v8127_v34  ;;  %v3203_v62 = vadd.f32 %v3195_v9, %v3075_v12  ;;  %v3721_v8 = vpop.permute.xlu2 %3720  ;;  %v2848_v39 = vpop.permute.xlu1 %2847  ;;  %v9539_v15 = vld [vmem:[#allocation78_spill] sm:$0xff] }
 0x4d2   : > { %9533 = vst [vmem:[#allocation106_spill] sm:$0xff] %v8290_v26  ;;  %v3299_v4 = vmul.f32 %v8277_v55, %v9537_v37  ;;  %v3531_v18 = vadd.f32 %v3523_v61, %v3455_v5  ;;  %v2950_v63 = vsel %vm1882_vm7, %v2930_v3, %v9538_v21  ;;  %v2987_v56 = vsel %vm1900_vm9, %v2967_v17, %v7831_v52  ;;  %v9542_v3 = vld [vmem:[#allocation29_spill] sm:$0xff] }
 0x4d3   : > { %v8316_v2 = vsel %vm1864_vm6, %v3863_v42, %v3721_v8  ;;  %v3623_v34 = vsel %vm1864_vm6, %v8220_v45, %v9430_v19  ;;  %v2970_v7 = vsel %vm1891_vm8, %v2950_v63, %v9539_v15  ;;  %v3371_v61 = vmul.f32 %v9540_v33, %v7910_v58  ;;  %v9543_v8 = vld [vmem:[#allocation149_spill] sm:$0xff] }
 0x4d4   : > { %v3307_v12 = vadd.f32 %v3299_v4, %v3203_v62  ;;  %v3007_v59 = vsel %vm1909_vm10, %v2987_v56, %v2848_v39  ;;  %v3176_v9 = vrot.slane %v7910_v58, 1  ;;  %v3280_v52 = vrot.slane %v7910_v58, 2  ;;  %v9546_v15 = vld [vmem:[#allocation153_spill] sm:$0xff] }
 0x4d5   : > { %v3177_v5 = vrot.slane %v3007_v59, 1  ;;  %v3281_v0 = vrot.slane %v3007_v59, 2  ;;  %v2913_v10 = vsel %vm1864_vm6, %v9542_v3, %v9541_v40  ;;  %v2990_v45 = vsel %vm1900_vm9, %v2970_v7, %v7907_v29  ;;  %3852 = vrot.lane.b32.xlu0 %v6759_v27, %s9099_s22  ;;  %v9544_v29 = vld [vmem:[#allocation89_spill] sm:$0xff]  ;;  %v9551_v3 = vld [vmem:[#allocation71_spill] sm:$0xff] }
 0x4d6   : > { %v3379_v17 = vadd.f32 %v3371_v61, %v3307_v12  ;;  %v8335_v42 = vsel %vm1873_vm5, %v3623_v34, %v9435_v44  ;;  %v3076_v62 = vmul.f32 %v7814_v41, %v7910_v58  ;;  %v3448_v21 = vmul.f32 %v9543_v8, %v8274_v1  ;;  %v9545_v41 = vld [vmem:[#allocation155_spill] sm:$0xff] }
 0x4d7   : > { %v3178_v37 = vsel %vm600_vm2, %v3176_v9, %v3177_v5  ;;  %v8343_v4 = vsel %vm674_vm3, %v3280_v52, %v3281_v0  ;;  %v3596_v63 = vmul.f32 %v9544_v29, %v7910_v58  ;;  %v3372_v56 = vmul.f32 %v7789_v47, %v8009_v54  ;;  %3824 = vrot.lane.b32.xlu2 %v6737_v46, %s9115_s14  ;;  %v8362_v58 = vpop.permute.xlu0 %3728  ;;  %v9547_v47 = vld [vmem:[#allocation132_spill] sm:$0xff]  ;;  %v9548_v61 = vld [vmem:[#allocation27_spill] sm:$0xff]  ;;  %v9549_v5 = vld [vmem:[#allocation142_spill] sm:$0xff] }
 0x4d8   : > { %v3196_v39 = vmul.f32 %v3178_v37, %v7802_v50  ;;  %v3449_v34 = vmul.f32 %v9545_v41, %v3178_v37  ;;  %v3597_v7 = vmul.f32 %v9546_v15, %v8009_v54  ;;  %v3866_v33 = vsel %vm1178_vm4, %v6698_v30, %v8187_v11  ;;  %v9550_v0 = vld [vmem:[#allocation114_spill] sm:$0xff] }
 0x4d9   : > { %3802 = vrot.lane.b32.xlu1 %v6845_v23, %s9090_s15  ;;  %v3450_v50 = vmul.f32 %v9547_v47, %v8037_v43  ;;  %v3675_v12 = vmul.f32 %v9548_v61, %v8037_v43  ;;  %v3727_v52 = vpop.permute.xlu2 %3726  ;;  %v3300_v54 = vmul.f32 %v8343_v4, %v9549_v5  ;;  %v3525_v11 = vmul.f32 %v9550_v0, %v8343_v4  ;;  %v2860_v41 = vpop.permute.xlu1 %2859 }
 0x4da   : > { %v3204_v59 = vadd.f32 %v3196_v39, %v3076_v62  ;;  %v3457_v9 = vadd.f32 %v3449_v34, %v3379_v17  ;;  %v3441_v40 = vrot.slane %v8079_v60, 1  ;;  %v3595_v8 = vmul.f32 %v9551_v3, %v8263_v6  ;;  %v9552_v39 = vld [vmem:[#allocation135_spill] sm:$0xff]  ;;  %v9558_v3 = vld [vmem:[#allocation34_spill] sm:$0xff] }
 0x4db   : > { %v8376_v29 = vsel %vm1864_vm6, %v3866_v33, %v3727_v52  ;;  %v3456_v15 = vadd.f32 %v3448_v21, %v3378_v31  ;;  %v8379_v43 = vsel %vm1909_vm10, %v2990_v45, %v2860_v41  ;;  %v3524_v34 = vmul.f32 %v9552_v39, %v8277_v55  ;;  %v9559_v41 = vld [vmem:[#allocation6_spill] sm:$0xff] }
 0x4dc   : > { %v3308_v17 = vadd.f32 %v3300_v54, %v3204_v59  ;;  %v3533_v62 = vadd.f32 %v3525_v11, %v3457_v9  ;;  %v3517_v47 = vrot.slane %v8079_v60, 2  ;;  %v3373_v61 = vmul.f32 %v3365_v16, %v8379_v43  ;;  %v9553_v59 = vld [vmem:[#allocation60_spill] sm:$0xff]  ;;  %v9554_v16 = vld [vmem:[#allocation73_spill] sm:$0xff]  ;;  %v9555_v54 = vld [vmem:[#allocation134_spill] sm:$0xff] }
 0x4dd   : > { %v3440_v5 = vrot.slane %v8379_v43, 1  ;;  %v3516_v6 = vrot.slane %v8379_v43, 2  ;;  %v3532_v0 = vadd.f32 %v3524_v34, %v3456_v15  ;;  %v3603_v31 = vadd.f32 %v3595_v8, %v3531_v18  ;;  %3950 = vrot.lane.b32.xlu0 %v9553_v59, %s9117_s17 }
 0x4de   : > { %v3380_v33 = vadd.f32 %v3372_v56, %v3308_v17  ;;  %v3605_v52 = vadd.f32 %v3597_v7, %v3533_v62  ;;  %v3381_v60 = vadd.f32 %v3373_v61, %v8091_v51  ;;  %v3673_v9 = vmul.f32 %v9554_v16, %v8274_v1  ;;  %v9556_v7 = vld [vmem:[#allocation116_spill] sm:$0xff]  ;;  %v9560_v17 = vld [vmem:[#allocation85_spill] sm:$0xff] }
 0x4df   : > { %v8388_v45 = vsel %vm600_vm2, %v3440_v5, %v3441_v40  ;;  %v8391_v21 = vsel %vm674_vm3, %v3516_v6, %v3517_v47  ;;  %v2933_v56 = vsel %vm1873_vm5, %v2913_v10, %v9555_v54  ;;  %3838 = vrot.lane.b32.xlu2 %v6670_v14, %s9099_s22  ;;  %v3526_v11 = vmul.f32 %v9556_v7, %v8040_v36  ;;  %v8410_v51 = vpop.permute.xlu0 %3742  ;;  %v9561_v47 = vld [vmem:[#allocation103_spill] sm:$0xff] }
 0x4e0   : > { %v3458_v18 = vadd.f32 %v3450_v50, %v3380_v33  ;;  %v8404_v40 = vadd.f32 %v3675_v12, %v3605_v52  ;;  %v2953_v8 = vsel %vm1882_vm7, %v2933_v56, %v9558_v3  ;;  %v3604_v1 = vadd.f32 %v3596_v63, %v3532_v0  ;;  %v9564_v0 = vld [vmem:[#allocation66_spill] sm:$0xff]  ;;  %v9567_v56 = vld [vmem:[#allocation119_spill] sm:$0xff] }
 0x4e1   : > { %3816 = vrot.lane.b32.xlu1 %v6655_v22, %s9115_s14  ;;  %v3674_v10 = vmul.f32 %v9559_v41, %v3178_v37  ;;  %v8413_v15 = vadd.f32 %v3673_v9, %v3603_v31  ;;  %v2973_v50 = vsel %vm1891_vm8, %v2953_v8, %v9560_v17  ;;  %v3869_v12 = vsel %vm1178_vm4, %v6759_v27, %v8246_v48  ;;  %v3733_v39 = vpop.permute.xlu2 %3732  ;;  %v9562_v37 = vld [vmem:[#allocation31_spill] sm:$0xff]  ;;  %v2872_v6 = vpop.permute.xlu1 %2871  ;;  %v9566_v9 = vld [vmem:[#allocation94_spill] sm:$0xff]  ;;  %v9568_v8 = vld [vmem:[#allocation137_spill] sm:$0xff] }
 0x4e2   : > { %9557 = vst [vmem:[#allocation20_spill] sm:$0xff] %v8404_v40  ;;  %v3491_v62 = vsel %vm1882_vm7, %v8162_v28, %v9421_v49  ;;  %v3534_v34 = vadd.f32 %v3526_v11, %v3458_v18  ;;  %v2993_v63 = vsel %vm1900_vm9, %v2973_v50, %v9561_v47  ;;  %v3429_v61 = vsel %vm1900_vm9, %v9562_v37, %v9424_v13  ;;  %v9563_v48 = vld [vmem:[#allocation67_spill] sm:$0xff]  ;;  %v9565_v28 = vld [vmem:[#allocation13_spill] sm:$0xff]  ;;  %v9569_v17 = vld [vmem:[#allocation88_spill] sm:$0xff] }
 0x4e3   : > { %v8429_v5 = vsel %vm1864_vm6, %v3869_v12, %v3733_v39  ;;  %v8431_v33 = vadd.f32 %v3674_v10, %v3604_v1  ;;  %v2005_v52 = vadd.f32 %v9563_v48, %v9421_v49  ;;  %v3582_v31 = vsel %vm1900_vm9, %v9565_v28, %v9564_v0  ;;  %v9570_v50 = vld [vmem:[#allocation146_spill] sm:$0xff]  ;;  %v9571_v39 = vld [vmem:[#allocation111_spill] sm:$0xff] }
 0x4e4   : > { %v3013_v16 = vsel %vm1909_vm10, %v2993_v63, %v2872_v6  ;;  %v3639_v54 = vsel %vm1882_vm7, %v8335_v42, %v9566_v9  ;;  %v3666_v18 = vrot.slane %v9567_v56, 1  ;;  %v3918_v7 = vrot.slane %v9567_v56, 2  ;;  %v9572_v37 = vld [vmem:[#allocation98_spill] sm:$0xff] }
 0x4e5   : > { %v3667_v11 = vrot.slane %v3013_v16, 1  ;;  %v3919_v3 = vrot.slane %v3013_v16, 2  ;;  %v3575_v1 = vsel %vm1891_vm8, %v9568_v8, %v9421_v49  ;;  %v3437_v41 = vsel %vm1909_vm10, %v3429_v61, %v9430_v19  ;;  %3956 = vrot.lane.b32.xlu0 %v9572_v37, %s9117_s17  ;;  %v9573_v61 = vld [vmem:[#allocation50_spill] sm:$0xff]  ;;  %v9575_v16 = vld [vmem:[#allocation91_spill] sm:$0xff] }
 0x4e6   : > { %v3499_v10 = vsel %vm1891_vm8, %v3491_v62, %v9563_v48  ;;  %v3646_v42 = vsel %vm1891_vm8, %v9570_v50, %v9569_v17  ;;  %v3451_v12 = vmul.f32 %v8388_v45, %v3437_v41  ;;  %v2199_v62 = vadd.f32 %v6655_v22, %v9573_v61  ;;  %v9574_v28 = vld [vmem:[#allocation10_spill] sm:$0xff]  ;;  %v9576_v17 = vld [vmem:[#allocation104_spill] sm:$0xff] }
 0x4e7   : > { %v3507_v47 = vsel %vm1900_vm9, %v3499_v10, %v9571_v39  ;;  %v3668_v63 = vsel %vm600_vm2, %v3666_v18, %v3667_v11  ;;  %v8461_v6 = vsel %vm674_vm3, %v3918_v7, %v3919_v3  ;;  %v2132_v8 = vadd.f32 %v9575_v16, %v9574_v28  ;;  %3844 = vrot.lane.b32.xlu2 %v6727_v38, %s9099_s22  ;;  %v9577_v18 = vld [vmem:[#allocation75_spill] sm:$0xff]  ;;  %v9579_v7 = vld [vmem:[#allocation86_spill] sm:$0xff]  ;;  %v8480_v61 = vpop.permute.xlu0 %3748 }
 0x4e8   : > { %v2037_v50 = vadd.f32 %v9576_v17, %v2005_v52  ;;  %v3647_v41 = vsel %vm1891_vm8, %v3639_v54, %v9576_v17  ;;  %v2201_v11 = vadd.f32 %v6727_v38, %v9577_v18  ;;  %v9578_v10 = vld [vmem:[#allocation87_spill] sm:$0xff]  ;;  %v3583_v22 = vsel %vm1900_vm9, %v3575_v1, %v9563_v48  ;;  %v9581_v28 = vld [vmem:[#allocation102_spill] sm:$0xff] }
 0x4e9   : > { %v2130_v3 = vadd.f32 %v9579_v7, %v9578_v10  ;;  %3822 = vrot.lane.b32.xlu1 %v6698_v30, %s9115_s14  ;;  %v9580_v52 = vld [vmem:[#allocation95_spill] sm:$0xff]  ;;  %v2164_v16 = vadd.f32 %v9581_v28, %v2132_v8  ;;  %v3591_v17 = vsel %vm1909_vm10, %v3583_v22, %v9571_v39  ;;  %v3515_v18 = vsel %vm1909_vm10, %v3507_v47, %v9424_v13  ;;  %v9582_v10 = vld [vmem:[#allocation101_spill] sm:$0xff]  ;;  %v3747_v1 = vpop.permute.xlu2 %3746 }
 0x4ea   : > { %v3654_v54 = vsel %vm1900_vm9, %v3646_v42, %v9580_v52  ;;  %v3590_v7 = vsel %vm1909_vm10, %v3582_v31, %v9582_v10  ;;  %v3527_v40 = vmul.f32 %v8391_v21, %v3515_v18  ;;  %v3655_v26 = vsel %vm1900_vm9, %v3647_v41, %v9421_v49  ;;  %v3699_v42 = vpop.permute.xlu1 %3698  ;;  %v9583_v49 = vld [vmem:[#allocation76_spill] sm:$0xff] }
 0x4eb   : > { %v3598_v36 = vmul.f32 %v3590_v7, %v8379_v43  ;;  %v3459_v52 = vadd.f32 %v3451_v12, %v3381_v60  ;;  %v2069_v8 = vadd.f32 %v9566_v9, %v2037_v50  ;;  %v3599_v22 = vmul.f32 %v3591_v17, %v9567_v56 }
 0x4ec   : > { %v3864_v47 = vsel %vm1178_vm4, %v6677_v20, %v3699_v42  ;;  %v3662_v31 = vsel %vm1909_vm10, %v3654_v54, %v9564_v0  ;;  %v2162_v41 = vadd.f32 %v9583_v49, %v2130_v3  ;;  %v3663_v60 = vsel %vm1909_vm10, %v3655_v26, %v9563_v48  ;;  %v9584_v0 = vld [vmem:[#allocation44_spill] sm:$0xff]  ;;  %v9585_v26 = vld [vmem:[#allocation90_spill] sm:$0xff]  ;;  %v9586_v42 = vld [vmem:[#allocation109_spill] sm:$0xff] }
 0x4ed   : > { %v3872_v28 = vsel %vm1864_vm6, %v3864_v47, %v8299_v53  ;;  %v3535_v18 = vadd.f32 %v3527_v40, %v3459_v52  ;;  %v3676_v43 = vmul.f32 %v3662_v31, %v8388_v45  ;;  %v3606_v7 = vadd.f32 %v3598_v36, %v3534_v34  ;;  %3970 = vrot.lane.b32.xlu0 %v9584_v0, %s9110_s23 }
 0x4ee   : > { %v8508_v9 = vsel %vm1873_vm5, %v3872_v28, %v3747_v1  ;;  %v2101_v56 = vadd.f32 %v9435_v44, %v2069_v8  ;;  %v3677_v12 = vmul.f32 %v3668_v63, %v3663_v60  ;;  %4562 = vrcp.f32 %v2201_v11 }
 0x4ef   : > { %v3607_v50 = vadd.f32 %v3599_v22, %v3535_v18  ;;  %v8513_v53 = vadd.f32 %v3676_v43, %v3606_v7  ;;  %v2196_v36 = vadd.f32 %v9582_v10, %v2164_v16  ;;  %3850 = vrot.lane.b32.xlu2 %v6845_v23, %s9099_s22  ;;  %4564 = vrcp.f32 %v2199_v62  ;;  %v3755_v44 = vpop.permute.xlu0 %3754 }
 0x4f0   : > { %v2194_v45 = vadd.f32 %v9585_v26, %v2162_v41  ;;  %v2133_v34 = vadd.f32 %v9430_v19, %v2101_v56  ;;  %v3862_v52 = vsel %vm1178_vm4, %v6670_v14, %v9586_v42 }
 0x4f1   : > { %3828 = vrot.lane.b32.xlu1 %v6759_v27, %s9115_s14  ;;  %v3753_v40 = vpop.permute.xlu2 %3752  ;;  %v8522_v63 = vadd.f32 %v3677_v12, %v3607_v50  ;;  %v2204_v11 = vadd.f32 %v6845_v23, %v2196_v36 }
 0x4f2   : > { %v3705_v48 = vpop.permute.xlu1 %3704  ;;  %v2202_v54 = vadd.f32 %v6698_v30, %v2194_v45  ;;  %v2165_v19 = vadd.f32 %v9424_v13, %v2133_v34 }
 0x4f3   : > { %v3867_v3 = vsel %vm1178_vm4, %v6737_v46, %v3705_v48  ;;  %4566 = vrcp.f32 %v2204_v11 }
 0x4f4   : > { %v3875_v62 = vsel %vm1864_vm6, %v3867_v3, %v8362_v58  ;;  %v8530_v16 = vpop.eup %4562  ;;  %4568 = vrcp.f32 %v2202_v54  ;;  %v2197_v30 = vadd.f32 %v9571_v39, %v2165_v19 }
 0x4f5   : > { %v8533_v17 = vsel %vm1873_vm5, %v3875_v62, %v3753_v40  ;;  %v8535_v10 = vpop.eup %4564  ;;  %3976 = vrot.lane.b32.xlu0 %v8530_v16, %s9110_s23 }
 0x4f6   : > { %v2205_v22 = vadd.f32 %v6759_v27, %v2197_v30 }
 0x4f7   : > { %3948 = vrot.lane.b32.xlu2 %v8535_v10, %s9117_s17  ;;  %v3769_v58 = vpop.permute.xlu0 %3768 }
 0x4f8   : > { %4570 = vrcp.f32 %v2205_v22 }
 0x4f9   : > { %3842 = vrot.lane.b32.xlu1 %v6677_v20, %s9099_s22  ;;  %v3767_v1 = vpop.permute.xlu2 %3766  ;;  %v8552_v31 = vpop.eup %4566 }
 0x4fa   : > { %v3719_v13 = vpop.permute.xlu1 %3718  ;;  %v8557_v20 = vpop.eup %4568 }
 0x4fb   : > { %v3870_v8 = vsel %vm1864_vm6, %v3862_v52, %v3719_v13 }
 0x4fc   : > { %v3878_v47 = vsel %vm1873_vm5, %v3870_v8, %v8410_v51  ;;  %v9587_v51 = vld [vmem:[#allocation105_spill] sm:$0xff] }
 0x4fd   : > { %v8555_v39 = vsel %vm1882_vm7, %v3878_v47, %v3767_v1  ;;  %3982 = vrot.lane.b32.xlu0 %v8552_v31, %s9110_s23  ;;  %v3865_v28 = vsel %vm1178_vm4, %v6727_v38, %v9587_v51 }
 0x4fe   : > { %v8574_v41 = vpop.eup %4570 }
 0x4ff   : > { %3954 = vrot.lane.b32.xlu2 %v8557_v20, %s9117_s17  ;;  %v3775_v14 = vpop.permute.xlu0 %3774 }
 0x501   : > { %3848 = vrot.lane.b32.xlu1 %v6737_v46, %s9099_s22  ;;  %v3773_v27 = vpop.permute.xlu2 %3772 }
 0x502   : > { %v3725_v18 = vpop.permute.xlu1 %3724 }
 0x503   : > { %v3873_v43 = vsel %vm1864_vm6, %v3865_v28, %v3725_v18 }
 0x504   : > { %v3881_v7 = vsel %vm1873_vm5, %v3873_v43, %v8480_v61  ;;  %v3868_v61 = vsel %vm1178_vm4, %v6845_v23, %v8249_v57 }
 0x505   : > { %v8572_v49 = vsel %vm1882_vm7, %v3881_v7, %v3773_v27  ;;  %3996 = vrot.lane.b32.xlu0 %v8535_v10, %s9119_s0 }
 0x507   : > { %3960 = vrot.lane.b32.xlu2 %v8574_v41, %s9117_s17  ;;  %v3781_v38 = vpop.permute.xlu0 %3780 }
 0x509   : > { %3946 = vrot.lane.b32.xlu1 %v9584_v0, %s9117_s17  ;;  %v3779_v46 = vpop.permute.xlu2 %3778 }
 0x50a   : > { %v3731_v60 = vpop.permute.xlu1 %3730 }
 0x50b   : > { %v3876_v56 = vsel %vm1864_vm6, %v3868_v61, %v3731_v60 }
 0x50c   : > { %v3884_v12 = vsel %vm1873_vm5, %v3876_v56, %v3755_v44 }
 0x50d   : > { %v8588_v50 = vsel %vm1882_vm7, %v3884_v12, %v3779_v46  ;;  %4002 = vrot.lane.b32.xlu0 %v8557_v20, %s9119_s0 }
 0x50f   : > { %3974 = vrot.lane.b32.xlu2 %v9553_v59, %s9110_s23  ;;  %v3795_v36 = vpop.permute.xlu0 %3794 }
 0x511   : > { %3952 = vrot.lane.b32.xlu1 %v8530_v16, %s9117_s17  ;;  %v3793_v26 = vpop.permute.xlu2 %3792 }
 0x512   : > { %v3745_v23 = vpop.permute.xlu1 %3744 }
 0x513   : > { %v3879_v57 = vsel %vm1873_vm5, %v8316_v2, %v3745_v23 }
 0x514   : > { %v3887_v45 = vsel %vm1882_vm7, %v3879_v57, %v3769_v58 }
 0x515   : > { %v8600_v44 = vsel %vm1891_vm8, %v3887_v45, %v3793_v26  ;;  %4008 = vrot.lane.b32.xlu0 %v8574_v41, %s9119_s0 }
 0x517   : > { %3980 = vrot.lane.b32.xlu2 %v9572_v37, %s9110_s23  ;;  %v3801_v40 = vpop.permute.xlu0 %3800 }
 0x519   : > { %3958 = vrot.lane.b32.xlu1 %v8552_v31, %s9117_s17  ;;  %v3799_v34 = vpop.permute.xlu2 %3798  ;;  %s4368_s17 = sshll.u32 %s4642_s28, 6 }
 0x51a   : > { %v3751_v48 = vpop.permute.xlu1 %3750 }
 0x51b   : > { %v3882_v2 = vsel %vm1873_vm5, %v8376_v29, %v3751_v48 }
 0x51c   : > { %v3890_v11 = vsel %vm1882_vm7, %v3882_v2, %v3775_v14 }
 0x51d   : > { %v8612_v3 = vsel %vm1891_vm8, %v3890_v11, %v3799_v34  ;;  %4022 = vrot.lane.b32.xlu0 %v9553_v59, %s4655_s16 }
 0x51f   : > { %3994 = vrot.lane.b32.xlu2 %v9584_v0, %s9119_s0  ;;  %v3815_v54 = vpop.permute.xlu0 %3814 }
 0x521   : > { %3972 = vrot.lane.b32.xlu1 %v8535_v10, %s9110_s23  ;;  %v3805_v62 = vpop.permute.xlu2 %3804 }
 0x522   : > { %v3757_v19 = vpop.permute.xlu1 %3756 }
 0x523   : > { %v3885_v29 = vsel %vm1873_vm5, %v8429_v5, %v3757_v19 }
 0x524   : > { %v3893_v30 = vsel %vm1882_vm7, %v3885_v29, %v3781_v38 }
 0x525   : > { %v8624_v58 = vsel %vm1891_vm8, %v3893_v30, %v3805_v62  ;;  %4028 = vrot.lane.b32.xlu0 %v9572_v37, %s4655_s16 }
 0x527   : > { %4000 = vrot.lane.b32.xlu2 %v8530_v16, %s9119_s0  ;;  %v3821_v1 = vpop.permute.xlu0 %3820 }
 0x529   : > { %3978 = vrot.lane.b32.xlu1 %v8557_v20, %s9110_s23  ;;  %v3819_v42 = vpop.permute.xlu2 %3818 }
 0x52a   : > { %v3771_v52 = vpop.permute.xlu1 %3770 }
 0x52b   : > { %v3888_v5 = vsel %vm1882_vm7, %v8508_v9, %v3771_v52 }
 0x52c   : > { %v3896_v13 = vsel %vm1891_vm8, %v3888_v5, %v3795_v36  ;;  %v9588_v36 = vld [vmem:[#allocation130_spill] sm:$0xff] }
 0x52d   : > { %v8636_v8 = vsel %vm1900_vm9, %v3896_v13, %v3819_v42  ;;  %4042 = vrot.lane.b32.xlu0 %v9584_v0, %s9090_s15 }
 0x52f   : > { %4006 = vrot.lane.b32.xlu2 %v8552_v31, %s9119_s0  ;;  %v3827_v22 = vpop.permute.xlu0 %3826 }
 0x531   : > { %3984 = vrot.lane.b32.xlu1 %v8574_v41, %s9110_s23  ;;  %v3825_v47 = vpop.permute.xlu2 %3824 }
 0x533   : > { %v3777_v14 = vpop.permute.xlu1 %3776 }
 0x534   : > { %v3891_v9 = vsel %vm1882_vm7, %v8533_v17, %v3777_v14 }
 0x535   : > { %v3899_v27 = vsel %vm1891_vm8, %v3891_v9, %v3801_v40  ;;  %4048 = vrot.lane.b32.xlu0 %v8530_v16, %s9090_s15 }
 0x536   : > { %v8648_v51 = vsel %vm1900_vm9, %v3899_v27, %v3825_v47 }
 0x537   : > { %4020 = vrot.lane.b32.xlu2 %v8535_v10, %s4655_s16  ;;  %v3841_v28 = vpop.permute.xlu0 %3840 }
 0x539   : > { %3998 = vrot.lane.b32.xlu1 %v9553_v59, %s9119_s0  ;;  %v3839_v18 = vpop.permute.xlu2 %3838 }
 0x53b   : > { %v3791_v43 = vpop.permute.xlu1 %3790 }
 0x53c   : > { %v3894_v17 = vsel %vm1891_vm8, %v8555_v39, %v3791_v43 }
 0x53d   : > { %v3902_v7 = vsel %vm1900_vm9, %v3894_v17, %v3815_v54  ;;  %4054 = vrot.lane.b32.xlu0 %v8552_v31, %s9090_s15 }
 0x53e   : > { %v3910_v38 = vsel %vm1909_vm10, %v3902_v7, %v3839_v18  ;;  %v9589_v18 = vld [vmem:[#allocation106_spill] sm:$0xff] }
 0x53f   : > { %4026 = vrot.lane.b32.xlu2 %v8557_v20, %s4655_s16  ;;  %v3847_v46 = vpop.permute.xlu0 %3846  ;;  %v3922_v26 = vmul.f32 %v3910_v38, %v9588_v36 }
 0x541   : > { %4004 = vrot.lane.b32.xlu1 %v9572_v37, %s9119_s0  ;;  %v3845_v61 = vpop.permute.xlu2 %3844  ;;  %v8678_v45 = vadd.f32 %v3922_v26, %v8259_v32  ;;  %s498_s0 = sand.u32 1, %s4634_s26  }
 0x542   : > { %s4187_s28 = scalar_lea.sflag [#allocation3], %s498_s0 }
 0x543   : > { %v3797_v60 = vpop.permute.xlu1 %3796 }
 0x544   : > { %v3897_v56 = vsel %vm1891_vm8, %v8572_v49, %v3797_v60 }
 0x545   : > { %v3905_v39 = vsel %vm1900_vm9, %v3897_v56, %v3821_v1  ;;  %4068 = vrot.lane.b32.xlu0 %v8535_v10, %s9115_s14  ;;  %v9591_v56 = vld [vmem:[#allocation20_spill] sm:$0xff] }
 0x546   : > { %v3913_v12 = vsel %vm1909_vm10, %v3905_v39, %v3845_v61  ;;  %v9590_v61 = vld [vmem:[#allocation11_spill] sm:$0xff] }
 0x547   : > { %4032 = vrot.lane.b32.xlu2 %v8574_v41, %s4655_s16  ;;  %v3853_v23 = vpop.permute.xlu0 %3852  ;;  %v3925_v2 = vmul.f32 %v3913_v12, %v8277_v55 }
 0x549   : > { %4018 = vrot.lane.b32.xlu1 %v9584_v0, %s4655_s16  ;;  %v3851_v57 = vpop.permute.xlu2 %3850 }
 0x54b   : > { %v3803_v49 = vpop.permute.xlu1 %3802 }
 0x54c   : > { %v3900_v40 = vsel %vm1891_vm8, %v8588_v50, %v3803_v49  ;;  %v8694_v50 = vadd.f32 %v3925_v2, %v8413_v15 }
 0x54d   : > { %v3908_v34 = vsel %vm1900_vm9, %v3900_v40, %v3827_v22  ;;  %4074 = vrot.lane.b32.xlu0 %v8557_v20, %s9115_s14 }
 0x54e   : > { %v3916_v48 = vsel %vm1909_vm10, %v3908_v34, %v3851_v57 }
 0x54f   : > { %4046 = vrot.lane.b32.xlu2 %v9553_v59, %s9090_s15  ;;  %v3951_v32 = vpop.permute.xlu0 %3950  ;;  %v3928_v55 = vmul.f32 %v3916_v48, %v8391_v21 }
 0x551   : > { %4024 = vrot.lane.b32.xlu1 %v8530_v16, %s4655_s16  ;;  %v8691_v11 = vpop.permute.xlu2 %3948 }
 0x553   : > { %v3817_v54 = vpop.permute.xlu1 %3816 }
 0x554   : > { %v3903_v62 = vsel %vm1900_vm9, %v8600_v44, %v3817_v54  ;;  %v8710_v44 = vadd.f32 %v3928_v55, %v8513_v53 }
 0x555   : > { %v3911_v19 = vsel %vm1909_vm10, %v3903_v62, %v3841_v28  ;;  %4080 = vrot.lane.b32.xlu0 %v8574_v41, %s9115_s14 }
 0x556   : > { %v3923_v29 = vmul.f32 %v3911_v19, %v8230_v35 }
 0x557   : > { %4052 = vrot.lane.b32.xlu2 %v9572_v37, %s9090_s15  ;;  %v3957_v15 = vpop.permute.xlu0 %3956 }
 0x558   : > { %v8716_v52 = vadd.f32 %v3923_v29, %v8304_v25  ;;  %v4119_v17 = vsel %vm1178_vm4, %v9572_v37, %v3957_v15 }
 0x559   : > { %4030 = vrot.lane.b32.xlu1 %v8552_v31, %s4655_s16  ;;  %v8707_v30 = vpop.permute.xlu2 %3954  ;;  %s4328_s16 = sshll.u32 %s498_s0, 6 }
 0x55b   : > { %v3823_v1 = vpop.permute.xlu1 %3822 }
 0x55c   : > { %v3906_v35 = vsel %vm1900_vm9, %v8612_v3, %v3823_v1 }
 0x55d   : > { %v3914_v42 = vsel %vm1909_vm10, %v3906_v35, %v3847_v46  ;;  %4094 = vrot.lane.b32.xlu0 %v9553_v59, %s9099_s22 }
 0x55e   : > { %v3926_v21 = vmul.f32 %v3914_v42, %v8343_v4 }
 0x55f   : > { %4066 = vrot.lane.b32.xlu2 %v9584_v0, %s9115_s14  ;;  %v3971_v53 = vpop.permute.xlu0 %3970 }
 0x560   : > { %v8738_v47 = vadd.f32 %v3926_v21, %v8431_v33 }
 0x561   : > { %4044 = vrot.lane.b32.xlu1 %v8535_v10, %s9090_s15  ;;  %v8725_v5 = vpop.permute.xlu2 %3960 }
 0x563   : > { %v3829_v3 = vpop.permute.xlu1 %3828 }
 0x564   : > { %v3909_v13 = vsel %vm1900_vm9, %v8624_v58, %v3829_v3  ;;  %v4116_v58 = vsel %vm1178_vm4, %v9553_v59, %v3951_v32 }
 0x565   : > { %v3917_v25 = vsel %vm1909_vm10, %v3909_v13, %v3853_v23  ;;  %4100 = vrot.lane.b32.xlu0 %v9572_v37, %s9099_s22 }
 0x566   : > { %v3929_v4 = vmul.f32 %v8461_v6, %v3917_v25 }
 0x567   : > { %4072 = vrot.lane.b32.xlu2 %v8530_v16, %s9115_s14  ;;  %v3977_v22 = vpop.permute.xlu0 %3976 }
 0x568   : > { %v8756_v33 = vadd.f32 %v3929_v4, %v8522_v63 }
 0x569   : > { %4050 = vrot.lane.b32.xlu1 %v8557_v20, %s9090_s15  ;;  %v3975_v14 = vpop.permute.xlu2 %3974 }
 0x56a   : > { %v8743_v6 = vsel %vm1864_vm6, %v4116_v58, %v3975_v14 }
 0x56b   : > { %v3843_v9 = vpop.permute.xlu1 %3842 }
 0x56c   : > { %v3912_v27 = vsel %vm1909_vm10, %v8636_v8, %v3843_v9 }
 0x56d   : > { %v3924_v28 = vmul.f32 %v3912_v27, %v7872_v24 }
 0x56f   : > { %v8749_v43 = vadd.f32 %v3924_v28, %v9589_v18  ;;  %4078 = vrot.lane.b32.xlu2 %v8552_v31, %s9115_s14  ;;  %v3983_v7 = vpop.permute.xlu0 %3982  ;;  %v4115_v18 = vsel %vm1178_vm4, %v8535_v10, %v8691_v11 }
 0x571   : > { %4056 = vrot.lane.b32.xlu1 %v8574_v41, %s9090_s15  ;;  %v3981_v38 = vpop.permute.xlu2 %3980  ;;  %s4592_s15 = scalar_lea.hbm %s8957_s13, 128 }
 0x572   : > { %v8761_v24 = vsel %vm1864_vm6, %v4119_v17, %v3981_v38 }
 0x573   : > { %v3849_v8 = vpop.permute.xlu1 %3848 }
 0x574   : > { %v3915_v46 = vsel %vm1909_vm10, %v8648_v51, %v3849_v8 }
 0x575   : > { %v3927_v60 = vmul.f32 %v3915_v46, %v9590_v61 }
 0x577   : > { %v8767_v39 = vadd.f32 %v3927_v60, %v9591_v56  ;;  %4092 = vrot.lane.b32.xlu2 %v8535_v10, %s9099_s22  ;;  %v3997_v36 = vpop.permute.xlu0 %3996  ;;  %v4118_v60 = vsel %vm1178_vm4, %v8557_v20, %v8707_v30 }
 0x579   : > { %4070 = vrot.lane.b32.xlu1 %v9553_v59, %s9115_s14  ;;  %v3995_v63 = vpop.permute.xlu2 %3994 }
 0x57b   : > { %v3947_v12 = vpop.permute.xlu1 %3946 }
 0x57c   : > { %v4114_v26 = vsel %vm1178_vm4, %v9584_v0, %v3947_v12 }
 0x57d   : > { %v4122_v23 = vsel %vm1864_vm6, %v4114_v26, %v3971_v53 }
 0x57e   : > { %v8777_v51 = vsel %vm1873_vm5, %v4122_v23, %v3995_v63 }
 0x57f   : > { %4098 = vrot.lane.b32.xlu2 %v8557_v20, %s9099_s22  ;;  %v4003_v34 = vpop.permute.xlu0 %4002 }
 0x581   : > { %4076 = vrot.lane.b32.xlu1 %v9572_v37, %s9115_s14  ;;  %v4001_v57 = vpop.permute.xlu2 %4000  ;;  %s4200_s14 = scalar_lea.hbm %s8957_s13, %s4368_s17 }
 0x582   : > { %s4203_s3 = sshll.u32 %s4200_s14, 4  ;;  %s4204_s3 = int_to_ptr.hbm [resolvable:$true] %s4203_s3 }
 0x583   : > { %v3953_v49 = vpop.permute.xlu1 %3952  ;;  %s4586_s19 = sshra.s32 %s4204_s3, 4  ;;  %s4587_s19 = int_to_ptr.hbm [resolvable:$true] %s4586_s19 }
 0x584   : > { %v4117_v59 = vsel %vm1178_vm4, %v8530_v16, %v3953_v49  ;;  %s4588_s24 = scalar_lea.hbm %s4587_s19, 64  ;;  %p4593_p1 = scmp.lt.s32.totalorder %s4587_s19, %s8957_s13 }
 0x585   : > { %v4125_v40 = vsel %vm1864_vm6, %v4117_v59, %v3977_v22  ;;  %p4589_p12 = scmp.ne.s32.totalorder %s4587_s19, %s4588_s24  ;;  %p4594_p2 = scmp.lt.s32.totalorder %s4592_s15, %s4588_s24 }
 0x586   : > { %v8787_v48 = vsel %vm1873_vm5, %v4125_v40, %v4001_v57  ;;  %v4121_v57 = vsel %vm1178_vm4, %v8574_v41, %v8725_v5 }
 0x587   : > { %4104 = vrot.lane.b32.xlu2 %v8574_v41, %s9099_s22  ;;  %v4009_v19 = vpop.permute.xlu0 %4008  ;;  %p4590_p13 = pnand %p4589_p12, %p4779_p4  ;;  %p4595_p3 = por %p4594_p2, %p4593_p1 }
 0x589   : > { %4090 = vrot.lane.b32.xlu1 %v9584_v0, %s9099_s22  ;;  %v4007_v2 = vpop.permute.xlu2 %4006  ;;  %p4591_p0 = pneg %p4590_p13 }
 0x58b   : > { %v3959_v32 = vpop.permute.xlu1 %3958  ;;  %p4596_p5 = pnand %p4595_p3, %p4591_p0 }
 0x58c   : > { %v4120_v37 = vsel %vm1178_vm4, %v8552_v31, %v3959_v32 }
 0x58d   : > { %v4128_v54 = vsel %vm1864_vm6, %v4120_v37, %v3983_v7 }
 0x58e   : > { %v8797_v62 = vsel %vm1873_vm5, %v4128_v54, %v4007_v2 }
 0x58f   : > { %v4023_v0 = vpop.permute.xlu0 %4022 }
 0x591   : > { %4096 = vrot.lane.b32.xlu1 %v8530_v16, %s9099_s22  ;;  %v4021_v29 = vpop.permute.xlu2 %4020 }
 0x593   : > { %v3973_v55 = vpop.permute.xlu1 %3972 }
 0x594   : > { %v4123_v7 = vsel %vm1864_vm6, %v4115_v18, %v3973_v55 }
 0x595   : > { %v4131_v38 = vsel %vm1873_vm5, %v4123_v7, %v3997_v36 }
 0x596   : > { %v4139_v46 = vsel %vm1882_vm7, %v4131_v38, %v4021_v29 }
 0x597   : > { %v8803_v21 = vpop.permute.xlu0 %4028 }
 0x599   : > { %4102 = vrot.lane.b32.xlu1 %v8552_v31, %s9099_s22  ;;  %v4027_v15 = vpop.permute.xlu2 %4026  ;;  %s8839_s22 = scalar_lea.vmem [#allocation2], %s4328_s16 }
 0x59a   : > { %s4201_s1 = sshll.u32 %s8839_s22, 4  ;;  %s4202_s1 = int_to_ptr.vmem [resolvable:$true] %s4201_s1 }
 0x59b   : > { %v3979_v1 = vpop.permute.xlu1 %3978 }
 0x59c   : > { %v4126_v10 = vsel %vm1864_vm6, %v4118_v60, %v3979_v1 }
 0x59d   : > { %v4134_v26 = vsel %vm1873_vm5, %v4126_v10, %v4003_v34 }
 0x59e   : > { %v4142_v20 = vsel %vm1882_vm7, %v4134_v26, %v4027_v15 }
 0x59f   : > { %v8805_v13 = vpop.permute.xlu0 %4042 }
 0x5a1   : > { %v4033_v35 = vpop.permute.xlu2 %4032 }
 0x5a3   : > { %v3985_v42 = vpop.permute.xlu1 %3984 }
 0x5a4   : > { %v4129_v59 = vsel %vm1864_vm6, %v4121_v57, %v3985_v42 }
 0x5a5   : > { %v4137_v2 = vsel %vm1873_vm5, %v4129_v59, %v4009_v19 }
 0x5a6   : > { %v4145_v37 = vsel %vm1882_vm7, %v4137_v2, %v4033_v35 }
 0x5a7   : > { %v8807_v16 = vpop.permute.xlu0 %4048 }
 0x5a9   : > { %v4047_v53 = vpop.permute.xlu2 %4046 }
 0x5ab   : > { %v3999_v3 = vpop.permute.xlu1 %3998 }
 0x5ac   : > { %v4132_v5 = vsel %vm1873_vm5, %v8743_v6, %v3999_v3 }
 0x5ad   : > { %v4140_v19 = vsel %vm1882_vm7, %v4132_v5, %v4023_v0 }
 0x5ae   : > { %v4148_v35 = vsel %vm1891_vm8, %v4140_v19, %v4047_v53 }
 0x5af   : > { %v8811_v58 = vpop.permute.xlu0 %4054 }
 0x5b1   : > { %v4053_v25 = vpop.permute.xlu2 %4052 }
 0x5b3   : > { %v4005_v4 = vpop.permute.xlu1 %4004 }
 0x5b4   : > { %v4135_v6 = vsel %vm1873_vm5, %v8761_v24, %v4005_v4 }
 0x5b7   : > { %v4069_v17 = vpop.permute.xlu0 %4068 }
 0x5b9   : > { %v8809_v22 = vpop.permute.xlu2 %4066 }
 0x5bb   : > { %v4019_v31 = vpop.permute.xlu1 %4018 }
 0x5bf   : > { %v4075_v63 = vpop.permute.xlu0 %4074 }
 0x5c1   : > { %v8813_v14 = vpop.permute.xlu2 %4072 }
 0x5c3   : > { %v8815_v9 = vpop.permute.xlu1 %4024 }
 0x5c7   : > { %v4081_v32 = vpop.permute.xlu0 %4080 }
 0x5c9   : > { %v8817_v27 = vpop.permute.xlu2 %4078 }
 0x5cb   : > { %v8819_v28 = vpop.permute.xlu1 %4030 }
 0x5cc   : > { %v4144_v60 = vsel %vm1882_vm7, %v8797_v62, %v8819_v28 }
 0x5cf   : > { %v4095_v1 = vpop.permute.xlu0 %4094 }
 0x5d1   : > { %v4093_v8 = vpop.permute.xlu2 %4092 }
 0x5d3   : > { %v4045_v61 = vpop.permute.xlu1 %4044 }
 0x5d4   : > { %v4147_v56 = vsel %vm1891_vm8, %v4139_v46, %v4045_v61 }
 0x5d5   : > { %v4155_v11 = vsel %vm1900_vm9, %v4147_v56, %v4069_v17 }
 0x5d6   : > { %v4163_v12 = vsel %vm1909_vm10, %v4155_v11, %v4093_v8  ;;  %v4138_v8 = vsel %vm1882_vm7, %v8777_v51, %v4019_v31  ;;  %v4141_v51 = vsel %vm1882_vm7, %v8787_v48, %v8815_v9 }
 0x5d7   : > { %v4171_v36 = vmul.f32 %v4163_v12, %v8716_v52  ;;  %v4101_v53 = vpop.permute.xlu0 %4100 }
 0x5d9   : > { %4179 = vst [vmem:[%s8839_s22 + $0x8] sm:$0xff] %v4171_v36  ;;  %v4099_v23 = vpop.permute.xlu2 %4098 }
 0x5db   : > { %v4051_v30 = vpop.permute.xlu1 %4050 }
 0x5dc   : > { %v4150_v49 = vsel %vm1891_vm8, %v4142_v20, %v4051_v30 }
 0x5dd   : > { %v4158_v52 = vsel %vm1900_vm9, %v4150_v49, %v4075_v63 }
 0x5de   : > { %v4166_v40 = vsel %vm1909_vm10, %v4158_v52, %v4099_v23 }
 0x5df   : > { %v4174_v34 = vmul.f32 %v4166_v40, %v8738_v47 }
 0x5e1   : > { %4182 = vst [vmem:[%s8839_s22 + $0x20] sm:$0xff] %v4174_v34  ;;  %v4105_v29 = vpop.permute.xlu2 %4104 }
 0x5e3   : > { %v4057_v54 = vpop.permute.xlu1 %4056 }
 0x5e4   : > { %v4153_v41 = vsel %vm1891_vm8, %v4145_v37, %v4057_v54 }
 0x5e5   : > { %v4161_v55 = vsel %vm1900_vm9, %v4153_v41, %v4081_v32 }
 0x5e6   : > { %v4169_v15 = vsel %vm1909_vm10, %v4161_v55, %v4105_v29 }
 0x5e7   : > { %v4177_v47 = vmul.f32 %v4169_v15, %v8756_v33  ;;  %v4143_v33 = vsel %vm1882_vm7, %v4135_v6, %v8803_v21 }
 0x5e8   : > { %v4151_v0 = vsel %vm1891_vm8, %v4143_v33, %v4053_v25 }
 0x5e9   : > { %4185 = vst [vmem:[%s8839_s22 + $0x38] sm:$0xff] %v4177_v47 }
 0x5eb   : > { %v4071_v42 = vpop.permute.xlu1 %4070 }
 0x5ec   : > { %v4156_v18 = vsel %vm1900_vm9, %v4148_v35, %v4071_v42 }
 0x5ed   : > { %v4164_v3 = vsel %vm1909_vm10, %v4156_v18, %v4095_v1 }
 0x5ee   : > { %v4172_v17 = vmul.f32 %v4164_v3, %v8749_v43  ;;  %v4146_v43 = vsel %vm1891_vm8, %v4138_v8, %v8805_v13 }
 0x5ef   : > { %v4154_v21 = vsel %vm1900_vm9, %v4146_v43, %v8809_v22 }
 0x5f0   : > { %4180 = vst [vmem:[%s8839_s22 + $0x10] sm:$0xff] %v4172_v17 }
 0x5f3   : > { %v4077_v7 = vpop.permute.xlu1 %4076 }
 0x5f4   : > { %v4159_v38 = vsel %vm1900_vm9, %v4151_v0, %v4077_v7 }
 0x5f5   : > { %v4167_v24 = vsel %vm1909_vm10, %v4159_v38, %v4101_v53 }
 0x5f6   : > { %v4175_v4 = vmul.f32 %v4167_v24, %v8767_v39  ;;  %v4149_v39 = vsel %vm1891_vm8, %v4141_v51, %v8807_v16 }
 0x5f7   : > { %v4157_v13 = vsel %vm1900_vm9, %v4149_v39, %v8813_v14 }
 0x5f8   : > { %4183 = vst [vmem:[%s8839_s22 + $0x28] sm:$0xff] %v4175_v4 }
 0x5fb   : > { %v4091_v25 = vpop.permute.xlu1 %4090 }
 0x5fc   : > { %v4162_v46 = vsel %vm1909_vm10, %v4154_v21, %v4091_v25 }
 0x5fd   : > { %v4170_v31 = vmul.f32 %v4162_v46, %v8678_v45  ;;  %v4152_v45 = vsel %vm1891_vm8, %v4144_v60, %v8811_v58 }
 0x5fe   : > { %v4160_v16 = vsel %vm1900_vm9, %v4152_v45, %v8817_v27 }
 0x5ff   : > { %4178 = vst [vmem:[%s8839_s22] sm:$0xff] %v4170_v31 }
 0x603   : > { %v4097_v61 = vpop.permute.xlu1 %4096 }
 0x604   : > { %v4165_v22 = vsel %vm1909_vm10, %v4157_v13, %v4097_v61 }
 0x605   : > { %v4173_v48 = vmul.f32 %v4165_v22, %v8694_v50 }
 0x607   : > { %4181 = vst [vmem:[%s8839_s22 + $0x18] sm:$0xff] %v4173_v48 }
 0x60b   : > { %v4103_v14 = vpop.permute.xlu1 %4102 }
 0x60c   : > { %v4168_v9 = vsel %vm1909_vm10, %v4160_v16, %v4103_v14 }
 0x60d   : > { %v4176_v50 = vmul.f32 %v4168_v9, %v8710_v44 }
 0x60f   : > { %4184 = vst [vmem:[%s8839_s22 + $0x30] sm:$0xff] %v4176_v50 }
 0x610   : > { %4599 = shalt.err (!%p4596_p5)
}
 0x611   : > { %s4667_s0 = smov 128   ;;  %s4668_s22 = smov 8  }
 0x612   : > { %4373 = dma.vmem_to_hbm [thread:$0]  (%p4779_p4), %s4202_s1, 1024, %s4204_s3, %s4187_s28, %s4667_s0, %s4667_s0, %s4668_s22  }
 0x613 PF: > { %p4379_p6 = scmp.ge.s32.totalorder %s4650_s30, 2  ;;  %s4218_s16 = sand.u32 1, %s4630_s25  }
 0x614   : > { %s4219_s17 = scalar_lea.sflag [#allocation3], %s4218_s16 }
 0x615   : > { %p4376_p7 = pnand %p4379_p6, %p4786_p8 }
 0x617   : > { %p4377_p9 = pneg %p4376_p7 }
 0x619   : > { %4625 = dma.done.wait (%p4377_p9), %s4219_s17, 1024  }
 0x61a   : > { %4627 = vsyncadd (%p4377_p9), %s4219_s17, 4294966272  ;;  %s26_s30 = sadd.s32 1, %s4650_s30   ;;  %s9592_s18 = sld [smem:[#allocation5_spill]] }
 0x61b   : > { %p23_p10 = scmp.ge.s32.totalorder %s26_s30, 4   ;;  %s9593_s25 = smov %s4634_s26 }
 0x61c   : > { %s9594_s26 = smov %s4638_s27  ;;  %s9595_s27 = smov %s4792_s21 }
 0x61d   : > { %s9596_s28 = smov %s4646_s29  ;;  %25 = sbr.rel (!%p23_p10) target bundleno = 8 (0x8), region = 113 }
 0x620   : > { %s9597_s29 = smov %s9592_s18 }
 0x622   :  { %4225 = vsyncpa [#allocation3], 1 }
 0x623   :  { %4227 = vsyncpa [#allocation3 + $0x1], 1 }

</bundles_post_ra>
